<compile_context>
chip_gen: v7x
topology: tpu7x:2x2x1
jax: 0.10.0
libtpu: 0.0.40
codegen_flags: <defaults>
</compile_context>

<pallas_src>
import functools

import numpy as np
import jax
import jax.numpy as jnp
from jax.experimental import pallas as pl
from jax.experimental.pallas import tpu as pltpu

N, C, H, W = 2, 8, 16, 16     # batch, channels, spatial (W*C == 128 lanes)
EPS = 1e-5                    # BatchNorm2d default eps
BIG = 1e30                    # magnitude of additive "-inf" for max-pool padding

# All nonzero row shifts (dh) used by any branch (conv taps, stage-2 taps, pools).
DH_LIST = (-4, -2, -1, 1, 2, 4)


def _mixed_op_kernel(x_ref, aw_ref, rmask_ref, cneg_ref, invnh_ref,
                     avgm_ref, s3m1_ref, s3m2_ref, s5m1_ref, s5m2_ref,
                     d3m_ref, d5m_ref, out_ref, *, w, c, dh_list):
    rows, lanes = x_ref.shape             # (N*H, W*C)
    x = x_ref[...]                        # f32
    dh_idx = {dh: i for i, dh in enumerate(dh_list)}
    inv_cnt = 1.0 / float(rows * w)       # 1 / (N*H*W)

    # ---- row-shift helpers (XLU sublane rolls; masks come from an input ref) ----
    def shift_rows(v, dh):                # result[r, :] == v[r + dh, :] (circular)
        return v if dh == 0 else pltpu.roll(v, (-dh) % rows, axis=0)

    def shift_mask(v, dh):                # circular shift + zero rows from outside the image
        if dh == 0:
            return v
        return shift_rows(v, dh) * rmask_ref[dh_idx[dh]]

    # ---- BatchNorm2d(affine=False), batch stats, arch weight folded into scale ----
    def chan_reduce(s):                   # (1, lanes) per-lane sums -> per-channel sums (lane-bcast)
        shift = c
        while shift < lanes:              # log-step lane all-reduce over the W positions of a channel
            s = s + pltpu.roll(s, shift, axis=1)
            shift *= 2
        return s

    def bn(v, scale):                     # v: f32 (rows, lanes)
        s1 = jnp.sum(v, axis=0, keepdims=True)
        s2 = jnp.sum(v * v, axis=0, keepdims=True)
        mean = chan_reduce(s1) * inv_cnt
        ex2 = chan_reduce(s2) * inv_cnt
        var = ex2 - mean * mean           # biased variance, f32 throughout
        return (v - mean) * (jax.lax.rsqrt(var + EPS) * scale)

    # ---- fused depthwise+pointwise conv: k row-shifted MXU matmuls ----
    def conv_stage(shifted_bf, m_ref, k, dil, pad):
        acc = None
        for ki in range(k):
            dh = ki * dil - pad
            t = jnp.dot(shifted_bf[dh], m_ref[ki],
                        preferred_element_type=jnp.float32)
            acc = t if acc is None else acc + t
        return acc

    def make_shifts_bf(v, dhs):           # shift+mask in f32, cast once per shift for the MXU
        return {dh: shift_mask(v, dh).astype(jnp.bfloat16) for dh in dhs}

    def sep_conv(x_bf, k, pad, m1_ref, m2_ref, scale):
        y = bn(conv_stage(x_bf, m1_ref, k, 1, pad), 1.0)
        y = jnp.maximum(y, 0.0)
        y_bf = make_shifts_bf(y, tuple(ki - pad for ki in range(k)))
        return bn(conv_stage(y_bf, m2_ref, k, 1, pad), scale)

    def dil_conv(x_bf, k, pad, m_ref, scale):
        return bn(conv_stage(x_bf, m_ref, k, 2, pad), scale)

    # ---- 3x3 pools, stride 1, padding 1 ----
    xs = {dh: shift_rows(x, dh) for dh in (-1, 0, 1)}
    rm = {dh: rmask_ref[dh_idx[dh]] for dh in (-1, 1)}            # (rows, 1)

    # avg-pool: row-sum the masked window, one MXU matmul folds col shifts + 1/nw
    vsum = xs[0] + xs[-1] * rm[-1] + xs[1] * rm[1]
    avg = jnp.dot(vsum.astype(jnp.bfloat16), avgm_ref[...],
                  preferred_element_type=jnp.float32) * invnh_ref[...]

    # max-pool: VPU add+max per tap with additive -BIG padding masks
    rneg = {dh: (rm[dh] - 1.0) * BIG for dh in (-1, 1)}           # 0 valid / -BIG invalid
    cneg = {-1: cneg_ref[0], 1: cneg_ref[1]}                      # (1, lanes)
    pmax = x                                                       # center tap always valid
    for dh in (-1, 0, 1):
        for dw in (-1, 0, 1):
            if dh == 0 and dw == 0:
                continue
            win = xs[dh] if dw == 0 else pltpu.roll(xs[dh], (-dw * c) % lanes, axis=1)
            if dh != 0 and dw != 0:
                win = win + (rneg[dh] + cneg[dw])
            elif dh != 0:
                win = win + rneg[dh]
            else:
                win = win + cneg[dw]
            pmax = jnp.maximum(pmax, win)

    # ---- conv branches share the shifted ReLU(x) windows ----
    xr = jnp.maximum(x, 0.0)
    xr_bf = make_shifts_bf(xr, (0,) + dh_list)

    # ---- weighted sum over primitives (arch weights folded into BN scales) ----
    out = aw_ref[3] * x                            # skip_connect (Identity)
    # primitive 0 ('none') contributes exactly zero -> omitted
    out = out + bn(pmax, aw_ref[1])                # max_pool_3x3 + BN
    out = out + bn(avg, aw_ref[2])                 # avg_pool_3x3 + BN
    out = out + sep_conv(xr_bf, 3, 1, s3m1_ref, s3m2_ref, aw_ref[4])
    out = out + sep_conv(xr_bf, 5, 2, s5m1_ref, s5m2_ref, aw_ref[5])
    out = out + dil_conv(xr_bf, 3, 2, d3m_ref, aw_ref[6])
    out = out + dil_conv(xr_bf, 5, 4, d5m_ref, aw_ref[7])
    out_ref[...] = out


# Learnable parameters in their "natural" (torch-equivalent) formats:
#   depthwise (k*k, C):   dw[ki*k+kj, ch] == torch_w[ch, 0, ki, kj]
#   pointwise (Cin,Cout): pw[ci, co]      == torch_w[co, ci, 0, 0]
def _fuse_dwpw(dw, pw, k, dil, pad, w, c):
    """Fuse depthwise tap weights, W shifts/masks and the 1x1 pointwise conv into
    k matrices M[ki] of shape (W*C, W*C): conv = sum_ki shift_rows(x, dh_ki) @ M[ki]."""
    dwn = np.asarray(dw, np.float32)
    pwn = np.asarray(pw, np.float32)
    wc = w * c
    mats = np.zeros((k, wc, wc), np.float32)
    for ki in range(k):
        for kj in range(k):
            d = kj * dil - pad
            blk = dwn[ki * k + kj][:, None] * pwn          # (C_in, C_out) = diag(dw_tap) @ pw
            for wo in range(w):
                wi = wo + d
                if 0 <= wi < w:
                    mats[ki, wi * c:(wi + 1) * c, wo * c:(wo + 1) * c] = blk
    return jnp.asarray(mats, dtype=jnp.bfloat16)


def _avg_pool_mat(w, c):
    """(W*C, W*C) matrix folding the 3-tap column sum, W-validity and the 1/nw
    (count_include_pad=False) column divisor of the 3x3 avg pool."""
    wc = w * c
    ws = np.arange(w)
    nw = 1.0 + (ws - 1 >= 0).astype(np.float32) + (ws + 1 < w).astype(np.float32)
    eye_c = np.eye(c, dtype=np.float32)
    m = np.zeros((wc, wc), np.float32)
    for dwj in (-1, 0, 1):
        for wo in range(w):
            wi = wo + dwj
            if 0 <= wi < w:
                m[wi * c:(wi + 1) * c, wo * c:(wo + 1) * c] += eye_c / nw[wo]
    return jnp.asarray(m, dtype=jnp.bfloat16)


def mixed_op(x_nchw, arch_weights, params):
    """x_nchw: (N, C, H, W) float32, arch_weights: (8,), params: dict of conv weights."""
    n, c, h, w = x_nchw.shape
    rows, lanes = n * h, w * c
    assert lanes == 128 and rows % 8 == 0 and (w & (w - 1)) == 0, \
        "demo kernel assumes lane-dense W*C == 128 and power-of-two W"

    # NCHW -> NHWC -> lane-dense (N*H, W*C)
    x2d = jnp.transpose(x_nchw, (0, 2, 3, 1)).astype(jnp.float32).reshape(rows, lanes)

    # ---- small constant tensors (must be kernel INPUTS: no captured constants) ----
    hh = np.arange(rows) % h
    rmask = np.stack([((hh + dh >= 0) & (hh + dh < h)).astype(np.float32)
                      for dh in DH_LIST]).reshape(len(DH_LIST), rows, 1)

    ww = np.repeat(np.arange(w), c)
    cneg = np.stack(
        [np.where((ww + dw >= 0) & (ww + dw < w), 0.0, -BIG).astype(np.float32)
         for dw in (-1, 1)]).reshape(2, 1, lanes)

    hs = np.arange(h)
    nh = 1.0 + (hs - 1 >= 0).astype(np.float32) + (hs + 1 < h).astype(np.float32)
    inv_nh = np.tile(1.0 / nh, n).reshape(rows, 1).astype(np.float32)

    # ---- fused weight matrices (bf16 MXU operands) ----
    avg_m = _avg_pool_mat(w, c)
    s3_m1 = _fuse_dwpw(params["s3_dw1"], params["s3_pw1"], 3, 1, 1, w, c)
    s3_m2 = _fuse_dwpw(params["s3_dw2"], params["s3_pw2"], 3, 1, 1, w, c)
    s5_m1 = _fuse_dwpw(params["s5_dw1"], params["s5_pw1"], 5, 1, 2, w, c)
    s5_m2 = _fuse_dwpw(params["s5_dw2"], params["s5_pw2"], 5, 1, 2, w, c)
    d3_m = _fuse_dwpw(params["d3_dw"], params["d3_pw"], 3, 2, 2, w, c)
    d5_m = _fuse_dwpw(params["d5_dw"], params["d5_pw"], 5, 2, 4, w, c)

    kernel = functools.partial(_mixed_op_kernel, w=w, c=c, dh_list=DH_LIST)
    vmem = pl.BlockSpec(memory_space=pltpu.MemorySpace.VMEM)
    smem = pl.BlockSpec(memory_space=pltpu.MemorySpace.SMEM)

    out2d = pl.pallas_call(
        kernel,
        out_shape=jax.ShapeDtypeStruct((rows, lanes), jnp.float32),
        in_specs=[vmem, smem] + [vmem] * 10,
        out_specs=vmem,
    )(x2d, arch_weights.astype(jnp.float32),
      jnp.asarray(rmask), jnp.asarray(cneg), jnp.asarray(inv_nh),
      avg_m, s3_m1, s3_m2, s5_m1, s5_m2, d3_m, d5_m)

    # (N*H, W*C) -> NHWC -> NCHW
    return jnp.transpose(out2d.reshape(n, h, w, c), (0, 3, 1, 2))


def _init_params(key, c):
    shapes = {
        "s3_dw1": (9, c),  "s3_pw1": (c, c), "s3_dw2": (9, c),  "s3_pw2": (c, c),
        "s5_dw1": (25, c), "s5_pw1": (c, c), "s5_dw2": (25, c), "s5_pw2": (c, c),
        "d3_dw": (9, c),   "d3_pw": (c, c),
        "d5_dw": (25, c),  "d5_pw": (c, c),
    }
    keys = jax.random.split(key, len(shapes))
    return {name: 0.2 * jax.random.normal(k, shp, jnp.float32)
            for (name, shp), k in zip(shapes.items(), keys)}


if __name__ == "__main__":
    root = jax.random.PRNGKey(0)
    k_x, k_w, k_p = jax.random.split(root, 3)

    x = jax.random.normal(k_x, (N, C, H, W), jnp.float32)          # PyTorch NCHW input
    arch_w = jax.nn.softmax(jax.random.normal(k_w, (8,), jnp.float32))
    params = _init_params(k_p, C)

    y = mixed_op(x, arch_w, params)
    y = jax.block_until_ready(y)

    assert y.shape == (N, C, H, W), y.shape
    assert bool(jnp.all(jnp.isfinite(y)))
    print("KERNEL_OK")
</pallas_src>

<mosaic_0001>
module attributes {stable_mosaic.version = 11 : i64} {
  func.func @_mixed_op_kernel(%arg0: memref<32x128xf32, #tpu.memory_space<vmem>>, %arg1: memref<8xf32, #tpu.memory_space<smem>>, %arg2: memref<6x32x1xf32, #tpu.memory_space<vmem>>, %arg3: memref<2x1x128xf32, #tpu.memory_space<vmem>>, %arg4: memref<32x1xf32, #tpu.memory_space<vmem>>, %arg5: memref<128x128xbf16, #tpu.memory_space<vmem>>, %arg6: memref<3x128x128xbf16, #tpu.memory_space<vmem>>, %arg7: memref<3x128x128xbf16, #tpu.memory_space<vmem>>, %arg8: memref<5x128x128xbf16, #tpu.memory_space<vmem>>, %arg9: memref<5x128x128xbf16, #tpu.memory_space<vmem>>, %arg10: memref<3x128x128xbf16, #tpu.memory_space<vmem>>, %arg11: memref<5x128x128xbf16, #tpu.memory_space<vmem>>, %arg12: memref<32x128xf32, #tpu.memory_space<vmem>>) attributes {dimension_semantics = [], scalar_prefetch = 0 : i64, scratch_operands = 0 : i64, tpu.core_type = #tpu.core_type<tc>} {
    %c0 = arith.constant 0 : index
    %c0_0 = arith.constant 0 : index
    %0 = vector.load %arg0[%c0, %c0_0] : memref<32x128xf32, #tpu.memory_space<vmem>>, vector<32x128xf32>
    %c1_i32 = arith.constant 1 : i32
    %1 = tpu.dynamic_rotate %0 by %c1_i32 dim 0 : vector<32x128xf32>, i32 -> vector<32x128xf32>
    %c31_i32 = arith.constant 31 : i32
    %2 = tpu.dynamic_rotate %0 by %c31_i32 dim 0 : vector<32x128xf32>, i32 -> vector<32x128xf32>
    %c2 = arith.constant 2 : index
    %c0_1 = arith.constant 0 : index
    %c0_2 = arith.constant 0 : index
    %3 = vector.load %arg2[%c2, %c0_1, %c0_2] : memref<6x32x1xf32, #tpu.memory_space<vmem>>, vector<1x32x1xf32>
    %4 = vector.shape_cast %3 : vector<1x32x1xf32> to vector<32x1xf32>
    %c3 = arith.constant 3 : index
    %c0_3 = arith.constant 0 : index
    %c0_4 = arith.constant 0 : index
    %5 = vector.load %arg2[%c3, %c0_3, %c0_4] : memref<6x32x1xf32, #tpu.memory_space<vmem>>, vector<1x32x1xf32>
    %6 = vector.shape_cast %5 : vector<1x32x1xf32> to vector<32x1xf32>
    %7 = vector.broadcast %4 : vector<32x1xf32> to vector<32x128xf32>
    %8 = arith.mulf %1, %7 : vector<32x128xf32>
    %9 = arith.addf %0, %8 : vector<32x128xf32>
    %10 = vector.broadcast %6 : vector<32x1xf32> to vector<32x128xf32>
    %11 = arith.mulf %2, %10 : vector<32x128xf32>
    %12 = arith.addf %9, %11 : vector<32x128xf32>
    %13 = arith.truncf %12 : vector<32x128xf32> to vector<32x128xbf16>
    %c0_5 = arith.constant 0 : index
    %c0_6 = arith.constant 0 : index
    %14 = vector.load %arg5[%c0_5, %c0_6] : memref<128x128xbf16, #tpu.memory_space<vmem>>, vector<128x128xbf16>
    %cst = arith.constant dense<0.000000e+00> : vector<32x128xf32>
    %15 = tpu.matmul %13, %14, %cst {dimension_numbers = #tpu.dot_dimension_numbers<[1], [0], [0], [1], [0, 0, 1, 1], [], []>} : vector<32x128xbf16>, vector<128x128xbf16>, vector<32x128xf32> -> vector<32x128xf32>
    %c0_7 = arith.constant 0 : index
    %c0_8 = arith.constant 0 : index
    %16 = vector.load %arg4[%c0_7, %c0_8] : memref<32x1xf32, #tpu.memory_space<vmem>>, vector<32x1xf32>
    %17 = vector.broadcast %16 : vector<32x1xf32> to vector<32x128xf32>
    %18 = arith.mulf %15, %17 : vector<32x128xf32>
    %cst_9 = arith.constant 1.000000e+00 : f32
    %19 = vector.broadcast %cst_9 : f32 to vector<32x1xf32>
    %20 = arith.subf %4, %19 : vector<32x1xf32>
    %cst_10 = arith.constant 1.000000e+30 : f32
    %21 = vector.broadcast %cst_10 : f32 to vector<32x1xf32>
    %22 = arith.mulf %20, %21 : vector<32x1xf32>
    %cst_11 = arith.constant 1.000000e+00 : f32
    %23 = vector.broadcast %cst_11 : f32 to vector<32x1xf32>
    %24 = arith.subf %6, %23 : vector<32x1xf32>
    %cst_12 = arith.constant 1.000000e+30 : f32
    %25 = vector.broadcast %cst_12 : f32 to vector<32x1xf32>
    %26 = arith.mulf %24, %25 : vector<32x1xf32>
    %c0_13 = arith.constant 0 : index
    %c0_14 = arith.constant 0 : index
    %c0_15 = arith.constant 0 : index
    %27 = vector.load %arg3[%c0_13, %c0_14, %c0_15] : memref<2x1x128xf32, #tpu.memory_space<vmem>>, vector<1x1x128xf32>
    %28 = vector.shape_cast %27 : vector<1x1x128xf32> to vector<1x128xf32>
    %c1 = arith.constant 1 : index
    %c0_16 = arith.constant 0 : index
    %c0_17 = arith.constant 0 : index
    %29 = vector.load %arg3[%c1, %c0_16, %c0_17] : memref<2x1x128xf32, #tpu.memory_space<vmem>>, vector<1x1x128xf32>
    %30 = vector.shape_cast %29 : vector<1x1x128xf32> to vector<1x128xf32>
    %c8_i32 = arith.constant 8 : i32
    %31 = tpu.dynamic_rotate %1 by %c8_i32 dim 1 : vector<32x128xf32>, i32 -> vector<32x128xf32>
    %32 = vector.broadcast %22 : vector<32x1xf32> to vector<32x128xf32>
    %33 = vector.broadcast %28 : vector<1x128xf32> to vector<32x128xf32>
    %34 = arith.addf %32, %33 : vector<32x128xf32>
    %35 = arith.addf %31, %34 : vector<32x128xf32>
    %36 = arith.maximumf %0, %35 : vector<32x128xf32>
    %37 = vector.broadcast %22 : vector<32x1xf32> to vector<32x128xf32>
    %38 = arith.addf %1, %37 : vector<32x128xf32>
    %39 = arith.maximumf %36, %38 : vector<32x128xf32>
    %c120_i32 = arith.constant 120 : i32
    %40 = tpu.dynamic_rotate %1 by %c120_i32 dim 1 : vector<32x128xf32>, i32 -> vector<32x128xf32>
    %41 = vector.broadcast %22 : vector<32x1xf32> to vector<32x128xf32>
    %42 = vector.broadcast %30 : vector<1x128xf32> to vector<32x128xf32>
    %43 = arith.addf %41, %42 : vector<32x128xf32>
    %44 = arith.addf %40, %43 : vector<32x128xf32>
    %45 = arith.maximumf %39, %44 : vector<32x128xf32>
    %c8_i32_18 = arith.constant 8 : i32
    %46 = tpu.dynamic_rotate %0 by %c8_i32_18 dim 1 : vector<32x128xf32>, i32 -> vector<32x128xf32>
    %47 = vector.broadcast %28 : vector<1x128xf32> to vector<32x128xf32>
    %48 = arith.addf %46, %47 : vector<32x128xf32>
    %49 = arith.maximumf %45, %48 : vector<32x128xf32>
    %c120_i32_19 = arith.constant 120 : i32
    %50 = tpu.dynamic_rotate %0 by %c120_i32_19 dim 1 : vector<32x128xf32>, i32 -> vector<32x128xf32>
    %51 = vector.broadcast %30 : vector<1x128xf32> to vector<32x128xf32>
    %52 = arith.addf %50, %51 : vector<32x128xf32>
    %53 = arith.maximumf %49, %52 : vector<32x128xf32>
    %c8_i32_20 = arith.constant 8 : i32
    %54 = tpu.dynamic_rotate %2 by %c8_i32_20 dim 1 : vector<32x128xf32>, i32 -> vector<32x128xf32>
    %55 = vector.broadcast %26 : vector<32x1xf32> to vector<32x128xf32>
    %56 = vector.broadcast %28 : vector<1x128xf32> to vector<32x128xf32>
    %57 = arith.addf %55, %56 : vector<32x128xf32>
    %58 = arith.addf %54, %57 : vector<32x128xf32>
    %59 = arith.maximumf %53, %58 : vector<32x128xf32>
    %60 = vector.broadcast %26 : vector<32x1xf32> to vector<32x128xf32>
    %61 = arith.addf %2, %60 : vector<32x128xf32>
    %62 = arith.maximumf %59, %61 : vector<32x128xf32>
    %c120_i32_21 = arith.constant 120 : i32
    %63 = tpu.dynamic_rotate %2 by %c120_i32_21 dim 1 : vector<32x128xf32>, i32 -> vector<32x128xf32>
    %64 = vector.broadcast %26 : vector<32x1xf32> to vector<32x128xf32>
    %65 = vector.broadcast %30 : vector<1x128xf32> to vector<32x128xf32>
    %66 = arith.addf %64, %65 : vector<32x128xf32>
    %67 = arith.addf %63, %66 : vector<32x128xf32>
    %68 = arith.maximumf %62, %67 : vector<32x128xf32>
    %cst_22 = arith.constant 0.000000e+00 : f32
    %69 = vector.broadcast %cst_22 : f32 to vector<32x128xf32>
    %70 = arith.maximumf %0, %69 : vector<32x128xf32>
    %71 = arith.truncf %70 : vector<32x128xf32> to vector<32x128xbf16>
    %c4_i32 = arith.constant 4 : i32
    %72 = tpu.dynamic_rotate %70 by %c4_i32 dim 0 : vector<32x128xf32>, i32 -> vector<32x128xf32>
    %c0_23 = arith.constant 0 : index
    %c0_24 = arith.constant 0 : index
    %c0_25 = arith.constant 0 : index
    %73 = vector.load %arg2[%c0_23, %c0_24, %c0_25] : memref<6x32x1xf32, #tpu.memory_space<vmem>>, vector<1x32x1xf32>
    %74 = vector.shape_cast %73 : vector<1x32x1xf32> to vector<32x1xf32>
    %75 = vector.broadcast %74 : vector<32x1xf32> to vector<32x128xf32>
    %76 = arith.mulf %72, %75 : vector<32x128xf32>
    %77 = arith.truncf %76 : vector<32x128xf32> to vector<32x128xbf16>
    %c2_i32 = arith.constant 2 : i32
    %78 = tpu.dynamic_rotate %70 by %c2_i32 dim 0 : vector<32x128xf32>, i32 -> vector<32x128xf32>
    %c1_26 = arith.constant 1 : index
    %c0_27 = arith.constant 0 : index
    %c0_28 = arith.constant 0 : index
    %79 = vector.load %arg2[%c1_26, %c0_27, %c0_28] : memref<6x32x1xf32, #tpu.memory_space<vmem>>, vector<1x32x1xf32>
    %80 = vector.shape_cast %79 : vector<1x32x1xf32> to vector<32x1xf32>
    %81 = vector.broadcast %80 : vector<32x1xf32> to vector<32x128xf32>
    %82 = arith.mulf %78, %81 : vector<32x128xf32>
    %83 = arith.truncf %82 : vector<32x128xf32> to vector<32x128xbf16>
    %c1_i32_29 = arith.constant 1 : i32
    %84 = tpu.dynamic_rotate %70 by %c1_i32_29 dim 0 : vector<32x128xf32>, i32 -> vector<32x128xf32>
    %c2_30 = arith.constant 2 : index
    %c0_31 = arith.constant 0 : index
    %c0_32 = arith.constant 0 : index
    %85 = vector.load %arg2[%c2_30, %c0_31, %c0_32] : memref<6x32x1xf32, #tpu.memory_space<vmem>>, vector<1x32x1xf32>
    %86 = vector.shape_cast %85 : vector<1x32x1xf32> to vector<32x1xf32>
    %87 = vector.broadcast %86 : vector<32x1xf32> to vector<32x128xf32>
    %88 = arith.mulf %84, %87 : vector<32x128xf32>
    %89 = arith.truncf %88 : vector<32x128xf32> to vector<32x128xbf16>
    %c31_i32_33 = arith.constant 31 : i32
    %90 = tpu.dynamic_rotate %70 by %c31_i32_33 dim 0 : vector<32x128xf32>, i32 -> vector<32x128xf32>
    %c3_34 = arith.constant 3 : index
    %c0_35 = arith.constant 0 : index
    %c0_36 = arith.constant 0 : index
    %91 = vector.load %arg2[%c3_34, %c0_35, %c0_36] : memref<6x32x1xf32, #tpu.memory_space<vmem>>, vector<1x32x1xf32>
    %92 = vector.shape_cast %91 : vector<1x32x1xf32> to vector<32x1xf32>
    %93 = vector.broadcast %92 : vector<32x1xf32> to vector<32x128xf32>
    %94 = arith.mulf %90, %93 : vector<32x128xf32>
    %95 = arith.truncf %94 : vector<32x128xf32> to vector<32x128xbf16>
    %c30_i32 = arith.constant 30 : i32
    %96 = tpu.dynamic_rotate %70 by %c30_i32 dim 0 : vector<32x128xf32>, i32 -> vector<32x128xf32>
    %c4 = arith.constant 4 : index
    %c0_37 = arith.constant 0 : index
    %c0_38 = arith.constant 0 : index
    %97 = vector.load %arg2[%c4, %c0_37, %c0_38] : memref<6x32x1xf32, #tpu.memory_space<vmem>>, vector<1x32x1xf32>
    %98 = vector.shape_cast %97 : vector<1x32x1xf32> to vector<32x1xf32>
    %99 = vector.broadcast %98 : vector<32x1xf32> to vector<32x128xf32>
    %100 = arith.mulf %96, %99 : vector<32x128xf32>
    %101 = arith.truncf %100 : vector<32x128xf32> to vector<32x128xbf16>
    %c28_i32 = arith.constant 28 : i32
    %102 = tpu.dynamic_rotate %70 by %c28_i32 dim 0 : vector<32x128xf32>, i32 -> vector<32x128xf32>
    %c5 = arith.constant 5 : index
    %c0_39 = arith.constant 0 : index
    %c0_40 = arith.constant 0 : index
    %103 = vector.load %arg2[%c5, %c0_39, %c0_40] : memref<6x32x1xf32, #tpu.memory_space<vmem>>, vector<1x32x1xf32>
    %104 = vector.shape_cast %103 : vector<1x32x1xf32> to vector<32x1xf32>
    %105 = vector.broadcast %104 : vector<32x1xf32> to vector<32x128xf32>
    %106 = arith.mulf %102, %105 : vector<32x128xf32>
    %107 = arith.truncf %106 : vector<32x128xf32> to vector<32x128xbf16>
    %c3_41 = arith.constant 3 : index
    %108 = memref.load %arg1[%c3_41] : memref<8xf32, #tpu.memory_space<smem>>
    %109 = vector.broadcast %108 : f32 to vector<32x128xf32>
    %110 = arith.mulf %109, %0 : vector<32x128xf32>
    %c1_42 = arith.constant 1 : index
    %111 = memref.load %arg1[%c1_42] : memref<8xf32, #tpu.memory_space<smem>>
    %cst_43 = arith.constant dense<0.000000e+00> : vector<128xf32>
    %112 = vector.multi_reduction <add>, %68, %cst_43 [0] : vector<32x128xf32> to vector<128xf32>
    %113 = vector.shape_cast %112 : vector<128xf32> to vector<1x128xf32>
    %114 = arith.mulf %68, %68 : vector<32x128xf32>
    %cst_44 = arith.constant dense<0.000000e+00> : vector<128xf32>
    %115 = vector.multi_reduction <add>, %114, %cst_44 [0] : vector<32x128xf32> to vector<128xf32>
    %116 = vector.shape_cast %115 : vector<128xf32> to vector<1x128xf32>
    %c8_i32_45 = arith.constant 8 : i32
    %117 = tpu.dynamic_rotate %113 by %c8_i32_45 dim 1 : vector<1x128xf32>, i32 -> vector<1x128xf32>
    %118 = arith.addf %113, %117 : vector<1x128xf32>
    %c16_i32 = arith.constant 16 : i32
    %119 = tpu.dynamic_rotate %118 by %c16_i32 dim 1 : vector<1x128xf32>, i32 -> vector<1x128xf32>
    %120 = arith.addf %118, %119 : vector<1x128xf32>
    %c32_i32 = arith.constant 32 : i32
    %121 = tpu.dynamic_rotate %120 by %c32_i32 dim 1 : vector<1x128xf32>, i32 -> vector<1x128xf32>
    %122 = arith.addf %120, %121 : vector<1x128xf32>
    %c64_i32 = arith.constant 64 : i32
    %123 = tpu.dynamic_rotate %122 by %c64_i32 dim 1 : vector<1x128xf32>, i32 -> vector<1x128xf32>
    %124 = arith.addf %122, %123 : vector<1x128xf32>
    %cst_46 = arith.constant 0.001953125 : f32
    %125 = vector.broadcast %cst_46 : f32 to vector<1x128xf32>
    %126 = arith.mulf %124, %125 : vector<1x128xf32>
    %c8_i32_47 = arith.constant 8 : i32
    %127 = tpu.dynamic_rotate %116 by %c8_i32_47 dim 1 : vector<1x128xf32>, i32 -> vector<1x128xf32>
    %128 = arith.addf %116, %127 : vector<1x128xf32>
    %c16_i32_48 = arith.constant 16 : i32
    %129 = tpu.dynamic_rotate %128 by %c16_i32_48 dim 1 : vector<1x128xf32>, i32 -> vector<1x128xf32>
    %130 = arith.addf %128, %129 : vector<1x128xf32>
    %c32_i32_49 = arith.constant 32 : i32
    %131 = tpu.dynamic_rotate %130 by %c32_i32_49 dim 1 : vector<1x128xf32>, i32 -> vector<1x128xf32>
    %132 = arith.addf %130, %131 : vector<1x128xf32>
    %c64_i32_50 = arith.constant 64 : i32
    %133 = tpu.dynamic_rotate %132 by %c64_i32_50 dim 1 : vector<1x128xf32>, i32 -> vector<1x128xf32>
    %134 = arith.addf %132, %133 : vector<1x128xf32>
    %cst_51 = arith.constant 0.001953125 : f32
    %135 = vector.broadcast %cst_51 : f32 to vector<1x128xf32>
    %136 = arith.mulf %134, %135 : vector<1x128xf32>
    %137 = arith.mulf %126, %126 : vector<1x128xf32>
    %138 = arith.subf %136, %137 : vector<1x128xf32>
    %139 = vector.broadcast %126 : vector<1x128xf32> to vector<32x128xf32>
    %140 = arith.subf %68, %139 : vector<32x128xf32>
    %cst_52 = arith.constant 9.99999974E-6 : f32
    %141 = vector.broadcast %cst_52 : f32 to vector<1x128xf32>
    %142 = arith.addf %138, %141 : vector<1x128xf32>
    %143 = math.rsqrt %142 : vector<1x128xf32>
    %144 = vector.broadcast %111 : f32 to vector<1x128xf32>
    %145 = arith.mulf %143, %144 : vector<1x128xf32>
    %146 = vector.broadcast %145 : vector<1x128xf32> to vector<32x128xf32>
    %147 = arith.mulf %140, %146 : vector<32x128xf32>
    %148 = arith.addf %110, %147 : vector<32x128xf32>
    %c2_53 = arith.constant 2 : index
    %149 = memref.load %arg1[%c2_53] : memref<8xf32, #tpu.memory_space<smem>>
    %cst_54 = arith.constant dense<0.000000e+00> : vector<128xf32>
    %150 = vector.multi_reduction <add>, %18, %cst_54 [0] : vector<32x128xf32> to vector<128xf32>
    %151 = vector.shape_cast %150 : vector<128xf32> to vector<1x128xf32>
    %152 = arith.mulf %18, %18 : vector<32x128xf32>
    %cst_55 = arith.constant dense<0.000000e+00> : vector<128xf32>
    %153 = vector.multi_reduction <add>, %152, %cst_55 [0] : vector<32x128xf32> to vector<128xf32>
    %154 = vector.shape_cast %153 : vector<128xf32> to vector<1x128xf32>
    %c8_i32_56 = arith.constant 8 : i32
    %155 = tpu.dynamic_rotate %151 by %c8_i32_56 dim 1 : vector<1x128xf32>, i32 -> vector<1x128xf32>
    %156 = arith.addf %151, %155 : vector<1x128xf32>
    %c16_i32_57 = arith.constant 16 : i32
    %157 = tpu.dynamic_rotate %156 by %c16_i32_57 dim 1 : vector<1x128xf32>, i32 -> vector<1x128xf32>
    %158 = arith.addf %156, %157 : vector<1x128xf32>
    %c32_i32_58 = arith.constant 32 : i32
    %159 = tpu.dynamic_rotate %158 by %c32_i32_58 dim 1 : vector<1x128xf32>, i32 -> vector<1x128xf32>
    %160 = arith.addf %158, %159 : vector<1x128xf32>
    %c64_i32_59 = arith.constant 64 : i32
    %161 = tpu.dynamic_rotate %160 by %c64_i32_59 dim 1 : vector<1x128xf32>, i32 -> vector<1x128xf32>
    %162 = arith.addf %160, %161 : vector<1x128xf32>
    %cst_60 = arith.constant 0.001953125 : f32
    %163 = vector.broadcast %cst_60 : f32 to vector<1x128xf32>
    %164 = arith.mulf %162, %163 : vector<1x128xf32>
    %c8_i32_61 = arith.constant 8 : i32
    %165 = tpu.dynamic_rotate %154 by %c8_i32_61 dim 1 : vector<1x128xf32>, i32 -> vector<1x128xf32>
    %166 = arith.addf %154, %165 : vector<1x128xf32>
    %c16_i32_62 = arith.constant 16 : i32
    %167 = tpu.dynamic_rotate %166 by %c16_i32_62 dim 1 : vector<1x128xf32>, i32 -> vector<1x128xf32>
    %168 = arith.addf %166, %167 : vector<1x128xf32>
    %c32_i32_63 = arith.constant 32 : i32
    %169 = tpu.dynamic_rotate %168 by %c32_i32_63 dim 1 : vector<1x128xf32>, i32 -> vector<1x128xf32>
    %170 = arith.addf %168, %169 : vector<1x128xf32>
    %c64_i32_64 = arith.constant 64 : i32
    %171 = tpu.dynamic_rotate %170 by %c64_i32_64 dim 1 : vector<1x128xf32>, i32 -> vector<1x128xf32>
    %172 = arith.addf %170, %171 : vector<1x128xf32>
    %cst_65 = arith.constant 0.001953125 : f32
    %173 = vector.broadcast %cst_65 : f32 to vector<1x128xf32>
    %174 = arith.mulf %172, %173 : vector<1x128xf32>
    %175 = arith.mulf %164, %164 : vector<1x128xf32>
    %176 = arith.subf %174, %175 : vector<1x128xf32>
    %177 = vector.broadcast %164 : vector<1x128xf32> to vector<32x128xf32>
    %178 = arith.subf %18, %177 : vector<32x128xf32>
    %cst_66 = arith.constant 9.99999974E-6 : f32
    %179 = vector.broadcast %cst_66 : f32 to vector<1x128xf32>
    %180 = arith.addf %176, %179 : vector<1x128xf32>
    %181 = math.rsqrt %180 : vector<1x128xf32>
    %182 = vector.broadcast %149 : f32 to vector<1x128xf32>
    %183 = arith.mulf %181, %182 : vector<1x128xf32>
    %184 = vector.broadcast %183 : vector<1x128xf32> to vector<32x128xf32>
    %185 = arith.mulf %178, %184 : vector<32x128xf32>
    %186 = arith.addf %148, %185 : vector<32x128xf32>
    %c4_67 = arith.constant 4 : index
    %187 = memref.load %arg1[%c4_67] : memref<8xf32, #tpu.memory_space<smem>>
    %c0_68 = arith.constant 0 : index
    %c0_69 = arith.constant 0 : index
    %c0_70 = arith.constant 0 : index
    %188 = vector.load %arg6[%c0_68, %c0_69, %c0_70] : memref<3x128x128xbf16, #tpu.memory_space<vmem>>, vector<1x128x128xbf16>
    %189 = vector.shape_cast %188 : vector<1x128x128xbf16> to vector<128x128xbf16>
    %cst_71 = arith.constant dense<0.000000e+00> : vector<32x128xf32>
    %190 = tpu.matmul %89, %189, %cst_71 {dimension_numbers = #tpu.dot_dimension_numbers<[1], [0], [0], [1], [0, 0, 1, 1], [], []>} : vector<32x128xbf16>, vector<128x128xbf16>, vector<32x128xf32> -> vector<32x128xf32>
    %c1_72 = arith.constant 1 : index
    %c0_73 = arith.constant 0 : index
    %c0_74 = arith.constant 0 : index
    %191 = vector.load %arg6[%c1_72, %c0_73, %c0_74] : memref<3x128x128xbf16, #tpu.memory_space<vmem>>, vector<1x128x128xbf16>
    %192 = vector.shape_cast %191 : vector<1x128x128xbf16> to vector<128x128xbf16>
    %cst_75 = arith.constant dense<0.000000e+00> : vector<32x128xf32>
    %193 = tpu.matmul %71, %192, %cst_75 {dimension_numbers = #tpu.dot_dimension_numbers<[1], [0], [0], [1], [0, 0, 1, 1], [], []>} : vector<32x128xbf16>, vector<128x128xbf16>, vector<32x128xf32> -> vector<32x128xf32>
    %194 = arith.addf %190, %193 : vector<32x128xf32>
    %c2_76 = arith.constant 2 : index
    %c0_77 = arith.constant 0 : index
    %c0_78 = arith.constant 0 : index
    %195 = vector.load %arg6[%c2_76, %c0_77, %c0_78] : memref<3x128x128xbf16, #tpu.memory_space<vmem>>, vector<1x128x128xbf16>
    %196 = vector.shape_cast %195 : vector<1x128x128xbf16> to vector<128x128xbf16>
    %cst_79 = arith.constant dense<0.000000e+00> : vector<32x128xf32>
    %197 = tpu.matmul %95, %196, %cst_79 {dimension_numbers = #tpu.dot_dimension_numbers<[1], [0], [0], [1], [0, 0, 1, 1], [], []>} : vector<32x128xbf16>, vector<128x128xbf16>, vector<32x128xf32> -> vector<32x128xf32>
    %198 = arith.addf %194, %197 : vector<32x128xf32>
    %cst_80 = arith.constant dense<0.000000e+00> : vector<128xf32>
    %199 = vector.multi_reduction <add>, %198, %cst_80 [0] : vector<32x128xf32> to vector<128xf32>
    %200 = vector.shape_cast %199 : vector<128xf32> to vector<1x128xf32>
    %201 = arith.mulf %198, %198 : vector<32x128xf32>
    %cst_81 = arith.constant dense<0.000000e+00> : vector<128xf32>
    %202 = vector.multi_reduction <add>, %201, %cst_81 [0] : vector<32x128xf32> to vector<128xf32>
    %203 = vector.shape_cast %202 : vector<128xf32> to vector<1x128xf32>
    %c8_i32_82 = arith.constant 8 : i32
    %204 = tpu.dynamic_rotate %200 by %c8_i32_82 dim 1 : vector<1x128xf32>, i32 -> vector<1x128xf32>
    %205 = arith.addf %200, %204 : vector<1x128xf32>
    %c16_i32_83 = arith.constant 16 : i32
    %206 = tpu.dynamic_rotate %205 by %c16_i32_83 dim 1 : vector<1x128xf32>, i32 -> vector<1x128xf32>
    %207 = arith.addf %205, %206 : vector<1x128xf32>
    %c32_i32_84 = arith.constant 32 : i32
    %208 = tpu.dynamic_rotate %207 by %c32_i32_84 dim 1 : vector<1x128xf32>, i32 -> vector<1x128xf32>
    %209 = arith.addf %207, %208 : vector<1x128xf32>
    %c64_i32_85 = arith.constant 64 : i32
    %210 = tpu.dynamic_rotate %209 by %c64_i32_85 dim 1 : vector<1x128xf32>, i32 -> vector<1x128xf32>
    %211 = arith.addf %209, %210 : vector<1x128xf32>
    %cst_86 = arith.constant 0.001953125 : f32
    %212 = vector.broadcast %cst_86 : f32 to vector<1x128xf32>
    %213 = arith.mulf %211, %212 : vector<1x128xf32>
    %c8_i32_87 = arith.constant 8 : i32
    %214 = tpu.dynamic_rotate %203 by %c8_i32_87 dim 1 : vector<1x128xf32>, i32 -> vector<1x128xf32>
    %215 = arith.addf %203, %214 : vector<1x128xf32>
    %c16_i32_88 = arith.constant 16 : i32
    %216 = tpu.dynamic_rotate %215 by %c16_i32_88 dim 1 : vector<1x128xf32>, i32 -> vector<1x128xf32>
    %217 = arith.addf %215, %216 : vector<1x128xf32>
    %c32_i32_89 = arith.constant 32 : i32
    %218 = tpu.dynamic_rotate %217 by %c32_i32_89 dim 1 : vector<1x128xf32>, i32 -> vector<1x128xf32>
    %219 = arith.addf %217, %218 : vector<1x128xf32>
    %c64_i32_90 = arith.constant 64 : i32
    %220 = tpu.dynamic_rotate %219 by %c64_i32_90 dim 1 : vector<1x128xf32>, i32 -> vector<1x128xf32>
    %221 = arith.addf %219, %220 : vector<1x128xf32>
    %cst_91 = arith.constant 0.001953125 : f32
    %222 = vector.broadcast %cst_91 : f32 to vector<1x128xf32>
    %223 = arith.mulf %221, %222 : vector<1x128xf32>
    %224 = arith.mulf %213, %213 : vector<1x128xf32>
    %225 = arith.subf %223, %224 : vector<1x128xf32>
    %226 = vector.broadcast %213 : vector<1x128xf32> to vector<32x128xf32>
    %227 = arith.subf %198, %226 : vector<32x128xf32>
    %cst_92 = arith.constant 9.99999974E-6 : f32
    %228 = vector.broadcast %cst_92 : f32 to vector<1x128xf32>
    %229 = arith.addf %225, %228 : vector<1x128xf32>
    %230 = math.rsqrt %229 : vector<1x128xf32>
    %cst_93 = arith.constant 1.000000e+00 : f32
    %231 = vector.broadcast %cst_93 : f32 to vector<1x128xf32>
    %232 = arith.mulf %230, %231 : vector<1x128xf32>
    %233 = vector.broadcast %232 : vector<1x128xf32> to vector<32x128xf32>
    %234 = arith.mulf %227, %233 : vector<32x128xf32>
    %cst_94 = arith.constant 0.000000e+00 : f32
    %235 = vector.broadcast %cst_94 : f32 to vector<32x128xf32>
    %236 = arith.maximumf %234, %235 : vector<32x128xf32>
    %c1_i32_95 = arith.constant 1 : i32
    %237 = tpu.dynamic_rotate %236 by %c1_i32_95 dim 0 : vector<32x128xf32>, i32 -> vector<32x128xf32>
    %c2_96 = arith.constant 2 : index
    %c0_97 = arith.constant 0 : index
    %c0_98 = arith.constant 0 : index
    %238 = vector.load %arg2[%c2_96, %c0_97, %c0_98] : memref<6x32x1xf32, #tpu.memory_space<vmem>>, vector<1x32x1xf32>
    %239 = vector.shape_cast %238 : vector<1x32x1xf32> to vector<32x1xf32>
    %240 = vector.broadcast %239 : vector<32x1xf32> to vector<32x128xf32>
    %241 = arith.mulf %237, %240 : vector<32x128xf32>
    %242 = arith.truncf %241 : vector<32x128xf32> to vector<32x128xbf16>
    %243 = arith.truncf %236 : vector<32x128xf32> to vector<32x128xbf16>
    %c31_i32_99 = arith.constant 31 : i32
    %244 = tpu.dynamic_rotate %236 by %c31_i32_99 dim 0 : vector<32x128xf32>, i32 -> vector<32x128xf32>
    %c3_100 = arith.constant 3 : index
    %c0_101 = arith.constant 0 : index
    %c0_102 = arith.constant 0 : index
    %245 = vector.load %arg2[%c3_100, %c0_101, %c0_102] : memref<6x32x1xf32, #tpu.memory_space<vmem>>, vector<1x32x1xf32>
    %246 = vector.shape_cast %245 : vector<1x32x1xf32> to vector<32x1xf32>
    %247 = vector.broadcast %246 : vector<32x1xf32> to vector<32x128xf32>
    %248 = arith.mulf %244, %247 : vector<32x128xf32>
    %249 = arith.truncf %248 : vector<32x128xf32> to vector<32x128xbf16>
    %c0_103 = arith.constant 0 : index
    %c0_104 = arith.constant 0 : index
    %c0_105 = arith.constant 0 : index
    %250 = vector.load %arg7[%c0_103, %c0_104, %c0_105] : memref<3x128x128xbf16, #tpu.memory_space<vmem>>, vector<1x128x128xbf16>
    %251 = vector.shape_cast %250 : vector<1x128x128xbf16> to vector<128x128xbf16>
    %cst_106 = arith.constant dense<0.000000e+00> : vector<32x128xf32>
    %252 = tpu.matmul %242, %251, %cst_106 {dimension_numbers = #tpu.dot_dimension_numbers<[1], [0], [0], [1], [0, 0, 1, 1], [], []>} : vector<32x128xbf16>, vector<128x128xbf16>, vector<32x128xf32> -> vector<32x128xf32>
    %c1_107 = arith.constant 1 : index
    %c0_108 = arith.constant 0 : index
    %c0_109 = arith.constant 0 : index
    %253 = vector.load %arg7[%c1_107, %c0_108, %c0_109] : memref<3x128x128xbf16, #tpu.memory_space<vmem>>, vector<1x128x128xbf16>
    %254 = vector.shape_cast %253 : vector<1x128x128xbf16> to vector<128x128xbf16>
    %cst_110 = arith.constant dense<0.000000e+00> : vector<32x128xf32>
    %255 = tpu.matmul %243, %254, %cst_110 {dimension_numbers = #tpu.dot_dimension_numbers<[1], [0], [0], [1], [0, 0, 1, 1], [], []>} : vector<32x128xbf16>, vector<128x128xbf16>, vector<32x128xf32> -> vector<32x128xf32>
    %256 = arith.addf %252, %255 : vector<32x128xf32>
    %c2_111 = arith.constant 2 : index
    %c0_112 = arith.constant 0 : index
    %c0_113 = arith.constant 0 : index
    %257 = vector.load %arg7[%c2_111, %c0_112, %c0_113] : memref<3x128x128xbf16, #tpu.memory_space<vmem>>, vector<1x128x128xbf16>
    %258 = vector.shape_cast %257 : vector<1x128x128xbf16> to vector<128x128xbf16>
    %cst_114 = arith.constant dense<0.000000e+00> : vector<32x128xf32>
    %259 = tpu.matmul %249, %258, %cst_114 {dimension_numbers = #tpu.dot_dimension_numbers<[1], [0], [0], [1], [0, 0, 1, 1], [], []>} : vector<32x128xbf16>, vector<128x128xbf16>, vector<32x128xf32> -> vector<32x128xf32>
    %260 = arith.addf %256, %259 : vector<32x128xf32>
    %cst_115 = arith.constant dense<0.000000e+00> : vector<128xf32>
    %261 = vector.multi_reduction <add>, %260, %cst_115 [0] : vector<32x128xf32> to vector<128xf32>
    %262 = vector.shape_cast %261 : vector<128xf32> to vector<1x128xf32>
    %263 = arith.mulf %260, %260 : vector<32x128xf32>
    %cst_116 = arith.constant dense<0.000000e+00> : vector<128xf32>
    %264 = vector.multi_reduction <add>, %263, %cst_116 [0] : vector<32x128xf32> to vector<128xf32>
    %265 = vector.shape_cast %264 : vector<128xf32> to vector<1x128xf32>
    %c8_i32_117 = arith.constant 8 : i32
    %266 = tpu.dynamic_rotate %262 by %c8_i32_117 dim 1 : vector<1x128xf32>, i32 -> vector<1x128xf32>
    %267 = arith.addf %262, %266 : vector<1x128xf32>
    %c16_i32_118 = arith.constant 16 : i32
    %268 = tpu.dynamic_rotate %267 by %c16_i32_118 dim 1 : vector<1x128xf32>, i32 -> vector<1x128xf32>
    %269 = arith.addf %267, %268 : vector<1x128xf32>
    %c32_i32_119 = arith.constant 32 : i32
    %270 = tpu.dynamic_rotate %269 by %c32_i32_119 dim 1 : vector<1x128xf32>, i32 -> vector<1x128xf32>
    %271 = arith.addf %269, %270 : vector<1x128xf32>
    %c64_i32_120 = arith.constant 64 : i32
    %272 = tpu.dynamic_rotate %271 by %c64_i32_120 dim 1 : vector<1x128xf32>, i32 -> vector<1x128xf32>
    %273 = arith.addf %271, %272 : vector<1x128xf32>
    %cst_121 = arith.constant 0.001953125 : f32
    %274 = vector.broadcast %cst_121 : f32 to vector<1x128xf32>
    %275 = arith.mulf %273, %274 : vector<1x128xf32>
    %c8_i32_122 = arith.constant 8 : i32
    %276 = tpu.dynamic_rotate %265 by %c8_i32_122 dim 1 : vector<1x128xf32>, i32 -> vector<1x128xf32>
    %277 = arith.addf %265, %276 : vector<1x128xf32>
    %c16_i32_123 = arith.constant 16 : i32
    %278 = tpu.dynamic_rotate %277 by %c16_i32_123 dim 1 : vector<1x128xf32>, i32 -> vector<1x128xf32>
    %279 = arith.addf %277, %278 : vector<1x128xf32>
    %c32_i32_124 = arith.constant 32 : i32
    %280 = tpu.dynamic_rotate %279 by %c32_i32_124 dim 1 : vector<1x128xf32>, i32 -> vector<1x128xf32>
    %281 = arith.addf %279, %280 : vector<1x128xf32>
    %c64_i32_125 = arith.constant 64 : i32
    %282 = tpu.dynamic_rotate %281 by %c64_i32_125 dim 1 : vector<1x128xf32>, i32 -> vector<1x128xf32>
    %283 = arith.addf %281, %282 : vector<1x128xf32>
    %cst_126 = arith.constant 0.001953125 : f32
    %284 = vector.broadcast %cst_126 : f32 to vector<1x128xf32>
    %285 = arith.mulf %283, %284 : vector<1x128xf32>
    %286 = arith.mulf %275, %275 : vector<1x128xf32>
    %287 = arith.subf %285, %286 : vector<1x128xf32>
    %288 = vector.broadcast %275 : vector<1x128xf32> to vector<32x128xf32>
    %289 = arith.subf %260, %288 : vector<32x128xf32>
    %cst_127 = arith.constant 9.99999974E-6 : f32
    %290 = vector.broadcast %cst_127 : f32 to vector<1x128xf32>
    %291 = arith.addf %287, %290 : vector<1x128xf32>
    %292 = math.rsqrt %291 : vector<1x128xf32>
    %293 = vector.broadcast %187 : f32 to vector<1x128xf32>
    %294 = arith.mulf %292, %293 : vector<1x128xf32>
    %295 = vector.broadcast %294 : vector<1x128xf32> to vector<32x128xf32>
    %296 = arith.mulf %289, %295 : vector<32x128xf32>
    %297 = arith.addf %186, %296 : vector<32x128xf32>
    %c5_128 = arith.constant 5 : index
    %298 = memref.load %arg1[%c5_128] : memref<8xf32, #tpu.memory_space<smem>>
    %c0_129 = arith.constant 0 : index
    %c0_130 = arith.constant 0 : index
    %c0_131 = arith.constant 0 : index
    %299 = vector.load %arg8[%c0_129, %c0_130, %c0_131] : memref<5x128x128xbf16, #tpu.memory_space<vmem>>, vector<1x128x128xbf16>
    %300 = vector.shape_cast %299 : vector<1x128x128xbf16> to vector<128x128xbf16>
    %cst_132 = arith.constant dense<0.000000e+00> : vector<32x128xf32>
    %301 = tpu.matmul %83, %300, %cst_132 {dimension_numbers = #tpu.dot_dimension_numbers<[1], [0], [0], [1], [0, 0, 1, 1], [], []>} : vector<32x128xbf16>, vector<128x128xbf16>, vector<32x128xf32> -> vector<32x128xf32>
    %c1_133 = arith.constant 1 : index
    %c0_134 = arith.constant 0 : index
    %c0_135 = arith.constant 0 : index
    %302 = vector.load %arg8[%c1_133, %c0_134, %c0_135] : memref<5x128x128xbf16, #tpu.memory_space<vmem>>, vector<1x128x128xbf16>
    %303 = vector.shape_cast %302 : vector<1x128x128xbf16> to vector<128x128xbf16>
    %cst_136 = arith.constant dense<0.000000e+00> : vector<32x128xf32>
    %304 = tpu.matmul %89, %303, %cst_136 {dimension_numbers = #tpu.dot_dimension_numbers<[1], [0], [0], [1], [0, 0, 1, 1], [], []>} : vector<32x128xbf16>, vector<128x128xbf16>, vector<32x128xf32> -> vector<32x128xf32>
    %305 = arith.addf %301, %304 : vector<32x128xf32>
    %c2_137 = arith.constant 2 : index
    %c0_138 = arith.constant 0 : index
    %c0_139 = arith.constant 0 : index
    %306 = vector.load %arg8[%c2_137, %c0_138, %c0_139] : memref<5x128x128xbf16, #tpu.memory_space<vmem>>, vector<1x128x128xbf16>
    %307 = vector.shape_cast %306 : vector<1x128x128xbf16> to vector<128x128xbf16>
    %cst_140 = arith.constant dense<0.000000e+00> : vector<32x128xf32>
    %308 = tpu.matmul %71, %307, %cst_140 {dimension_numbers = #tpu.dot_dimension_numbers<[1], [0], [0], [1], [0, 0, 1, 1], [], []>} : vector<32x128xbf16>, vector<128x128xbf16>, vector<32x128xf32> -> vector<32x128xf32>
    %309 = arith.addf %305, %308 : vector<32x128xf32>
    %c3_141 = arith.constant 3 : index
    %c0_142 = arith.constant 0 : index
    %c0_143 = arith.constant 0 : index
    %310 = vector.load %arg8[%c3_141, %c0_142, %c0_143] : memref<5x128x128xbf16, #tpu.memory_space<vmem>>, vector<1x128x128xbf16>
    %311 = vector.shape_cast %310 : vector<1x128x128xbf16> to vector<128x128xbf16>
    %cst_144 = arith.constant dense<0.000000e+00> : vector<32x128xf32>
    %312 = tpu.matmul %95, %311, %cst_144 {dimension_numbers = #tpu.dot_dimension_numbers<[1], [0], [0], [1], [0, 0, 1, 1], [], []>} : vector<32x128xbf16>, vector<128x128xbf16>, vector<32x128xf32> -> vector<32x128xf32>
    %313 = arith.addf %309, %312 : vector<32x128xf32>
    %c4_145 = arith.constant 4 : index
    %c0_146 = arith.constant 0 : index
    %c0_147 = arith.constant 0 : index
    %314 = vector.load %arg8[%c4_145, %c0_146, %c0_147] : memref<5x128x128xbf16, #tpu.memory_space<vmem>>, vector<1x128x128xbf16>
    %315 = vector.shape_cast %314 : vector<1x128x128xbf16> to vector<128x128xbf16>
    %cst_148 = arith.constant dense<0.000000e+00> : vector<32x128xf32>
    %316 = tpu.matmul %101, %315, %cst_148 {dimension_numbers = #tpu.dot_dimension_numbers<[1], [0], [0], [1], [0, 0, 1, 1], [], []>} : vector<32x128xbf16>, vector<128x128xbf16>, vector<32x128xf32> -> vector<32x128xf32>
    %317 = arith.addf %313, %316 : vector<32x128xf32>
    %cst_149 = arith.constant dense<0.000000e+00> : vector<128xf32>
    %318 = vector.multi_reduction <add>, %317, %cst_149 [0] : vector<32x128xf32> to vector<128xf32>
    %319 = vector.shape_cast %318 : vector<128xf32> to vector<1x128xf32>
    %320 = arith.mulf %317, %317 : vector<32x128xf32>
    %cst_150 = arith.constant dense<0.000000e+00> : vector<128xf32>
    %321 = vector.multi_reduction <add>, %320, %cst_150 [0] : vector<32x128xf32> to vector<128xf32>
    %322 = vector.shape_cast %321 : vector<128xf32> to vector<1x128xf32>
    %c8_i32_151 = arith.constant 8 : i32
    %323 = tpu.dynamic_rotate %319 by %c8_i32_151 dim 1 : vector<1x128xf32>, i32 -> vector<1x128xf32>
    %324 = arith.addf %319, %323 : vector<1x128xf32>
    %c16_i32_152 = arith.constant 16 : i32
    %325 = tpu.dynamic_rotate %324 by %c16_i32_152 dim 1 : vector<1x128xf32>, i32 -> vector<1x128xf32>
    %326 = arith.addf %324, %325 : vector<1x128xf32>
    %c32_i32_153 = arith.constant 32 : i32
    %327 = tpu.dynamic_rotate %326 by %c32_i32_153 dim 1 : vector<1x128xf32>, i32 -> vector<1x128xf32>
    %328 = arith.addf %326, %327 : vector<1x128xf32>
    %c64_i32_154 = arith.constant 64 : i32
    %329 = tpu.dynamic_rotate %328 by %c64_i32_154 dim 1 : vector<1x128xf32>, i32 -> vector<1x128xf32>
    %330 = arith.addf %328, %329 : vector<1x128xf32>
    %cst_155 = arith.constant 0.001953125 : f32
    %331 = vector.broadcast %cst_155 : f32 to vector<1x128xf32>
    %332 = arith.mulf %330, %331 : vector<1x128xf32>
    %c8_i32_156 = arith.constant 8 : i32
    %333 = tpu.dynamic_rotate %322 by %c8_i32_156 dim 1 : vector<1x128xf32>, i32 -> vector<1x128xf32>
    %334 = arith.addf %322, %333 : vector<1x128xf32>
    %c16_i32_157 = arith.constant 16 : i32
    %335 = tpu.dynamic_rotate %334 by %c16_i32_157 dim 1 : vector<1x128xf32>, i32 -> vector<1x128xf32>
    %336 = arith.addf %334, %335 : vector<1x128xf32>
    %c32_i32_158 = arith.constant 32 : i32
    %337 = tpu.dynamic_rotate %336 by %c32_i32_158 dim 1 : vector<1x128xf32>, i32 -> vector<1x128xf32>
    %338 = arith.addf %336, %337 : vector<1x128xf32>
    %c64_i32_159 = arith.constant 64 : i32
    %339 = tpu.dynamic_rotate %338 by %c64_i32_159 dim 1 : vector<1x128xf32>, i32 -> vector<1x128xf32>
    %340 = arith.addf %338, %339 : vector<1x128xf32>
    %cst_160 = arith.constant 0.001953125 : f32
    %341 = vector.broadcast %cst_160 : f32 to vector<1x128xf32>
    %342 = arith.mulf %340, %341 : vector<1x128xf32>
    %343 = arith.mulf %332, %332 : vector<1x128xf32>
    %344 = arith.subf %342, %343 : vector<1x128xf32>
    %345 = vector.broadcast %332 : vector<1x128xf32> to vector<32x128xf32>
    %346 = arith.subf %317, %345 : vector<32x128xf32>
    %cst_161 = arith.constant 9.99999974E-6 : f32
    %347 = vector.broadcast %cst_161 : f32 to vector<1x128xf32>
    %348 = arith.addf %344, %347 : vector<1x128xf32>
    %349 = math.rsqrt %348 : vector<1x128xf32>
    %cst_162 = arith.constant 1.000000e+00 : f32
    %350 = vector.broadcast %cst_162 : f32 to vector<1x128xf32>
    %351 = arith.mulf %349, %350 : vector<1x128xf32>
    %352 = vector.broadcast %351 : vector<1x128xf32> to vector<32x128xf32>
    %353 = arith.mulf %346, %352 : vector<32x128xf32>
    %cst_163 = arith.constant 0.000000e+00 : f32
    %354 = vector.broadcast %cst_163 : f32 to vector<32x128xf32>
    %355 = arith.maximumf %353, %354 : vector<32x128xf32>
    %c2_i32_164 = arith.constant 2 : i32
    %356 = tpu.dynamic_rotate %355 by %c2_i32_164 dim 0 : vector<32x128xf32>, i32 -> vector<32x128xf32>
    %c1_165 = arith.constant 1 : index
    %c0_166 = arith.constant 0 : index
    %c0_167 = arith.constant 0 : index
    %357 = vector.load %arg2[%c1_165, %c0_166, %c0_167] : memref<6x32x1xf32, #tpu.memory_space<vmem>>, vector<1x32x1xf32>
    %358 = vector.shape_cast %357 : vector<1x32x1xf32> to vector<32x1xf32>
    %359 = vector.broadcast %358 : vector<32x1xf32> to vector<32x128xf32>
    %360 = arith.mulf %356, %359 : vector<32x128xf32>
    %361 = arith.truncf %360 : vector<32x128xf32> to vector<32x128xbf16>
    %c1_i32_168 = arith.constant 1 : i32
    %362 = tpu.dynamic_rotate %355 by %c1_i32_168 dim 0 : vector<32x128xf32>, i32 -> vector<32x128xf32>
    %c2_169 = arith.constant 2 : index
    %c0_170 = arith.constant 0 : index
    %c0_171 = arith.constant 0 : index
    %363 = vector.load %arg2[%c2_169, %c0_170, %c0_171] : memref<6x32x1xf32, #tpu.memory_space<vmem>>, vector<1x32x1xf32>
    %364 = vector.shape_cast %363 : vector<1x32x1xf32> to vector<32x1xf32>
    %365 = vector.broadcast %364 : vector<32x1xf32> to vector<32x128xf32>
    %366 = arith.mulf %362, %365 : vector<32x128xf32>
    %367 = arith.truncf %366 : vector<32x128xf32> to vector<32x128xbf16>
    %368 = arith.truncf %355 : vector<32x128xf32> to vector<32x128xbf16>
    %c31_i32_172 = arith.constant 31 : i32
    %369 = tpu.dynamic_rotate %355 by %c31_i32_172 dim 0 : vector<32x128xf32>, i32 -> vector<32x128xf32>
    %c3_173 = arith.constant 3 : index
    %c0_174 = arith.constant 0 : index
    %c0_175 = arith.constant 0 : index
    %370 = vector.load %arg2[%c3_173, %c0_174, %c0_175] : memref<6x32x1xf32, #tpu.memory_space<vmem>>, vector<1x32x1xf32>
    %371 = vector.shape_cast %370 : vector<1x32x1xf32> to vector<32x1xf32>
    %372 = vector.broadcast %371 : vector<32x1xf32> to vector<32x128xf32>
    %373 = arith.mulf %369, %372 : vector<32x128xf32>
    %374 = arith.truncf %373 : vector<32x128xf32> to vector<32x128xbf16>
    %c30_i32_176 = arith.constant 30 : i32
    %375 = tpu.dynamic_rotate %355 by %c30_i32_176 dim 0 : vector<32x128xf32>, i32 -> vector<32x128xf32>
    %c4_177 = arith.constant 4 : index
    %c0_178 = arith.constant 0 : index
    %c0_179 = arith.constant 0 : index
    %376 = vector.load %arg2[%c4_177, %c0_178, %c0_179] : memref<6x32x1xf32, #tpu.memory_space<vmem>>, vector<1x32x1xf32>
    %377 = vector.shape_cast %376 : vector<1x32x1xf32> to vector<32x1xf32>
    %378 = vector.broadcast %377 : vector<32x1xf32> to vector<32x128xf32>
    %379 = arith.mulf %375, %378 : vector<32x128xf32>
    %380 = arith.truncf %379 : vector<32x128xf32> to vector<32x128xbf16>
    %c0_180 = arith.constant 0 : index
    %c0_181 = arith.constant 0 : index
    %c0_182 = arith.constant 0 : index
    %381 = vector.load %arg9[%c0_180, %c0_181, %c0_182] : memref<5x128x128xbf16, #tpu.memory_space<vmem>>, vector<1x128x128xbf16>
    %382 = vector.shape_cast %381 : vector<1x128x128xbf16> to vector<128x128xbf16>
    %cst_183 = arith.constant dense<0.000000e+00> : vector<32x128xf32>
    %383 = tpu.matmul %361, %382, %cst_183 {dimension_numbers = #tpu.dot_dimension_numbers<[1], [0], [0], [1], [0, 0, 1, 1], [], []>} : vector<32x128xbf16>, vector<128x128xbf16>, vector<32x128xf32> -> vector<32x128xf32>
    %c1_184 = arith.constant 1 : index
    %c0_185 = arith.constant 0 : index
    %c0_186 = arith.constant 0 : index
    %384 = vector.load %arg9[%c1_184, %c0_185, %c0_186] : memref<5x128x128xbf16, #tpu.memory_space<vmem>>, vector<1x128x128xbf16>
    %385 = vector.shape_cast %384 : vector<1x128x128xbf16> to vector<128x128xbf16>
    %cst_187 = arith.constant dense<0.000000e+00> : vector<32x128xf32>
    %386 = tpu.matmul %367, %385, %cst_187 {dimension_numbers = #tpu.dot_dimension_numbers<[1], [0], [0], [1], [0, 0, 1, 1], [], []>} : vector<32x128xbf16>, vector<128x128xbf16>, vector<32x128xf32> -> vector<32x128xf32>
    %387 = arith.addf %383, %386 : vector<32x128xf32>
    %c2_188 = arith.constant 2 : index
    %c0_189 = arith.constant 0 : index
    %c0_190 = arith.constant 0 : index
    %388 = vector.load %arg9[%c2_188, %c0_189, %c0_190] : memref<5x128x128xbf16, #tpu.memory_space<vmem>>, vector<1x128x128xbf16>
    %389 = vector.shape_cast %388 : vector<1x128x128xbf16> to vector<128x128xbf16>
    %cst_191 = arith.constant dense<0.000000e+00> : vector<32x128xf32>
    %390 = tpu.matmul %368, %389, %cst_191 {dimension_numbers = #tpu.dot_dimension_numbers<[1], [0], [0], [1], [0, 0, 1, 1], [], []>} : vector<32x128xbf16>, vector<128x128xbf16>, vector<32x128xf32> -> vector<32x128xf32>
    %391 = arith.addf %387, %390 : vector<32x128xf32>
    %c3_192 = arith.constant 3 : index
    %c0_193 = arith.constant 0 : index
    %c0_194 = arith.constant 0 : index
    %392 = vector.load %arg9[%c3_192, %c0_193, %c0_194] : memref<5x128x128xbf16, #tpu.memory_space<vmem>>, vector<1x128x128xbf16>
    %393 = vector.shape_cast %392 : vector<1x128x128xbf16> to vector<128x128xbf16>
    %cst_195 = arith.constant dense<0.000000e+00> : vector<32x128xf32>
    %394 = tpu.matmul %374, %393, %cst_195 {dimension_numbers = #tpu.dot_dimension_numbers<[1], [0], [0], [1], [0, 0, 1, 1], [], []>} : vector<32x128xbf16>, vector<128x128xbf16>, vector<32x128xf32> -> vector<32x128xf32>
    %395 = arith.addf %391, %394 : vector<32x128xf32>
    %c4_196 = arith.constant 4 : index
    %c0_197 = arith.constant 0 : index
    %c0_198 = arith.constant 0 : index
    %396 = vector.load %arg9[%c4_196, %c0_197, %c0_198] : memref<5x128x128xbf16, #tpu.memory_space<vmem>>, vector<1x128x128xbf16>
    %397 = vector.shape_cast %396 : vector<1x128x128xbf16> to vector<128x128xbf16>
    %cst_199 = arith.constant dense<0.000000e+00> : vector<32x128xf32>
    %398 = tpu.matmul %380, %397, %cst_199 {dimension_numbers = #tpu.dot_dimension_numbers<[1], [0], [0], [1], [0, 0, 1, 1], [], []>} : vector<32x128xbf16>, vector<128x128xbf16>, vector<32x128xf32> -> vector<32x128xf32>
    %399 = arith.addf %395, %398 : vector<32x128xf32>
    %cst_200 = arith.constant dense<0.000000e+00> : vector<128xf32>
    %400 = vector.multi_reduction <add>, %399, %cst_200 [0] : vector<32x128xf32> to vector<128xf32>
    %401 = vector.shape_cast %400 : vector<128xf32> to vector<1x128xf32>
    %402 = arith.mulf %399, %399 : vector<32x128xf32>
    %cst_201 = arith.constant dense<0.000000e+00> : vector<128xf32>
    %403 = vector.multi_reduction <add>, %402, %cst_201 [0] : vector<32x128xf32> to vector<128xf32>
    %404 = vector.shape_cast %403 : vector<128xf32> to vector<1x128xf32>
    %c8_i32_202 = arith.constant 8 : i32
    %405 = tpu.dynamic_rotate %401 by %c8_i32_202 dim 1 : vector<1x128xf32>, i32 -> vector<1x128xf32>
    %406 = arith.addf %401, %405 : vector<1x128xf32>
    %c16_i32_203 = arith.constant 16 : i32
    %407 = tpu.dynamic_rotate %406 by %c16_i32_203 dim 1 : vector<1x128xf32>, i32 -> vector<1x128xf32>
    %408 = arith.addf %406, %407 : vector<1x128xf32>
    %c32_i32_204 = arith.constant 32 : i32
    %409 = tpu.dynamic_rotate %408 by %c32_i32_204 dim 1 : vector<1x128xf32>, i32 -> vector<1x128xf32>
    %410 = arith.addf %408, %409 : vector<1x128xf32>
    %c64_i32_205 = arith.constant 64 : i32
    %411 = tpu.dynamic_rotate %410 by %c64_i32_205 dim 1 : vector<1x128xf32>, i32 -> vector<1x128xf32>
    %412 = arith.addf %410, %411 : vector<1x128xf32>
    %cst_206 = arith.constant 0.001953125 : f32
    %413 = vector.broadcast %cst_206 : f32 to vector<1x128xf32>
    %414 = arith.mulf %412, %413 : vector<1x128xf32>
    %c8_i32_207 = arith.constant 8 : i32
    %415 = tpu.dynamic_rotate %404 by %c8_i32_207 dim 1 : vector<1x128xf32>, i32 -> vector<1x128xf32>
    %416 = arith.addf %404, %415 : vector<1x128xf32>
    %c16_i32_208 = arith.constant 16 : i32
    %417 = tpu.dynamic_rotate %416 by %c16_i32_208 dim 1 : vector<1x128xf32>, i32 -> vector<1x128xf32>
    %418 = arith.addf %416, %417 : vector<1x128xf32>
    %c32_i32_209 = arith.constant 32 : i32
    %419 = tpu.dynamic_rotate %418 by %c32_i32_209 dim 1 : vector<1x128xf32>, i32 -> vector<1x128xf32>
    %420 = arith.addf %418, %419 : vector<1x128xf32>
    %c64_i32_210 = arith.constant 64 : i32
    %421 = tpu.dynamic_rotate %420 by %c64_i32_210 dim 1 : vector<1x128xf32>, i32 -> vector<1x128xf32>
    %422 = arith.addf %420, %421 : vector<1x128xf32>
    %cst_211 = arith.constant 0.001953125 : f32
    %423 = vector.broadcast %cst_211 : f32 to vector<1x128xf32>
    %424 = arith.mulf %422, %423 : vector<1x128xf32>
    %425 = arith.mulf %414, %414 : vector<1x128xf32>
    %426 = arith.subf %424, %425 : vector<1x128xf32>
    %427 = vector.broadcast %414 : vector<1x128xf32> to vector<32x128xf32>
    %428 = arith.subf %399, %427 : vector<32x128xf32>
    %cst_212 = arith.constant 9.99999974E-6 : f32
    %429 = vector.broadcast %cst_212 : f32 to vector<1x128xf32>
    %430 = arith.addf %426, %429 : vector<1x128xf32>
    %431 = math.rsqrt %430 : vector<1x128xf32>
    %432 = vector.broadcast %298 : f32 to vector<1x128xf32>
    %433 = arith.mulf %431, %432 : vector<1x128xf32>
    %434 = vector.broadcast %433 : vector<1x128xf32> to vector<32x128xf32>
    %435 = arith.mulf %428, %434 : vector<32x128xf32>
    %436 = arith.addf %297, %435 : vector<32x128xf32>
    %c6 = arith.constant 6 : index
    %437 = memref.load %arg1[%c6] : memref<8xf32, #tpu.memory_space<smem>>
    %c0_213 = arith.constant 0 : index
    %c0_214 = arith.constant 0 : index
    %c0_215 = arith.constant 0 : index
    %438 = vector.load %arg10[%c0_213, %c0_214, %c0_215] : memref<3x128x128xbf16, #tpu.memory_space<vmem>>, vector<1x128x128xbf16>
    %439 = vector.shape_cast %438 : vector<1x128x128xbf16> to vector<128x128xbf16>
    %cst_216 = arith.constant dense<0.000000e+00> : vector<32x128xf32>
    %440 = tpu.matmul %83, %439, %cst_216 {dimension_numbers = #tpu.dot_dimension_numbers<[1], [0], [0], [1], [0, 0, 1, 1], [], []>} : vector<32x128xbf16>, vector<128x128xbf16>, vector<32x128xf32> -> vector<32x128xf32>
    %c1_217 = arith.constant 1 : index
    %c0_218 = arith.constant 0 : index
    %c0_219 = arith.constant 0 : index
    %441 = vector.load %arg10[%c1_217, %c0_218, %c0_219] : memref<3x128x128xbf16, #tpu.memory_space<vmem>>, vector<1x128x128xbf16>
    %442 = vector.shape_cast %441 : vector<1x128x128xbf16> to vector<128x128xbf16>
    %cst_220 = arith.constant dense<0.000000e+00> : vector<32x128xf32>
    %443 = tpu.matmul %71, %442, %cst_220 {dimension_numbers = #tpu.dot_dimension_numbers<[1], [0], [0], [1], [0, 0, 1, 1], [], []>} : vector<32x128xbf16>, vector<128x128xbf16>, vector<32x128xf32> -> vector<32x128xf32>
    %444 = arith.addf %440, %443 : vector<32x128xf32>
    %c2_221 = arith.constant 2 : index
    %c0_222 = arith.constant 0 : index
    %c0_223 = arith.constant 0 : index
    %445 = vector.load %arg10[%c2_221, %c0_222, %c0_223] : memref<3x128x128xbf16, #tpu.memory_space<vmem>>, vector<1x128x128xbf16>
    %446 = vector.shape_cast %445 : vector<1x128x128xbf16> to vector<128x128xbf16>
    %cst_224 = arith.constant dense<0.000000e+00> : vector<32x128xf32>
    %447 = tpu.matmul %101, %446, %cst_224 {dimension_numbers = #tpu.dot_dimension_numbers<[1], [0], [0], [1], [0, 0, 1, 1], [], []>} : vector<32x128xbf16>, vector<128x128xbf16>, vector<32x128xf32> -> vector<32x128xf32>
    %448 = arith.addf %444, %447 : vector<32x128xf32>
    %cst_225 = arith.constant dense<0.000000e+00> : vector<128xf32>
    %449 = vector.multi_reduction <add>, %448, %cst_225 [0] : vector<32x128xf32> to vector<128xf32>
    %450 = vector.shape_cast %449 : vector<128xf32> to vector<1x128xf32>
    %451 = arith.mulf %448, %448 : vector<32x128xf32>
    %cst_226 = arith.constant dense<0.000000e+00> : vector<128xf32>
    %452 = vector.multi_reduction <add>, %451, %cst_226 [0] : vector<32x128xf32> to vector<128xf32>
    %453 = vector.shape_cast %452 : vector<128xf32> to vector<1x128xf32>
    %c8_i32_227 = arith.constant 8 : i32
    %454 = tpu.dynamic_rotate %450 by %c8_i32_227 dim 1 : vector<1x128xf32>, i32 -> vector<1x128xf32>
    %455 = arith.addf %450, %454 : vector<1x128xf32>
    %c16_i32_228 = arith.constant 16 : i32
    %456 = tpu.dynamic_rotate %455 by %c16_i32_228 dim 1 : vector<1x128xf32>, i32 -> vector<1x128xf32>
    %457 = arith.addf %455, %456 : vector<1x128xf32>
    %c32_i32_229 = arith.constant 32 : i32
    %458 = tpu.dynamic_rotate %457 by %c32_i32_229 dim 1 : vector<1x128xf32>, i32 -> vector<1x128xf32>
    %459 = arith.addf %457, %458 : vector<1x128xf32>
    %c64_i32_230 = arith.constant 64 : i32
    %460 = tpu.dynamic_rotate %459 by %c64_i32_230 dim 1 : vector<1x128xf32>, i32 -> vector<1x128xf32>
    %461 = arith.addf %459, %460 : vector<1x128xf32>
    %cst_231 = arith.constant 0.001953125 : f32
    %462 = vector.broadcast %cst_231 : f32 to vector<1x128xf32>
    %463 = arith.mulf %461, %462 : vector<1x128xf32>
    %c8_i32_232 = arith.constant 8 : i32
    %464 = tpu.dynamic_rotate %453 by %c8_i32_232 dim 1 : vector<1x128xf32>, i32 -> vector<1x128xf32>
    %465 = arith.addf %453, %464 : vector<1x128xf32>
    %c16_i32_233 = arith.constant 16 : i32
    %466 = tpu.dynamic_rotate %465 by %c16_i32_233 dim 1 : vector<1x128xf32>, i32 -> vector<1x128xf32>
    %467 = arith.addf %465, %466 : vector<1x128xf32>
    %c32_i32_234 = arith.constant 32 : i32
    %468 = tpu.dynamic_rotate %467 by %c32_i32_234 dim 1 : vector<1x128xf32>, i32 -> vector<1x128xf32>
    %469 = arith.addf %467, %468 : vector<1x128xf32>
    %c64_i32_235 = arith.constant 64 : i32
    %470 = tpu.dynamic_rotate %469 by %c64_i32_235 dim 1 : vector<1x128xf32>, i32 -> vector<1x128xf32>
    %471 = arith.addf %469, %470 : vector<1x128xf32>
    %cst_236 = arith.constant 0.001953125 : f32
    %472 = vector.broadcast %cst_236 : f32 to vector<1x128xf32>
    %473 = arith.mulf %471, %472 : vector<1x128xf32>
    %474 = arith.mulf %463, %463 : vector<1x128xf32>
    %475 = arith.subf %473, %474 : vector<1x128xf32>
    %476 = vector.broadcast %463 : vector<1x128xf32> to vector<32x128xf32>
    %477 = arith.subf %448, %476 : vector<32x128xf32>
    %cst_237 = arith.constant 9.99999974E-6 : f32
    %478 = vector.broadcast %cst_237 : f32 to vector<1x128xf32>
    %479 = arith.addf %475, %478 : vector<1x128xf32>
    %480 = math.rsqrt %479 : vector<1x128xf32>
    %481 = vector.broadcast %437 : f32 to vector<1x128xf32>
    %482 = arith.mulf %480, %481 : vector<1x128xf32>
    %483 = vector.broadcast %482 : vector<1x128xf32> to vector<32x128xf32>
    %484 = arith.mulf %477, %483 : vector<32x128xf32>
    %485 = arith.addf %436, %484 : vector<32x128xf32>
    %c7 = arith.constant 7 : index
    %486 = memref.load %arg1[%c7] : memref<8xf32, #tpu.memory_space<smem>>
    %c0_238 = arith.constant 0 : index
    %c0_239 = arith.constant 0 : index
    %c0_240 = arith.constant 0 : index
    %487 = vector.load %arg11[%c0_238, %c0_239, %c0_240] : memref<5x128x128xbf16, #tpu.memory_space<vmem>>, vector<1x128x128xbf16>
    %488 = vector.shape_cast %487 : vector<1x128x128xbf16> to vector<128x128xbf16>
    %cst_241 = arith.constant dense<0.000000e+00> : vector<32x128xf32>
    %489 = tpu.matmul %77, %488, %cst_241 {dimension_numbers = #tpu.dot_dimension_numbers<[1], [0], [0], [1], [0, 0, 1, 1], [], []>} : vector<32x128xbf16>, vector<128x128xbf16>, vector<32x128xf32> -> vector<32x128xf32>
    %c1_242 = arith.constant 1 : index
    %c0_243 = arith.constant 0 : index
    %c0_244 = arith.constant 0 : index
    %490 = vector.load %arg11[%c1_242, %c0_243, %c0_244] : memref<5x128x128xbf16, #tpu.memory_space<vmem>>, vector<1x128x128xbf16>
    %491 = vector.shape_cast %490 : vector<1x128x128xbf16> to vector<128x128xbf16>
    %cst_245 = arith.constant dense<0.000000e+00> : vector<32x128xf32>
    %492 = tpu.matmul %83, %491, %cst_245 {dimension_numbers = #tpu.dot_dimension_numbers<[1], [0], [0], [1], [0, 0, 1, 1], [], []>} : vector<32x128xbf16>, vector<128x128xbf16>, vector<32x128xf32> -> vector<32x128xf32>
    %493 = arith.addf %489, %492 : vector<32x128xf32>
    %c2_246 = arith.constant 2 : index
    %c0_247 = arith.constant 0 : index
    %c0_248 = arith.constant 0 : index
    %494 = vector.load %arg11[%c2_246, %c0_247, %c0_248] : memref<5x128x128xbf16, #tpu.memory_space<vmem>>, vector<1x128x128xbf16>
    %495 = vector.shape_cast %494 : vector<1x128x128xbf16> to vector<128x128xbf16>
    %cst_249 = arith.constant dense<0.000000e+00> : vector<32x128xf32>
    %496 = tpu.matmul %71, %495, %cst_249 {dimension_numbers = #tpu.dot_dimension_numbers<[1], [0], [0], [1], [0, 0, 1, 1], [], []>} : vector<32x128xbf16>, vector<128x128xbf16>, vector<32x128xf32> -> vector<32x128xf32>
    %497 = arith.addf %493, %496 : vector<32x128xf32>
    %c3_250 = arith.constant 3 : index
    %c0_251 = arith.constant 0 : index
    %c0_252 = arith.constant 0 : index
    %498 = vector.load %arg11[%c3_250, %c0_251, %c0_252] : memref<5x128x128xbf16, #tpu.memory_space<vmem>>, vector<1x128x128xbf16>
    %499 = vector.shape_cast %498 : vector<1x128x128xbf16> to vector<128x128xbf16>
    %cst_253 = arith.constant dense<0.000000e+00> : vector<32x128xf32>
    %500 = tpu.matmul %101, %499, %cst_253 {dimension_numbers = #tpu.dot_dimension_numbers<[1], [0], [0], [1], [0, 0, 1, 1], [], []>} : vector<32x128xbf16>, vector<128x128xbf16>, vector<32x128xf32> -> vector<32x128xf32>
    %501 = arith.addf %497, %500 : vector<32x128xf32>
    %c4_254 = arith.constant 4 : index
    %c0_255 = arith.constant 0 : index
    %c0_256 = arith.constant 0 : index
    %502 = vector.load %arg11[%c4_254, %c0_255, %c0_256] : memref<5x128x128xbf16, #tpu.memory_space<vmem>>, vector<1x128x128xbf16>
    %503 = vector.shape_cast %502 : vector<1x128x128xbf16> to vector<128x128xbf16>
    %cst_257 = arith.constant dense<0.000000e+00> : vector<32x128xf32>
    %504 = tpu.matmul %107, %503, %cst_257 {dimension_numbers = #tpu.dot_dimension_numbers<[1], [0], [0], [1], [0, 0, 1, 1], [], []>} : vector<32x128xbf16>, vector<128x128xbf16>, vector<32x128xf32> -> vector<32x128xf32>
    %505 = arith.addf %501, %504 : vector<32x128xf32>
    %cst_258 = arith.constant dense<0.000000e+00> : vector<128xf32>
    %506 = vector.multi_reduction <add>, %505, %cst_258 [0] : vector<32x128xf32> to vector<128xf32>
    %507 = vector.shape_cast %506 : vector<128xf32> to vector<1x128xf32>
    %508 = arith.mulf %505, %505 : vector<32x128xf32>
    %cst_259 = arith.constant dense<0.000000e+00> : vector<128xf32>
    %509 = vector.multi_reduction <add>, %508, %cst_259 [0] : vector<32x128xf32> to vector<128xf32>
    %510 = vector.shape_cast %509 : vector<128xf32> to vector<1x128xf32>
    %c8_i32_260 = arith.constant 8 : i32
    %511 = tpu.dynamic_rotate %507 by %c8_i32_260 dim 1 : vector<1x128xf32>, i32 -> vector<1x128xf32>
    %512 = arith.addf %507, %511 : vector<1x128xf32>
    %c16_i32_261 = arith.constant 16 : i32
    %513 = tpu.dynamic_rotate %512 by %c16_i32_261 dim 1 : vector<1x128xf32>, i32 -> vector<1x128xf32>
    %514 = arith.addf %512, %513 : vector<1x128xf32>
    %c32_i32_262 = arith.constant 32 : i32
    %515 = tpu.dynamic_rotate %514 by %c32_i32_262 dim 1 : vector<1x128xf32>, i32 -> vector<1x128xf32>
    %516 = arith.addf %514, %515 : vector<1x128xf32>
    %c64_i32_263 = arith.constant 64 : i32
    %517 = tpu.dynamic_rotate %516 by %c64_i32_263 dim 1 : vector<1x128xf32>, i32 -> vector<1x128xf32>
    %518 = arith.addf %516, %517 : vector<1x128xf32>
    %cst_264 = arith.constant 0.001953125 : f32
    %519 = vector.broadcast %cst_264 : f32 to vector<1x128xf32>
    %520 = arith.mulf %518, %519 : vector<1x128xf32>
    %c8_i32_265 = arith.constant 8 : i32
    %521 = tpu.dynamic_rotate %510 by %c8_i32_265 dim 1 : vector<1x128xf32>, i32 -> vector<1x128xf32>
    %522 = arith.addf %510, %521 : vector<1x128xf32>
    %c16_i32_266 = arith.constant 16 : i32
    %523 = tpu.dynamic_rotate %522 by %c16_i32_266 dim 1 : vector<1x128xf32>, i32 -> vector<1x128xf32>
    %524 = arith.addf %522, %523 : vector<1x128xf32>
    %c32_i32_267 = arith.constant 32 : i32
    %525 = tpu.dynamic_rotate %524 by %c32_i32_267 dim 1 : vector<1x128xf32>, i32 -> vector<1x128xf32>
    %526 = arith.addf %524, %525 : vector<1x128xf32>
    %c64_i32_268 = arith.constant 64 : i32
    %527 = tpu.dynamic_rotate %526 by %c64_i32_268 dim 1 : vector<1x128xf32>, i32 -> vector<1x128xf32>
    %528 = arith.addf %526, %527 : vector<1x128xf32>
    %cst_269 = arith.constant 0.001953125 : f32
    %529 = vector.broadcast %cst_269 : f32 to vector<1x128xf32>
    %530 = arith.mulf %528, %529 : vector<1x128xf32>
    %531 = arith.mulf %520, %520 : vector<1x128xf32>
    %532 = arith.subf %530, %531 : vector<1x128xf32>
    %533 = vector.broadcast %520 : vector<1x128xf32> to vector<32x128xf32>
    %534 = arith.subf %505, %533 : vector<32x128xf32>
    %cst_270 = arith.constant 9.99999974E-6 : f32
    %535 = vector.broadcast %cst_270 : f32 to vector<1x128xf32>
    %536 = arith.addf %532, %535 : vector<1x128xf32>
    %537 = math.rsqrt %536 : vector<1x128xf32>
    %538 = vector.broadcast %486 : f32 to vector<1x128xf32>
    %539 = arith.mulf %537, %538 : vector<1x128xf32>
    %540 = vector.broadcast %539 : vector<1x128xf32> to vector<32x128xf32>
    %541 = arith.mulf %534, %540 : vector<32x128xf32>
    %542 = arith.addf %485, %541 : vector<32x128xf32>
    %c0_271 = arith.constant 0 : index
    %c0_272 = arith.constant 0 : index
    %543 = vector.load %arg12[%c0_271, %c0_272] : memref<32x128xf32, #tpu.memory_space<vmem>>, vector<32x128xf32>
    tpu.vector_store %arg12[%c0_271, %c0_272], %542 {strides = array<i32>} : memref<32x128xf32, #tpu.memory_space<vmem>>, vector<32x128xf32>,
    return
  }
}

</mosaic_0001>

<bundles_post_ra>
// kernel: tpu_custom_call.1
= control target key start
LH: loop header
LB: loop body
LE: loop exit
PB: predicated region body
PF: predicated region fallthrough
CT: control target
= control target key end

     0   :  { %17 = vsyncpa [#allocation5], 0  ;;  %s7136_s0 = inlined_call_operand.vmem [shape: f32[32,128], index: 0, kind: input, shape index: {}]   ;;  %s7137_s1 = inlined_call_operand.vmem [shape: f32[8], index: 1, kind: input, shape index: {}]   ;;  %s7138_s2 = inlined_call_operand.vmem [shape: f32[6,32,1], index: 2, kind: input, shape index: {}]   ;;  %s7139_s3 = inlined_call_operand.vmem [shape: f32[2,1,128], index: 3, kind: input, shape index: {}]   ;;  %s7140_s4 = inlined_call_operand.vmem [shape: f32[32,1], index: 4, kind: input, shape index: {}]   ;;  %s7141_s5 = inlined_call_operand.hbm [shape: bf16[128,128], index: 5, kind: input, shape index: {}]   ;;  %s7142_s6 = inlined_call_operand.vmem [shape: bf16[3,128,128], index: 6, kind: input, shape index: {}]   ;;  %s7143_s7 = inlined_call_operand.hbm [shape: bf16[3,128,128], index: 7, kind: input, shape index: {}]   ;;  %s7144_s8 = inlined_call_operand.hbm [shape: bf16[5,128,128], index: 8, kind: input, shape index: {}]   ;;  %s7145_s9 = inlined_call_operand.hbm [shape: bf16[5,128,128], index: 9, kind: input, shape index: {}]   ;;  %s7146_s10 = inlined_call_operand.hbm [shape: bf16[3,128,128], index: 10, kind: input, shape index: {}]   ;;  %s7147_s11 = inlined_call_operand.hbm [shape: bf16[5,128,128], index: 11, kind: input, shape index: {}]   ;;  %s7148_s12 = inlined_call_operand.hbm [shape: f32[32,128], index: 12, kind: output, shape index: {}]  }
   0x1   :  { %18 = vsyncpa [#allocation3], 0 }
   0x2   :  { %19 = vsyncpa [#allocation8], 0 }
   0x3   :  { %20 = vsyncpa [#allocation11], 0 }
   0x4   :  { %21 = vsyncpa [#allocation14], 0 }
   0x5   :  { %22 = vsyncpa [#allocation4], 0  ;;  %s5765_s21 = smov [#allocation7]   ;;  %s5766_s23 = smov [#allocation10]  }
   0x6   :  { %s60_s22 = sshll.u32 %s5765_s21, 4  ;;  %s84_s24 = sshll.u32 %s5766_s23, 4  ;;  %s61_s22 = int_to_ptr.vmem [resolvable:$true] %s60_s22  ;;  %s5846_s24 = int_to_ptr.vmem [resolvable:$true] %s84_s24 }
   0x7   :  { %s5587_s27 = scalar_lea.hbm %s7143_s7, 3072 }
   0x8   :  { %p5588_p0 = scmp.ne.s32.totalorder %s7143_s7, %s5587_s27  ;;  %p5591_p1 = scmp.lt.u32.totalorder %s5587_s27, %s7143_s7 }
   0xa   :  { %p5593_p2 = pnand %p5591_p1, %p5588_p0 }
   0xc   :  { %5596 = shalt.err (!%p5593_p2)
}
   0xd   :  { %s5597_s14 = scalar_lea.vmem %s61_s22, 3072  ;;  %p5602_p4 = scmp.lt.s32.totalorder %s61_s22, %s61_s22 }
   0xe   :  { %p5598_p3 = scmp.ne.s32.totalorder %s61_s22, %s5597_s14  ;;  %p5603_p5 = scmp.lt.s32.totalorder %s5597_s14, %s5597_s14 }
  0x10   :  { %p5604_p6 = por %p5603_p5, %p5602_p4 }
  0x12   :  { %p5605_p7 = pnand %p5604_p6, %p5598_p3 }
  0x14   :  { %5608 = shalt.err (!%p5605_p7)
}
  0x15   :  { %s5767_s15 = smov 64   ;;  %s5768_s16 = smov 4  }
  0x16   :  { %66 = dma.hbm_to_vmem [thread:$0]  %s7143_s7, 3072, %s61_s22, [#allocation8], %s5767_s15, %s5767_s15, %s5768_s16  }
  0x17   :  { %s5609_s21 = scalar_lea.hbm %s7145_s9, 5120 }
  0x18   :  { %p5610_p8 = scmp.ne.s32.totalorder %s7145_s9, %s5609_s21  ;;  %p5613_p9 = scmp.lt.u32.totalorder %s5609_s21, %s7145_s9 }
  0x1a   :  { %p5615_p10 = pnand %p5613_p9, %p5610_p8 }
  0x1c   :  { %5618 = shalt.err (!%p5615_p10)
}
  0x1d   :  { %s5619_s28 = scalar_lea.vmem %s5846_s24, 5120  ;;  %p5624_p12 = scmp.lt.s32.totalorder %s5846_s24, %s5846_s24 }
  0x1e   :  { %p5620_p11 = scmp.ne.s32.totalorder %s5846_s24, %s5619_s28  ;;  %p5625_p13 = scmp.lt.s32.totalorder %s5619_s28, %s5619_s28 }
  0x20   :  { %p5626_p0 = por %p5625_p13, %p5624_p12 }
  0x22   :  { %p5627_p1 = pnand %p5626_p0, %p5620_p11 }
  0x24   :  { %5630 = shalt.err (!%p5627_p1)
}
  0x25   :  { %90 = dma.hbm_to_vmem [thread:$0]  %s7145_s9, 5120, %s5846_s24, [#allocation11], %s5767_s15, %s5767_s15, %s5768_s16  }
  0x26   :  { %s31_s13 = sshll.u32 %s7137_s1, 4  ;;  %s32_s13 = int_to_ptr.vmem [resolvable:$true] %s31_s13 }
  0x27   :  { %s5631_s14 = scalar_lea.vmem %s32_s13, 16  ;;  %p5636_p3 = scmp.lt.s32.totalorder %s32_s13, %s32_s13 }
  0x28   :  { %p5632_p2 = scmp.ne.s32.totalorder %s32_s13, %s5631_s14  ;;  %p5637_p4 = scmp.lt.s32.totalorder %s5631_s14, %s5631_s14 }
  0x2a   :  { %p5638_p5 = por %p5637_p4, %p5636_p3 }
  0x2c   :  { %p5639_p6 = pnand %p5638_p5, %p5632_p2 }
  0x2e   :  { %5642 = shalt.err (!%p5639_p6)
}
  0x2f   :  { %s5769_s17 = smov [#allocation2]   ;;  %s5770_s18 = smov [#allocation6]  }
  0x30   :  { %34 = dma.vmem_to_smem %s32_s13, 16, %s5769_s17, [#allocation5]  }
  0x31   :  { %s46_s19 = sshll.u32 %s5770_s18, 4  ;;  %s5771_s20 = smov [#allocation9]   ;;  %s47_s19 = int_to_ptr.vmem [resolvable:$true] %s46_s19 }
  0x32   :  { %s72_s21 = sshll.u32 %s5771_s20, 4  ;;  %s5643_s23 = scalar_lea.hbm %s7141_s5, 1024  ;;  %s73_s21 = int_to_ptr.vmem [resolvable:$true] %s72_s21 }
  0x33   :  { %p5644_p7 = scmp.ne.s32.totalorder %s7141_s5, %s5643_s23  ;;  %p5647_p8 = scmp.lt.u32.totalorder %s5643_s23, %s7141_s5 }
  0x35   :  { %p5649_p9 = pnand %p5647_p8, %p5644_p7 }
  0x37   :  { %5652 = shalt.err (!%p5649_p9)
}
  0x38   :  { %s5653_s28 = scalar_lea.vmem %s47_s19, 1024  ;;  %p5658_p11 = scmp.lt.s32.totalorder %s47_s19, %s47_s19 }
  0x39   :  { %p5654_p10 = scmp.ne.s32.totalorder %s47_s19, %s5653_s28  ;;  %p5659_p12 = scmp.lt.s32.totalorder %s5653_s28, %s5653_s28 }
  0x3b   :  { %p5660_p13 = por %p5659_p12, %p5658_p11 }
  0x3d   :  { %p5661_p0 = pnand %p5660_p13, %p5654_p10 }
  0x3f   :  { %5664 = shalt.err (!%p5661_p0)
}
  0x40   :  { %52 = dma.hbm_to_vmem [thread:$0]  %s7141_s5, 1024, %s47_s19, [#allocation3], %s5767_s15, %s5767_s15, %s5768_s16  }
  0x41   :  { %s5665_s13 = scalar_lea.hbm %s7144_s8, 5120 }
  0x42   :  { %p5666_p1 = scmp.ne.s32.totalorder %s7144_s8, %s5665_s13  ;;  %p5669_p2 = scmp.lt.u32.totalorder %s5665_s13, %s7144_s8 }
  0x44   :  { %p5671_p3 = pnand %p5669_p2, %p5666_p1 }
  0x46   :  { %5674 = shalt.err (!%p5671_p3)
}
  0x47   :  { %s5675_s9 = scalar_lea.vmem %s73_s21, 5120  ;;  %p5680_p5 = scmp.lt.s32.totalorder %s73_s21, %s73_s21 }
  0x48   :  { %p5676_p4 = scmp.ne.s32.totalorder %s73_s21, %s5675_s9  ;;  %p5681_p6 = scmp.lt.s32.totalorder %s5675_s9, %s5675_s9 }
  0x4a   :  { %p5682_p7 = por %p5681_p6, %p5680_p5 }
  0x4c   :  { %p5683_p8 = pnand %p5682_p7, %p5676_p4 }
  0x4e   :  { %5686 = shalt.err (!%p5683_p8)
}
  0x4f   :  { %78 = dma.hbm_to_vmem [thread:$0]  %s7144_s8, 5120, %s73_s21, [#allocation8], %s5767_s15, %s5767_s15, %s5768_s16  }
  0x50   :  { %s5772_s24 = smov [#allocation12]   ;;  %s5773_s1 = smov [#allocation13]  }
  0x51   :  { %s96_s23 = sshll.u32 %s5772_s24, 4  ;;  %s108_s25 = sshll.u32 %s5773_s1, 4  ;;  %s97_s23 = int_to_ptr.vmem [resolvable:$true] %s96_s23  ;;  %s109_s25 = int_to_ptr.vmem [resolvable:$true] %s108_s25 }
  0x52   :  { %s5687_s28 = scalar_lea.hbm %s7146_s10, 3072 }
  0x53   :  { %p5688_p9 = scmp.ne.s32.totalorder %s7146_s10, %s5687_s28  ;;  %p5691_p10 = scmp.lt.u32.totalorder %s5687_s28, %s7146_s10 }
  0x55   :  { %p5693_p11 = pnand %p5691_p10, %p5688_p9 }
  0x57   :  { %5696 = shalt.err (!%p5693_p11)
}
  0x58   :  { %s5697_s8 = scalar_lea.vmem %s97_s23, 3072  ;;  %p5702_p13 = scmp.lt.s32.totalorder %s97_s23, %s97_s23 }
  0x59   :  { %p5698_p12 = scmp.ne.s32.totalorder %s97_s23, %s5697_s8  ;;  %p5703_p0 = scmp.lt.s32.totalorder %s5697_s8, %s5697_s8 }
  0x5b   :  { %p5704_p1 = por %p5703_p0, %p5702_p13 }
  0x5d   :  { %p5705_p2 = pnand %p5704_p1, %p5698_p12 }
  0x5f   :  { %5708 = shalt.err (!%p5705_p2)
}
  0x60   :  { %102 = dma.hbm_to_vmem [thread:$0]  %s7146_s10, 3072, %s97_s23, [#allocation11], %s5767_s15, %s5767_s15, %s5768_s16  }
  0x61   :  { %s5709_s18 = scalar_lea.hbm %s7147_s11, 5120 }
  0x62   :  { %p5710_p3 = scmp.ne.s32.totalorder %s7147_s11, %s5709_s18  ;;  %p5713_p4 = scmp.lt.u32.totalorder %s5709_s18, %s7147_s11 }
  0x64   :  { %p5715_p5 = pnand %p5713_p4, %p5710_p3 }
  0x66   :  { %5718 = shalt.err (!%p5715_p5)
}
  0x67   :  { %s5719_s24 = scalar_lea.vmem %s109_s25, 5120  ;;  %p5724_p7 = scmp.lt.s32.totalorder %s109_s25, %s109_s25 }
  0x68   :  { %p5720_p6 = scmp.ne.s32.totalorder %s109_s25, %s5719_s24  ;;  %p5725_p8 = scmp.lt.s32.totalorder %s5719_s24, %s5719_s24 }
  0x6a   :  { %p5726_p9 = por %p5725_p8, %p5724_p7 }
  0x6c   :  { %p5727_p10 = pnand %p5726_p9, %p5720_p6 }
  0x6e   :  { %5730 = shalt.err (!%p5727_p10)
}
  0x6f   :  { %114 = dma.hbm_to_vmem [thread:$0]  %s7147_s11, 5120, %s109_s25, [#allocation14], %s5767_s15, %s5767_s15, %s5768_s16  }
  0x70   :  { %5753 = dma.done.wait [#allocation5], 16  }
  0x71   :  { %5754 = vsyncadd [#allocation5], 4294967280 }
  0x72   :  { %5755 = dma.done.wait [#allocation3], 1024  }
  0x73   :  { %5756 = vsyncadd [#allocation3], 4294966272 }
  0x74   :  { %5757 = dma.done.wait [#allocation8], 8192  }
  0x75   :  { %5758 = vsyncadd [#allocation8], 4294959104 }
  0x76   :  { %5759 = dma.done.wait [#allocation11], 8192  }
  0x77   :  { %5760 = vsyncadd [#allocation11], 4294959104 }
  0x78   :  { %5761 = dma.done.wait [#allocation14], 5120  }
  0x79   :  { %5762 = vsyncadd [#allocation14], 4294962176 }
  0x7a   :  { %136 = sfence }
  0x7b   :  { %v4247_v0 = vld [vmem:[%s7138_s2 + $0x50] sm:$0xff]  ;;  %v4245_v1 = vld [vmem:[%s7138_s2 + $0x40] sm:$0xff]  ;;  %v5774_v2 = vmov 0   ;;  %v4248_v3 = vld [vmem:[%s7138_s2 + $0x58] sm:$0xff]  ;;  %v146_v26 = vlaneseq  ;;  %s5776_s18 = smov 16   ;;  %s5777_s20 = smov 32  }
  0x7c   :  { %5354 = vset.pattern.permute.xlu1 %v5774_v2  ;;  %5353 = vset.pattern.permute.xlu0 %v5774_v2  ;;  %v4246_v4 = vld [vmem:[%s7138_s2 + $0x48] sm:$0xff]  ;;  %v4249_v6 = vld [vmem:[%s7138_s2 + $0x60] sm:$0xff]  ;;  %v4252_v9 = vld [vmem:[%s7138_s2 + $0x78] sm:$0xff]  ;;  %s5778_s11 = smov 120   ;;  %s7061_s26 = sld [smem:[#allocation2 + $0x5]] }
  0x7d   :  { %184 = vperm.xlu1 %5354, %v4247_v0   ;;  %174 = vperm.xlu0 %5353, %v4245_v1   ;;  %v4250_v5 = vld [vmem:[%s7138_s2 + $0x68] sm:$0xff]  ;;  %v5355_v7 = vld [vmem:[#allocation6] sm:$0xff]   ;;  %v4251_v10 = vld [vmem:[%s7138_s2 + $0x70] sm:$0xff]  ;;  %v6000_v28 = vshrl.u32 %v146_v26, 7  ;;  %s7065_s27 = sld [smem:[#allocation2 + $0x6]]  ;;  %s5779_s30 = smov [#allocation15]  }
  0x7e   :  { %4765 = vmatprep.subr.bf16.mxu1 %v5355_v7  ;;  %v5356_v8 = vld [vmem:[#allocation6 + $0x8] sm:$0xff]   ;;  %v5357_v11 = vld [vmem:[#allocation6 + $0x10] sm:$0xff]   ;;  %v4272_v13 = vld [vmem:[%s7138_s2 + $0x20] sm:$0xff]  ;;  %s4229_s8 = sshll.u32 %s5779_s30, 4  ;;  %s4230_s8 = int_to_ptr.vmem [resolvable:$true] %s4229_s8 }
  0x7f   :  { %4766 = vmatpush3.bf16.msra.mxu1 %v5355_v7  ;;  %v4273_v12 = vld [vmem:[%s7138_s2 + $0x28] sm:$0xff]  ;;  %v5358_v14 = vld [vmem:[#allocation6 + $0x18] sm:$0xff]   ;;  %v4274_v16 = vld [vmem:[%s7138_s2 + $0x30] sm:$0xff]  ;;  %vm148_vm0 = vcmp.lt.s32.totalorder %v6000_v28, 1  ;;  %vm157_vm1 = vcmp.lt.s32.totalorder %v6000_v28, 7  ;;  %vm619_vm2 = vcmp.lt.s32.totalorder %v6000_v28, 2  ;;  %p5736_p12 = scmp.lt.s32.totalorder %s4230_s8, %s4230_s8 }
  0x80   :  { %4767 = vmatprep.subr.bf16.mxu1 %v5356_v8  ;;  %v4275_v15 = vld [vmem:[%s7138_s2 + $0x38] sm:$0xff]  ;;  %v5359_v17 = vld [vmem:[#allocation6 + $0x20] sm:$0xff]   ;;  %v4277_v18 = vld [vmem:[%s7138_s2 + $0x88] sm:$0xff]  ;;  %vm687_vm3 = vcmp.lt.s32.totalorder %v6000_v28, 6  ;;  %vm580_vm4 = vcmp.lt.s32.totalorder %v6000_v28, 4  ;;  %s5731_s21 = scalar_lea.vmem %s4230_s8, 512 }
  0x81   :  { %189 = vperm.xlu1 %5354, %v4248_v3   ;;  %179 = vperm.xlu0 %5353, %v4246_v4   ;;  %v4276_v19 = vld [vmem:[%s7138_s2 + $0x80] sm:$0xff]  ;;  %v5360_v20 = vld [vmem:[#allocation6 + $0x28] sm:$0xff]   ;;  %v4279_v21 = vld [vmem:[%s7138_s2 + $0x98] sm:$0xff]  ;;  %p5732_p11 = scmp.ne.s32.totalorder %s4230_s8, %s5731_s21  ;;  %p5737_p13 = scmp.lt.s32.totalorder %s5731_s21, %s5731_s21 }
  0x82   :  { %v4278_v22 = vld [vmem:[%s7138_s2 + $0x90] sm:$0xff]  ;;  %v5362_v24 = vld [vmem:[#allocation6 + $0x38] sm:$0xff]   ;;  %v5363_v25 = vld [vmem:[%s7142_s6 + $0x40] sm:$0xff]  }
  0x83   :  { %4768 = vmatpush3.bf16.msra.mxu1 %v5356_v8  ;;  %v5361_v23 = vld [vmem:[#allocation6 + $0x30] sm:$0xff]   ;;  %v139_v27 = vld [vmem:[%s7136_s0 + $0x8] sm:$0xff]  ;;  %v6012_v32 = vld [vmem:[%s7136_s0 + $0x18] sm:$0xff]  ;;  %p5738_p0 = por %p5737_p13, %p5736_p12 }
  0x84   :  { %4769 = vmatprep.subr.bf16.mxu1 %v5357_v11  ;;  %v143_v29 = vrot.slane %v139_v27, 7  ;;  %v6002_v30 = vmax.f32 %v139_v27, 0.0  ;;  %v6007_v31 = vld [vmem:[%s7136_s0 + $0x10] sm:$0xff]  ;;  %v145_v34 = vrot.slane %v6012_v32, 7  ;;  %v138_v35 = vld [vmem:[%s7136_s0] sm:$0xff]  ;;  %v154_v40 = vrot.slane %v139_v27, 1 }
  0x85   :  { %207 = vperm.xlu1 %5354, %v4250_v5   ;;  %202 = vperm.xlu0 %5353, %v4249_v6   ;;  %v144_v33 = vrot.slane %v6007_v31, 7  ;;  %v142_v36 = vrot.slane %v138_v35, 7  ;;  %v153_v37 = vrot.slane %v138_v35, 1  ;;  %v155_v41 = vrot.slane %v6007_v31, 1  ;;  %v5371_v26 = vld [vmem:[%s7142_s6] sm:$0xff]   ;;  %p5739_p1 = pnand %p5738_p0, %p5732_p11 }
  0x86   :  { %v156_v49 = vrot.slane %v6012_v32, 1  ;;  %v6083_v3 = vmax.f32 %v138_v35, 0.0 }
  0x87   :  { %4770 = vmatpush3.bf16.msra.mxu1 %v5357_v11  ;;  %v6028_v42 = vsel %vm148_vm0, %v142_v36, %v143_v29  ;;  %v6032_v43 = vsel %vm148_vm0, %v145_v34, %v142_v36  ;;  %v6040_v46 = vsel %vm148_vm0, %v143_v29, %v144_v33  ;;  %v6049_v50 = vsel %vm157_vm1, %v154_v40, %v155_v41  ;;  %v5374_v36 = vld [vmem:[%s7142_s6 + $0x18] sm:$0xff]  }
  0x88   :  { %4771 = vmatprep.subr.bf16.mxu1 %v5358_v14  ;;  %v6053_v51 = vsel %vm157_vm1, %v153_v37, %v154_v40  ;;  %v6057_v52 = vsel %vm148_vm0, %v144_v33, %v145_v34  ;;  %v6073_v61 = vsel %vm157_vm1, %v155_v41, %v156_v49  ;;  %v6077_v0 = vsel %vm157_vm1, %v156_v49, %v153_v37  ;;  %v5375_v37 = vld [vmem:[%s7142_s6 + $0x20] sm:$0xff]   ;;  %v5376_v40 = vld [vmem:[%s7142_s6 + $0x28] sm:$0xff]   ;;  %v5377_v41 = vld [vmem:[%s7142_s6 + $0x30] sm:$0xff]  }
  0x89   :  { %217 = vperm.xlu1 %5354, %v4252_v9   ;;  %212 = vperm.xlu0 %5353, %v4251_v10   ;;  %v6093_v11 = vpack.c.bf16 %v6002_v30, %v6083_v3  ;;  %v670_v49 = vrot.slane %v6002_v30, 1 }
  0x8b   :  { %4772 = vmatpush3.bf16.msra.mxu1 %v5358_v14  ;;  %7171 = vst [vmem:[#allocation22_spill] sm:$0xff] %v6093_v11  ;;  %v5365_v14 = vld [vmem:[%s7142_s6 + $0x50] sm:$0xff]  }
  0x8c   :  { %4773 = vmatprep.subr.bf16.mxu1 %v5359_v17 }
  0x8d   :  { %636 = vperm.xlu1 %5354, %v4273_v12   ;;  %631 = vperm.xlu0 %5353, %v4272_v13   ;;  %v5364_v13 = vld [vmem:[%s7142_s6 + $0x48] sm:$0xff]  }
  0x8f   :  { %4774 = vmatpush3.bf16.msra.mxu1 %v5359_v17  ;;  %v5368_v17 = vld [vmem:[%s7142_s6 + $0x68] sm:$0xff]  }
  0x90   :  { %4775 = vmatprep.subr.bf16.mxu1 %v5360_v20 }
  0x91   :  { %646 = vperm.xlu1 %5354, %v4275_v15   ;;  %641 = vperm.xlu0 %5353, %v4274_v16   ;;  %v5366_v15 = vld [vmem:[%s7142_s6 + $0x58] sm:$0xff]   ;;  %v5367_v16 = vld [vmem:[%s7142_s6 + $0x60] sm:$0xff]  }
  0x93   :  { %4776 = vmatpush3.bf16.msra.mxu1 %v5360_v20  ;;  %v656_v20 = vrot.slane %v6002_v30, 7 }
  0x94   :  { %4777 = vmatprep.subr.bf16.mxu1 %v5361_v23 }
  0x95   :  { %704 = vperm.xlu1 %5354, %v4277_v18   ;;  %699 = vperm.xlu0 %5353, %v4276_v19   ;;  %v6112_v18 = vmax.f32 %v6012_v32, 0.0  ;;  %v5369_v19 = vld [vmem:[%s7142_s6 + $0x70] sm:$0xff]  }
  0x97   :  { %4778 = vmatpush3.bf16.msra.mxu1 %v5361_v23  ;;  %v655_v23 = vrot.slane %v6083_v3, 7 }
  0x98   :  { %4779 = vmatprep.subr.bf16.mxu1 %v5362_v24 }
  0x99   :  { %714 = vperm.xlu1 %5354, %v4279_v21   ;;  %709 = vperm.xlu0 %5353, %v4278_v22   ;;  %v658_v21 = vrot.slane %v6112_v18, 7  ;;  %v5370_v22 = vld [vmem:[%s7142_s6 + $0x78] sm:$0xff]  }
  0x9b   :  { %4780 = vmatpush3.bf16.msra.mxu1 %v5362_v24  ;;  %v661_v24 = vsel %vm148_vm0, %v655_v23, %v656_v20 }
  0x9c   :  { %4785 = vmatprep.subr.bf16.mxu1 %v5363_v25 }
  0xfc   :  { %v6021_v38 = vpop.permute.xlu1 %184  ;;  %v6023_v39 = vpop.permute.xlu0 %174 }
  0xfd   :  { %v192_v47 = vmul.f32 %v6023_v39, %v6032_v43  ;;  %v194_v53 = vmul.f32 %v6021_v38, %v6040_v46 }
  0xff   :  { %v196_v56 = vadd.f32 %v192_v47, %v138_v35  ;;  %v198_v5 = vadd.f32 %v194_v53, %v6007_v31  ;;  %v5373_v35 = vld [vmem:[%s7142_s6 + $0x10] sm:$0xff]   ;;  %v669_v47 = vrot.slane %v6083_v3, 1 }
 0x100   :  { %v6034_v44 = vpop.permute.xlu1 %189  ;;  %v6036_v45 = vpop.permute.xlu0 %179 }
 0x101   :  { %v193_v48 = vmul.f32 %v6036_v45, %v6028_v42  ;;  %v195_v60 = vmul.f32 %v6034_v44, %v6057_v52  ;;  %v664_v29 = vmul.f32 %v661_v24, %v6036_v45 }
 0x103   :  { %v197_v57 = vadd.f32 %v193_v48, %v139_v27  ;;  %v199_v7 = vadd.f32 %v195_v60, %v6012_v32  ;;  %v662_v27 = vsel %vm148_vm0, %v658_v21, %v655_v23  ;;  %v5387_v23 = vld [vmem:[#allocation9 + $0x40] sm:$0xff]  }
 0x104   :  { %v6061_v54 = vpop.permute.xlu1 %207  ;;  %v6063_v55 = vpop.permute.xlu0 %202  ;;  %v663_v33 = vmul.f32 %v662_v27, %v6023_v39  ;;  %v5389_v27 = vld [vmem:[#allocation9 + $0x50] sm:$0xff]  }
 0x105   :  { %v220_v58 = vmul.f32 %v6063_v55, %v6053_v51  ;;  %v221_v59 = vmul.f32 %v6061_v54, %v6049_v50 }
 0x106   :  { %v6142_v34 = vpack.c.bf16 %v664_v29, %v663_v33  ;;  %v5390_v29 = vld [vmem:[#allocation9 + $0x58] sm:$0xff]   ;;  %v5391_v33 = vld [vmem:[#allocation9 + $0x60] sm:$0xff]  }
 0x107   :  { %v224_v62 = vadd.f32 %v220_v58, %v196_v56  ;;  %v225_v63 = vadd.f32 %v221_v59, %v197_v57  ;;  %v5378_v56 = vld [vmem:[%s7142_s6 + $0x38] sm:$0xff]   ;;  %v675_v59 = vsel %vm157_vm1, %v669_v47, %v670_v49 }
 0x108   :  { %v6079_v1 = vpop.permute.xlu1 %217  ;;  %v6081_v2 = vpop.permute.xlu0 %212 }
 0x109   :  { %v228_v4 = vpack.c.bf16 %v225_v63, %v224_v62  ;;  %v222_v6 = vmul.f32 %v6081_v2, %v6073_v61  ;;  %v223_v8 = vmul.f32 %v6079_v1, %v6077_v0  ;;  %v5379_v63 = vld [vmem:[%s7142_s6 + $0x80] sm:$0xff]  }
 0x10b   :  { %4781 = vmatprep.mubr.bf16.mxu1 %v228_v4  ;;  %v226_v9 = vadd.f32 %v222_v6, %v198_v5  ;;  %v227_v10 = vadd.f32 %v223_v8, %v199_v7  ;;  %v677_v4 = vmul.f32 %v675_v59, %v6063_v55  ;;  %v5380_v8 = vld [vmem:[%s7142_s6 + $0x88] sm:$0xff]  }
 0x10d   :  { %v229_v12 = vpack.c.bf16 %v227_v10, %v226_v9  ;;  %v5381_v10 = vld [vmem:[%s7142_s6 + $0x90] sm:$0xff]  }
 0x10f   :  { %4782 = vmatmul.mubr.bf16.vlgmr.msra.gmra.mrb[0].mxu1 %v229_v12  ;;  %v5382_v12 = vld [vmem:[%s7142_s6 + $0x98] sm:$0xff]  }
 0x110   :  { %4786 = vmatpush3.bf16.msra.mxu1 %v5363_v25  ;;  %4801 = vmatprep.mubr.bf16.mxu1 %v6093_v11  ;;  %v6126_v25 = vmax.f32 %v6007_v31, 0.0  ;;  %v5372_v31 = vld [vmem:[%s7142_s6 + $0x8] sm:$0xff]  }
 0x111   :  { %4787 = vmatprep.subr.bf16.mxu1 %v5364_v13 }
 0x112   :  { %v6136_v32 = vpack.c.bf16 %v6112_v18, %v6126_v25  ;;  %v671_v48 = vrot.slane %v6126_v25, 1  ;;  %v657_v53 = vrot.slane %v6126_v25, 7 }
 0x114   :  { %4788 = vmatpush3.bf16.msra.mxu1 %v5364_v13  ;;  %7172 = vst [vmem:[#allocation23_spill] sm:$0xff] %v6136_v32  ;;  %v659_v57 = vsel %vm148_vm0, %v657_v53, %v658_v21  ;;  %v674_v58 = vsel %vm157_vm1, %v670_v49, %v671_v48  ;;  %v660_v60 = vsel %vm148_vm0, %v656_v20, %v657_v53  ;;  %v5383_v13 = vld [vmem:[%s7142_s6 + $0xa0] sm:$0xff]  }
 0x115   :  { %4789 = vmatprep.subr.bf16.mxu1 %v5365_v14  ;;  %v666_v62 = vmul.f32 %v659_v57, %v6034_v44  ;;  %v678_v5 = vmul.f32 %v674_v58, %v6061_v54  ;;  %v665_v6 = vmul.f32 %v660_v60, %v6021_v38  ;;  %v5395_v53 = vld [vmem:[#allocation9] sm:$0xff]   ;;  %v5396_v58 = vld [vmem:[#allocation9 + $0x8] sm:$0xff]   ;;  %v5397_v60 = vld [vmem:[#allocation9 + $0x10] sm:$0xff]  }
 0x117   :  { %v6183_v7 = vpack.c.bf16 %v666_v62, %v665_v6  ;;  %v6188_v9 = vpack.c.bf16 %v678_v5, %v677_v4  ;;  %v5398_v62 = vld [vmem:[#allocation9 + $0x18] sm:$0xff]   ;;  %v5400_v4 = vld [vmem:[#allocation9 + $0x28] sm:$0xff]   ;;  %v5401_v5 = vld [vmem:[#allocation9 + $0x30] sm:$0xff]   ;;  %v617_v6 = vrot.slane %v6126_v25, 6 }
 0x118   :  { %4790 = vmatpush3.bf16.msra.mxu1 %v5365_v14  ;;  %v5384_v14 = vld [vmem:[%s7142_s6 + $0xa8] sm:$0xff]  }
 0x119   :  { %4791 = vmatprep.subr.bf16.mxu1 %v5366_v15 }
 0x11c   :  { %4792 = vmatpush3.bf16.msra.mxu1 %v5366_v15  ;;  %v5385_v15 = vld [vmem:[%s7142_s6 + $0xb0] sm:$0xff]  }
 0x11d   :  { %4793 = vmatprep.subr.bf16.mxu1 %v5367_v16 }
 0x120   :  { %4794 = vmatpush3.bf16.msra.mxu1 %v5367_v16  ;;  %v672_v16 = vrot.slane %v6112_v18, 1 }
 0x121   :  { %4795 = vmatprep.subr.bf16.mxu1 %v5368_v17 }
 0x122   :  { %v673_v20 = vsel %vm157_vm1, %v671_v48, %v672_v16  ;;  %v6229_v48 = vpop.permute.xlu0 %631 }
 0x124   :  { %4796 = vmatpush3.bf16.msra.mxu1 %v5368_v17  ;;  %v5386_v17 = vld [vmem:[%s7142_s6 + $0xb8] sm:$0xff]   ;;  %s5775_s6 = smov 8  }
 0x125   :  { %4797 = vmatprep.subr.bf16.mxu1 %v5369_v19 }
 0x128   :  { %4798 = vmatpush3.bf16.msra.mxu1 %v5369_v19  ;;  %v676_v19 = vsel %vm157_vm1, %v672_v16, %v669_v47  ;;  %v5403_v16 = vld [vmem:[#allocation9 + $0x80] sm:$0xff]  }
 0x129   :  { %4799 = vmatprep.subr.bf16.mxu1 %v5370_v22  ;;  %v680_v21 = vmul.f32 %v676_v19, %v6079_v1  ;;  %v5404_v19 = vld [vmem:[#allocation9 + $0x88] sm:$0xff]  }
 0x12c   :  { %4800 = vmatpush3.bf16.msra.mxu1 %v5370_v22  ;;  %v679_v22 = vmul.f32 %v673_v20, %v6081_v2  ;;  %v5405_v20 = vld [vmem:[#allocation9 + $0x90] sm:$0xff]  }
 0x12d   :  { %4805 = vmatprep.subr.bf16.mxu1 %v5371_v26 }
 0x12e   :  { %v6217_v24 = vpack.c.bf16 %v680_v21, %v679_v22  ;;  %v5406_v21 = vld [vmem:[#allocation9 + $0x98] sm:$0xff]   ;;  %v5407_v22 = vld [vmem:[#allocation9 + $0xa0] sm:$0xff]  }
 0x12f   :  { %4802 = vmatmul.mubr.bf16.vlgmr.msra.gmra.mrb[4].mxu1 %v6136_v32 }
 0x130   :  { %4806 = vmatpush3.bf16.msra.mxu1 %v5371_v26  ;;  %4821 = vmatprep.mubr.bf16.mxu1 %v6142_v34  ;;  %v5388_v26 = vld [vmem:[#allocation9 + $0x48] sm:$0xff]  }
 0x131   :  { %4807 = vmatprep.subr.bf16.mxu1 %v5372_v31 }
 0x134   :  { %4808 = vmatpush3.bf16.msra.mxu1 %v5372_v31  ;;  %v5392_v31 = vld [vmem:[#allocation9 + $0x68] sm:$0xff]  }
 0x135   :  { %4809 = vmatprep.subr.bf16.mxu1 %v5373_v35 }
 0x138   :  { %4810 = vmatpush3.bf16.msra.mxu1 %v5373_v35  ;;  %v5393_v35 = vld [vmem:[#allocation9 + $0x70] sm:$0xff]  }
 0x139   :  { %4811 = vmatprep.subr.bf16.mxu1 %v5374_v36 }
 0x13c   :  { %4812 = vmatpush3.bf16.msra.mxu1 %v5374_v36  ;;  %v615_v36 = vrot.slane %v6083_v3, 6 }
 0x13d   :  { %4813 = vmatprep.subr.bf16.mxu1 %v5375_v37 }
 0x140   :  { %4814 = vmatpush3.bf16.msra.mxu1 %v5375_v37  ;;  %v616_v37 = vrot.slane %v6002_v30, 6 }
 0x141   :  { %4815 = vmatprep.subr.bf16.mxu1 %v5376_v40 }
 0x142   :  { %v622_v47 = vsel %vm619_vm2, %v615_v36, %v616_v37 }
 0x144   :  { %4816 = vmatpush3.bf16.msra.mxu1 %v5376_v40  ;;  %v5394_v40 = vld [vmem:[#allocation9 + $0x78] sm:$0xff]  }
 0x145   :  { %4817 = vmatprep.subr.bf16.mxu1 %v5377_v41 }
 0x148   :  { %4818 = vmatpush3.bf16.msra.mxu1 %v5377_v41  ;;  %v6225_v41 = vpop.permute.xlu1 %636 }
 0x149   :  { %4819 = vmatprep.subr.bf16.mxu1 %v5378_v56 }
 0x14c   :  { %4820 = vmatpush3.bf16.msra.mxu1 %v5378_v56  ;;  %v650_v56 = vmul.f32 %v6225_v41, %v622_v47  ;;  %v684_v47 = vrot.slane %v6002_v30, 2 }
 0x14d   :  { %4825 = vmatprep.subr.bf16.mxu1 %v5379_v63 }
 0x14f   :  { %4822 = vmatmul.mubr.bf16.vlgmr.msra.gmra.mrb[4].mxu1 %v6183_v7 }
 0x150   :  { %4826 = vmatpush3.bf16.msra.mxu1 %v5379_v63  ;;  %4841 = vmatprep.mubr.bf16.mxu1 %v6188_v9  ;;  %v5399_v63 = vld [vmem:[#allocation9 + $0x20] sm:$0xff]  }
 0x151   :  { %4827 = vmatprep.subr.bf16.mxu1 %v5380_v8 }
 0x154   :  { %4828 = vmatpush3.bf16.msra.mxu1 %v5380_v8  ;;  %v6240_v8 = vpop.permute.xlu1 %646 }
 0x155   :  { %4829 = vmatprep.subr.bf16.mxu1 %v5381_v10 }
 0x158   :  { %4830 = vmatpush3.bf16.msra.mxu1 %v5381_v10 }
 0x159   :  { %4831 = vmatprep.subr.bf16.mxu1 %v5382_v12 }
 0x15c   :  { %4832 = vmatpush3.bf16.msra.mxu1 %v5382_v12  ;;  %v6244_v12 = vpop.permute.xlu0 %641 }
 0x15d   :  { %4833 = vmatprep.subr.bf16.mxu1 %v5383_v13 }
 0x160   :  { %4834 = vmatpush3.bf16.msra.mxu1 %v5383_v13  ;;  %v621_v13 = vsel %vm619_vm2, %v616_v37, %v617_v6  ;;  %v5416_v37 = vld [vmem:[#allocation9 + $0xe8] sm:$0xff]  }
 0x161   :  { %4835 = vmatprep.subr.bf16.mxu1 %v5384_v14 }
 0x164   :  { %4836 = vmatpush3.bf16.msra.mxu1 %v5384_v14 }
 0x165   :  { %4837 = vmatprep.subr.bf16.mxu1 %v5385_v15 }
 0x168   :  { %4838 = vmatpush3.bf16.msra.mxu1 %v5385_v15  ;;  %v651_v15 = vmul.f32 %v6244_v12, %v621_v13 }
 0x169   :  { %4839 = vmatprep.subr.bf16.mxu1 %v5386_v17 }
 0x16c   :  { %4840 = vmatpush3.bf16.msra.mxu1 %v5386_v17 }
 0x16d   :  { %4905 = vmatprep.subr.bf16.mxu1 %v5387_v23 }
 0x16f   :  { %4842 = vmatmul.mubr.bf16.vlgmr.msra.gmra.mrb[4].mxu1 %v6217_v24 }
 0x170   :  { %4906 = vmatpush3.bf16.msra.mxu1 %v5387_v23  ;;  %4921 = vmatprep.mubr.bf16.mxu1 %v6142_v34  ;;  %v618_v34 = vrot.slane %v6112_v18, 6  ;;  %v5408_v23 = vld [vmem:[#allocation9 + $0xa8] sm:$0xff]  }
 0x171   :  { %4907 = vmatprep.subr.bf16.mxu1 %v5388_v26 }
 0x172   :  { %v623_v49 = vsel %vm619_vm2, %v618_v34, %v615_v36  ;;  %v620_v10 = vsel %vm619_vm2, %v617_v6, %v618_v34  ;;  %v5415_v36 = vld [vmem:[#allocation9 + $0xe0] sm:$0xff]   ;;  %v5417_v34 = vld [vmem:[#allocation9 + $0xf0] sm:$0xff]  }
 0x173   :  { %v649_v57 = vmul.f32 %v6229_v48, %v623_v49  ;;  %v652_v14 = vmul.f32 %v6240_v8, %v620_v10  ;;  %v683_v49 = vrot.slane %v6083_v3, 2  ;;  %v5420_v10 = vld [vmem:[#allocation9 + $0x108] sm:$0xff]  }
 0x174   :  { %4908 = vmatpush3.bf16.msra.mxu1 %v5388_v26  ;;  %v5409_v26 = vld [vmem:[#allocation9 + $0xb0] sm:$0xff]  }
 0x175   :  { %4909 = vmatprep.subr.bf16.mxu1 %v5389_v27  ;;  %v6235_v59 = vpack.c.bf16 %v650_v56, %v649_v57  ;;  %v6250_v17 = vpack.c.bf16 %v652_v14, %v651_v15  ;;  %v5421_v14 = vld [vmem:[#allocation9 + $0x110] sm:$0xff]   ;;  %v5422_v15 = vld [vmem:[#allocation9 + $0x118] sm:$0xff]  }
 0x177   :  { %7173 = vst [vmem:[#allocation24_spill] sm:$0xff] %v6235_v59  ;;  %7174 = vst [vmem:[#allocation25_spill] sm:$0xff] %v6250_v17 }
 0x178   :  { %4910 = vmatpush3.bf16.msra.mxu1 %v5389_v27  ;;  %v5410_v27 = vld [vmem:[#allocation9 + $0xb8] sm:$0xff]  }
 0x179   :  { %4911 = vmatprep.subr.bf16.mxu1 %v5390_v29 }
 0x17c   :  { %4912 = vmatpush3.bf16.msra.mxu1 %v5390_v29  ;;  %v5411_v29 = vld [vmem:[#allocation9 + $0xc0] sm:$0xff]  }
 0x17d   :  { %4913 = vmatprep.subr.bf16.mxu1 %v5391_v33 }
 0x180   :  { %4914 = vmatpush3.bf16.msra.mxu1 %v5391_v33  ;;  %v5412_v33 = vld [vmem:[#allocation9 + $0xc8] sm:$0xff]  }
 0x181   :  { %4915 = vmatprep.subr.bf16.mxu1 %v5392_v31 }
 0x184   :  { %4916 = vmatpush3.bf16.msra.mxu1 %v5392_v31  ;;  %v5413_v31 = vld [vmem:[#allocation9 + $0xd0] sm:$0xff]  }
 0x185   :  { %4917 = vmatprep.subr.bf16.mxu1 %v5393_v35 }
 0x188   :  { %4918 = vmatpush3.bf16.msra.mxu1 %v5393_v35  ;;  %v5414_v35 = vld [vmem:[#allocation9 + $0xd8] sm:$0xff]  }
 0x189   :  { %4919 = vmatprep.subr.bf16.mxu1 %v5394_v40 }
 0x18c   :  { %4920 = vmatpush3.bf16.msra.mxu1 %v5394_v40 }
 0x18d   :  { %4925 = vmatprep.subr.bf16.mxu1 %v5395_v53 }
 0x18f   :  { %4922 = vmatmul.mubr.bf16.vlgmr.msra.gmra.mrb[8].mxu1 %v6183_v7  ;;  %v5402_v7 = vld [vmem:[#allocation9 + $0x38] sm:$0xff]  }
 0x190   :  { %4926 = vmatpush3.bf16.msra.mxu1 %v5395_v53  ;;  %4941 = vmatprep.mubr.bf16.mxu1 %v6235_v59 }
 0x191   :  { %4927 = vmatprep.subr.bf16.mxu1 %v5396_v58 }
 0x194   :  { %4928 = vmatpush3.bf16.msra.mxu1 %v5396_v58  ;;  %v5418_v58 = vld [vmem:[#allocation9 + $0xf8] sm:$0xff]  }
 0x195   :  { %4929 = vmatprep.subr.bf16.mxu1 %v5397_v60 }
 0x198   :  { %4930 = vmatpush3.bf16.msra.mxu1 %v5397_v60  ;;  %v6268_v60 = vpop.permute.xlu1 %704 }
 0x199   :  { %4931 = vmatprep.subr.bf16.mxu1 %v5398_v62 }
 0x19c   :  { %4932 = vmatpush3.bf16.msra.mxu1 %v5398_v62 }
 0x19d   :  { %4933 = vmatprep.subr.bf16.mxu1 %v5399_v63 }
 0x1a0   :  { %4934 = vmatpush3.bf16.msra.mxu1 %v5399_v63  ;;  %v6272_v63 = vpop.permute.xlu0 %699 }
 0x1a1   :  { %4935 = vmatprep.subr.bf16.mxu1 %v5400_v4 }
 0x1a4   :  { %4936 = vmatpush3.bf16.msra.mxu1 %v5400_v4  ;;  %v690_v4 = vsel %vm687_vm3, %v683_v49, %v684_v47 }
 0x1a5   :  { %4937 = vmatprep.subr.bf16.mxu1 %v5401_v5 }
 0x1a8   :  { %4938 = vmatpush3.bf16.msra.mxu1 %v5401_v5  ;;  %v5419_v5 = vld [vmem:[#allocation9 + $0x100] sm:$0xff]  }
 0x1a9   :  { %4939 = vmatprep.subr.bf16.mxu1 %v5402_v7 }
 0x1ac   :  { %4940 = vmatpush3.bf16.msra.mxu1 %v5402_v7  ;;  %v717_v7 = vmul.f32 %v6272_v63, %v690_v4  ;;  %v5436_v4 = vld [vmem:[#allocation12 + $0x8] sm:$0xff]  }
 0x1ad   :  { %4945 = vmatprep.subr.bf16.mxu1 %v5403_v16 }
 0x1af   :  { %4942 = vmatmul.mubr.bf16.vlgmr.msra.gmra.mrb[8].mxu1 %v6250_v17 }
 0x1b0   :  { %4946 = vmatpush3.bf16.msra.mxu1 %v5403_v16  ;;  %4961 = vmatprep.mubr.bf16.mxu1 %v6093_v11  ;;  %v5423_v16 = vld [vmem:[#allocation9 + $0x120] sm:$0xff]  }
 0x1b1   :  { %4947 = vmatprep.subr.bf16.mxu1 %v5404_v19 }
 0x1b4   :  { %4948 = vmatpush3.bf16.msra.mxu1 %v5404_v19  ;;  %v5424_v19 = vld [vmem:[#allocation9 + $0x128] sm:$0xff]  }
 0x1b5   :  { %4949 = vmatprep.subr.bf16.mxu1 %v5405_v20 }
 0x1b8   :  { %4950 = vmatpush3.bf16.msra.mxu1 %v5405_v20  ;;  %v5425_v20 = vld [vmem:[#allocation9 + $0x130] sm:$0xff]  }
 0x1b9   :  { %4951 = vmatprep.subr.bf16.mxu1 %v5406_v21 }
 0x1bc   :  { %4952 = vmatpush3.bf16.msra.mxu1 %v5406_v21  ;;  %v686_v21 = vrot.slane %v6112_v18, 2 }
 0x1bd   :  { %4953 = vmatprep.subr.bf16.mxu1 %v5407_v22 }
 0x1c0   :  { %4954 = vmatpush3.bf16.msra.mxu1 %v5407_v22  ;;  %v6283_v22 = vpop.permute.xlu1 %714 }
 0x1c1   :  { %4955 = vmatprep.subr.bf16.mxu1 %v5408_v23 }
 0x1c4   :  { %4956 = vmatpush3.bf16.msra.mxu1 %v5408_v23  ;;  %v691_v23 = vsel %vm687_vm3, %v686_v21, %v683_v49  ;;  %v5433_v49 = vld [vmem:[#allocation12 + $0x70] sm:$0xff]  }
 0x1c5   :  { %4957 = vmatprep.subr.bf16.mxu1 %v5409_v26 }
 0x1c8   :  { %4958 = vmatpush3.bf16.msra.mxu1 %v5409_v26  ;;  %v6287_v26 = vpop.permute.xlu0 %709 }
 0x1c9   :  { %4959 = vmatprep.subr.bf16.mxu1 %v5410_v27 }
 0x1cc   :  { %4960 = vmatpush3.bf16.msra.mxu1 %v5410_v27 }
 0x1cd   :  { %4965 = vmatprep.subr.bf16.mxu1 %v5411_v29 }
 0x1cf   :  { %4962 = vmatmul.mubr.bf16.vlgmr.msra.gmra.mrb[8].mxu1 %v6136_v32 }
 0x1d0   :  { %4966 = vmatpush3.bf16.msra.mxu1 %v5411_v29  ;;  %4981 = vmatprep.mubr.bf16.mxu1 %v6188_v9  ;;  %v685_v9 = vrot.slane %v6126_v25, 2  ;;  %v720_v29 = vmul.f32 %v6283_v22, %v691_v23 }
 0x1d1   :  { %4967 = vmatprep.subr.bf16.mxu1 %v5412_v33 }
 0x1d2   :  { %v689_v62 = vsel %vm687_vm3, %v684_v47, %v685_v9  ;;  %v688_v27 = vsel %vm687_vm3, %v685_v9, %v686_v21  ;;  %v5431_v47 = vld [vmem:[#allocation12 + $0x60] sm:$0xff]   ;;  %v5432_v9 = vld [vmem:[#allocation12 + $0x68] sm:$0xff]   ;;  %v5442_v21 = vld [vmem:[#allocation12 + $0x38] sm:$0xff]  }
 0x1d3   :  { %v718_v6 = vmul.f32 %v6268_v60, %v689_v62  ;;  %v5435_v62 = vld [vmem:[#allocation12] sm:$0xff]  }
 0x1d4   :  { %4968 = vmatpush3.bf16.msra.mxu1 %v5412_v33  ;;  %v719_v33 = vmul.f32 %v6287_v26, %v688_v27 }
 0x1d5   :  { %4969 = vmatprep.subr.bf16.mxu1 %v5413_v31  ;;  %v6278_v13 = vpack.c.bf16 %v718_v6, %v717_v7  ;;  %v5438_v6 = vld [vmem:[#allocation12 + $0x18] sm:$0xff]   ;;  %v5439_v7 = vld [vmem:[#allocation12 + $0x20] sm:$0xff]  }
 0x1d7   :  { %7177 = vst [vmem:[#allocation28_spill] sm:$0xff] %v6278_v13 }
 0x1d8   :  { %4970 = vmatpush3.bf16.msra.mxu1 %v5413_v31  ;;  %v5427_v31 = vld [vmem:[#allocation12 + $0x40] sm:$0xff]  }
 0x1d9   :  { %4971 = vmatprep.subr.bf16.mxu1 %v5414_v35 }
 0x1dc   :  { %4972 = vmatpush3.bf16.msra.mxu1 %v5414_v35  ;;  %v6293_v35 = vpack.c.bf16 %v720_v29, %v719_v33 }
 0x1dd   :  { %4973 = vmatprep.subr.bf16.mxu1 %v5415_v36 }
 0x1de   :  { %7178 = vst [vmem:[#allocation29_spill] sm:$0xff] %v6293_v35 }
 0x1e0   :  { %4974 = vmatpush3.bf16.msra.mxu1 %v5415_v36  ;;  %v5428_v36 = vld [vmem:[#allocation12 + $0x48] sm:$0xff]  }
 0x1e1   :  { %4975 = vmatprep.subr.bf16.mxu1 %v5416_v37 }
 0x1e2   :  { %v6256_v40 = vpop.f32.mrb[0].mxu1 }
 0x1e3   :  { %7175 = vst [vmem:[#allocation26_spill] sm:$0xff] %v6256_v40  ;;  %v6261_v53 = vpop.f32.mrb[1].mxu1  ;;  %v5460_v40 = vld [vmem:[#allocation7 + $0x8] sm:$0xff]  }
 0x1e4   :  { %4976 = vmatpush3.bf16.msra.mxu1 %v5416_v37  ;;  %v6264_v56 = vpop.f32.mrb[2].mxu1  ;;  %v5429_v37 = vld [vmem:[#allocation12 + $0x50] sm:$0xff]  }
 0x1e5   :  { %7176 = vst [vmem:[#allocation27_spill] sm:$0xff] %v6264_v56  ;;  %v6266_v57 = vpop.f32.mrb[3].mxu1  ;;  %4977 = vmatprep.subr.bf16.mxu1 %v5417_v34 }
 0x1e8   :  { %4978 = vmatpush3.bf16.msra.mxu1 %v5417_v34  ;;  %v5430_v34 = vld [vmem:[#allocation12 + $0x58] sm:$0xff]  }
 0x1e9   :  { %4979 = vmatprep.subr.bf16.mxu1 %v5418_v58 }
 0x1ec   :  { %4980 = vmatpush3.bf16.msra.mxu1 %v5418_v58  ;;  %v5434_v58 = vld [vmem:[#allocation12 + $0x78] sm:$0xff]  }
 0x1ed   :  { %4985 = vmatprep.subr.bf16.mxu1 %v5419_v5 }
 0x1ef   :  { %4982 = vmatmul.mubr.bf16.vlgmr.msra.gmra.mrb[8].mxu1 %v6217_v24  ;;  %v5426_v24 = vld [vmem:[#allocation9 + $0x138] sm:$0xff]  }
 0x1f0   :  { %4986 = vmatpush3.bf16.msra.mxu1 %v5419_v5  ;;  %5001 = vmatprep.mubr.bf16.mxu1 %v6278_v13  ;;  %v5437_v5 = vld [vmem:[#allocation12 + $0x10] sm:$0xff]  }
 0x1f1   :  { %4987 = vmatprep.subr.bf16.mxu1 %v5420_v10 }
 0x1f4   :  { %4988 = vmatpush3.bf16.msra.mxu1 %v5420_v10  ;;  %v5440_v10 = vld [vmem:[#allocation12 + $0x28] sm:$0xff]  }
 0x1f5   :  { %4989 = vmatprep.subr.bf16.mxu1 %v5421_v14 }
 0x1f8   :  { %4990 = vmatpush3.bf16.msra.mxu1 %v5421_v14  ;;  %v5441_v14 = vld [vmem:[#allocation12 + $0x30] sm:$0xff]  }
 0x1f9   :  { %4991 = vmatprep.subr.bf16.mxu1 %v5422_v15 }
 0x1fc   :  { %4992 = vmatpush3.bf16.msra.mxu1 %v5422_v15 }
 0x1fd   :  { %4993 = vmatprep.subr.bf16.mxu1 %v5423_v16 }
 0x200   :  { %4994 = vmatpush3.bf16.msra.mxu1 %v5423_v16 }
 0x201   :  { %4995 = vmatprep.subr.bf16.mxu1 %v5424_v19 }
 0x204   :  { %4996 = vmatpush3.bf16.msra.mxu1 %v5424_v19 }
 0x205   :  { %4997 = vmatprep.subr.bf16.mxu1 %v5425_v20 }
 0x208   :  { %4998 = vmatpush3.bf16.msra.mxu1 %v5425_v20 }
 0x209   :  { %4999 = vmatprep.subr.bf16.mxu1 %v5426_v24 }
 0x20c   :  { %5000 = vmatpush3.bf16.msra.mxu1 %v5426_v24 }
 0x20d   :  { %5105 = vmatprep.subr.bf16.mxu1 %v5427_v31 }
 0x20f   :  { %5002 = vmatmul.mubr.bf16.vlgmr.msra.gmra.mrb[8].mxu1 %v6293_v35 }
 0x210   :  { %5106 = vmatpush3.bf16.msra.mxu1 %v5427_v31  ;;  %5121 = vmatprep.mubr.bf16.mxu1 %v6093_v11 }
 0x211   :  { %5107 = vmatprep.subr.bf16.mxu1 %v5428_v36 }
 0x214   :  { %5108 = vmatpush3.bf16.msra.mxu1 %v5428_v36  ;;  %v5443_v36 = vld [vmem:[#allocation12 + $0x80] sm:$0xff]  }
 0x215   :  { %5109 = vmatprep.subr.bf16.mxu1 %v5429_v37 }
 0x218   :  { %5110 = vmatpush3.bf16.msra.mxu1 %v5429_v37 }
 0x219   :  { %5111 = vmatprep.subr.bf16.mxu1 %v5430_v34 }
 0x21c   :  { %5112 = vmatpush3.bf16.msra.mxu1 %v5430_v34 }
 0x21d   :  { %5113 = vmatprep.subr.bf16.mxu1 %v5431_v47 }
 0x220   :  { %5114 = vmatpush3.bf16.msra.mxu1 %v5431_v47 }
 0x221   :  { %5115 = vmatprep.subr.bf16.mxu1 %v5432_v9 }
 0x224   :  { %5116 = vmatpush3.bf16.msra.mxu1 %v5432_v9 }
 0x225   :  { %5117 = vmatprep.subr.bf16.mxu1 %v5433_v49 }
 0x228   :  { %5118 = vmatpush3.bf16.msra.mxu1 %v5433_v49 }
 0x229   :  { %5119 = vmatprep.subr.bf16.mxu1 %v5434_v58 }
 0x22c   :  { %5120 = vmatpush3.bf16.msra.mxu1 %v5434_v58  ;;  %v5444_v58 = vld [vmem:[#allocation12 + $0x88] sm:$0xff]  }
 0x22d   :  { %5125 = vmatprep.subr.bf16.mxu1 %v5435_v62 }
 0x22f   :  { %5122 = vmatmul.mubr.bf16.vlgmr.msra.gmra.mrb[12].mxu1 %v6136_v32 }
 0x230   :  { %5126 = vmatpush3.bf16.msra.mxu1 %v5435_v62  ;;  %5141 = vmatprep.mubr.bf16.mxu1 %v6235_v59 }
 0x231   :  { %5127 = vmatprep.subr.bf16.mxu1 %v5436_v4 }
 0x234   :  { %5128 = vmatpush3.bf16.msra.mxu1 %v5436_v4 }
 0x235   :  { %5129 = vmatprep.subr.bf16.mxu1 %v5437_v5 }
 0x238   :  { %5130 = vmatpush3.bf16.msra.mxu1 %v5437_v5 }
 0x239   :  { %5131 = vmatprep.subr.bf16.mxu1 %v5438_v6 }
 0x23c   :  { %5132 = vmatpush3.bf16.msra.mxu1 %v5438_v6 }
 0x23d   :  { %5133 = vmatprep.subr.bf16.mxu1 %v5439_v7 }
 0x240   :  { %5134 = vmatpush3.bf16.msra.mxu1 %v5439_v7  ;;  %v5445_v7 = vld [vmem:[#allocation12 + $0x90] sm:$0xff]  }
 0x241   :  { %5135 = vmatprep.subr.bf16.mxu1 %v5440_v10 }
 0x242   :  { %v6299_v15 = vpop.f32.mrb[4].mxu1 }
 0x243   :  { %v6301_v16 = vpop.f32.mrb[5].mxu1  ;;  %v1267_v29 = vmul.f32 %v6299_v15, %v6299_v15 }
 0x244   :  { %v6303_v19 = vpop.f32.mrb[6].mxu1  ;;  %5136 = vmatpush3.bf16.msra.mxu1 %v5440_v10  ;;  %v1265_v24 = vmul.f32 %v6301_v16, %v6301_v16 }
 0x245   :  { %v6305_v20 = vpop.f32.mrb[7].mxu1  ;;  %5137 = vmatprep.subr.bf16.mxu1 %v5441_v14  ;;  %v1268_v37 = vmul.f32 %v6303_v19, %v6303_v19 }
 0x246   :  { %v1256_v23 = vadd.f32 %v6305_v20, %v6301_v16  ;;  %v1266_v27 = vmul.f32 %v6305_v20, %v6305_v20 }
 0x248   :  { %v1257_v33 = vadd.f32 %v6299_v15, %v1256_v23  ;;  %v1269_v31 = vadd.f32 %v1266_v27, %v1265_v24  ;;  %5138 = vmatpush3.bf16.msra.mxu1 %v5441_v14 }
 0x249   :  { %5139 = vmatprep.subr.bf16.mxu1 %v5442_v21 }
 0x24a   :  { %v1258_v34 = vadd.f32 %v6303_v19, %v1257_v33  ;;  %v1270_v47 = vadd.f32 %v1269_v31, %v1267_v29  ;;  %v5447_v31 = vld [vmem:[#allocation12 + $0xa0] sm:$0xff]  }
 0x24c   :  { %v1259_v9 = vrot.slane %v1258_v34, 4  ;;  %v1271_v49 = vadd.f32 %v1270_v47, %v1268_v37  ;;  %5140 = vmatpush3.bf16.msra.mxu1 %v5442_v21  ;;  %v5446_v21 = vld [vmem:[#allocation12 + $0x98] sm:$0xff]   ;;  %v5449_v37 = vld [vmem:[#allocation12 + $0xb0] sm:$0xff]  }
 0x24d   :  { %5145 = vmatprep.subr.bf16.mxu1 %v5443_v36 }
 0x24e   :  { %v1260_v62 = vadd.f32 %v1259_v9, %v1258_v34  ;;  %v1272_v4 = vrot.slane %v1271_v49, 4  ;;  %v5450_v34 = vld [vmem:[#allocation12 + $0xb8] sm:$0xff]  }
 0x24f   :  { %5142 = vmatmul.mubr.bf16.vlgmr.msra.gmra.mrb[12].mxu1 %v6250_v17 }
 0x250   :  { %5146 = vmatpush3.bf16.msra.mxu1 %v5443_v36  ;;  %5161 = vmatprep.mubr.bf16.mxu1 %v6278_v13  ;;  %v1261_v5 = vrot.slane %v1260_v62, 2  ;;  %v1273_v6 = vadd.f32 %v1272_v4, %v1271_v49  ;;  %v5448_v36 = vld [vmem:[#allocation12 + $0xa8] sm:$0xff]  }
 0x251   :  { %5147 = vmatprep.subr.bf16.mxu1 %v5444_v58 }
 0x252   :  { %v1262_v10 = vadd.f32 %v1261_v5, %v1260_v62  ;;  %v1274_v14 = vrot.slane %v1273_v6, 2 }
 0x254   :  { %5148 = vmatpush3.bf16.msra.mxu1 %v5444_v58  ;;  %v1263_v24 = vrot.slane %v1262_v10, 1  ;;  %v1275_v23 = vadd.f32 %v1274_v14, %v1273_v6 }
 0x255   :  { %5149 = vmatprep.subr.bf16.mxu1 %v5445_v7 }
 0x256   :  { %v1264_v27 = vadd.f32 %v1263_v24, %v1262_v10  ;;  %v1276_v29 = vrot.slane %v1275_v23, 1 }
 0x258   :  { %5150 = vmatpush3.bf16.msra.mxu1 %v5445_v7  ;;  %1278 = vrot.lane.b32.xlu0 %v1264_v27, %s5775_s6  ;;  %v1277_v33 = vadd.f32 %v1276_v29, %v1275_v23 }
 0x259   :  { %5151 = vmatprep.subr.bf16.mxu1 %v5446_v21 }
 0x25a   :  { %1291 = vrot.lane.b32.xlu1 %v1277_v33, %s5775_s6 }
 0x25c   :  { %5152 = vmatpush3.bf16.msra.mxu1 %v5446_v21 }
 0x25d   :  { %5153 = vmatprep.subr.bf16.mxu1 %v5447_v31 }
 0x260   :  { %5154 = vmatpush3.bf16.msra.mxu1 %v5447_v31 }
 0x261   :  { %5155 = vmatprep.subr.bf16.mxu1 %v5448_v36 }
 0x264   :  { %5156 = vmatpush3.bf16.msra.mxu1 %v5448_v36 }
 0x265   :  { %5157 = vmatprep.subr.bf16.mxu1 %v5449_v37 }
 0x268   :  { %5158 = vmatpush3.bf16.msra.mxu1 %v5449_v37 }
 0x269   :  { %5159 = vmatprep.subr.bf16.mxu1 %v5450_v34 }
 0x26c   :  { %5160 = vmatpush3.bf16.msra.mxu1 %v5450_v34 }
 0x26f   :  { %5162 = vmatmul.mubr.bf16.vlgmr.msra.gmra.mrb[12].mxu1 %v6293_v35 }
 0x2ca   :  { %v1279_v47 = vpop.permute.xlu0 %1278 }
 0x2cb   :  { %v1280_v9 = vadd.f32 %v1279_v47, %v1264_v27 }
 0x2cc   :  { %v1292_v49 = vpop.permute.xlu1 %1291 }
 0x2cd   :  { %v1293_v58 = vadd.f32 %v1292_v49, %v1277_v33  ;;  %1281 = vrot.lane.b32.xlu0 %v1280_v9, %s5776_s18 }
 0x2cf   :  { %1294 = vrot.lane.b32.xlu1 %v1293_v58, %s5776_s18 }
 0x2e2   :  { %v6326_v62 = vpop.f32.mrb[8].mxu1 }
 0x2e3   :  { %v6328_v4 = vpop.f32.mrb[9].mxu1  ;;  %v2370_v24 = vmul.f32 %v6326_v62, %v6326_v62 }
 0x2e4   :  { %v6330_v5 = vpop.f32.mrb[10].mxu1  ;;  %v2368_v7 = vmul.f32 %v6328_v4, %v6328_v4 }
 0x2e5   :  { %v6332_v6 = vpop.f32.mrb[11].mxu1  ;;  %v2371_v27 = vmul.f32 %v6330_v5, %v6330_v5 }
 0x2e6   :  { %v2359_v10 = vadd.f32 %v6332_v6, %v6328_v4  ;;  %v2369_v14 = vmul.f32 %v6332_v6, %v6332_v6 }
 0x2e8   :  { %v2360_v23 = vadd.f32 %v6326_v62, %v2359_v10  ;;  %v2372_v21 = vadd.f32 %v2369_v14, %v2368_v7 }
 0x2ea   :  { %v2361_v29 = vadd.f32 %v6330_v5, %v2360_v23  ;;  %v2373_v33 = vadd.f32 %v2372_v21, %v2370_v24 }
 0x2ec   :  { %v2362_v31 = vrot.slane %v2361_v29, 4  ;;  %v2374_v36 = vadd.f32 %v2373_v33, %v2371_v27 }
 0x2ee   :  { %v2363_v37 = vadd.f32 %v2362_v31, %v2361_v29  ;;  %v2375_v34 = vrot.slane %v2374_v36, 4 }
 0x2f0   :  { %v2364_v47 = vrot.slane %v2363_v37, 2  ;;  %v2376_v49 = vadd.f32 %v2375_v34, %v2374_v36  ;;  %v5451_v34 = vld [vmem:[#allocation7 + $0x40] sm:$0xff]  }
 0x2f1   :  { %4845 = vmatprep.subr.bf16.mxu0 %v5451_v34 }
 0x2f2   :  { %v2365_v35 = vadd.f32 %v2364_v47, %v2363_v37  ;;  %v2377_v13 = vrot.slane %v2376_v49, 2  ;;  %4846 = vmatpush3.bf16.msra.mxu0 %v5451_v34  ;;  %v5458_v34 = vld [vmem:[#allocation7 + $0x78] sm:$0xff]  }
 0x2f4   :  { %v2366_v32 = vrot.slane %v2365_v35, 1  ;;  %v2378_v11 = vadd.f32 %v2377_v13, %v2376_v49 }
 0x2f6   :  { %v2367_v17 = vadd.f32 %v2366_v32, %v2365_v35  ;;  %v2379_v59 = vrot.slane %v2378_v11, 1 }
 0x2f8   :  { %2381 = vrot.lane.b32.xlu0 %v2367_v17, %s5775_s6  ;;  %v2380_v7 = vadd.f32 %v2379_v59, %v2378_v11 }
 0x2fa   :  { %2394 = vrot.lane.b32.xlu1 %v2380_v7, %s5775_s6 }
 0x33f   :  { %v1282_v10 = vpop.permute.xlu0 %1281 }
 0x340   :  { %v1283_v14 = vadd.f32 %v1282_v10, %v1280_v9 }
 0x341   :  { %v1295_v24 = vpop.permute.xlu1 %1294 }
 0x342   :  { %v1296_v23 = vadd.f32 %v1295_v24, %v1293_v58  ;;  %v6348_v21 = vpop.f32.mrb[12].mxu1  ;;  %1284 = vrot.lane.b32.xlu0 %v1283_v14, %s5777_s20 }
 0x343   :  { %7179 = vst [vmem:[#allocation30_spill] sm:$0xff] %v6348_v21  ;;  %v6351_v27 = vpop.f32.mrb[13].mxu1  ;;  %v3501_v35 = vmul.f32 %v6348_v21, %v6348_v21 }
 0x344   :  { %7180 = vst [vmem:[#allocation31_spill] sm:$0xff] %v6351_v27  ;;  %v6353_v29 = vpop.f32.mrb[14].mxu1  ;;  %1297 = vrot.lane.b32.xlu1 %v1296_v23, %s5777_s20  ;;  %v3499_v11 = vmul.f32 %v6351_v27, %v6351_v27 }
 0x345   :  { %7181 = vst [vmem:[#allocation32_spill] sm:$0xff] %v6353_v29  ;;  %v6356_v32 = vpop.f32.mrb[15].mxu1  ;;  %v3502_v33 = vmul.f32 %v6353_v29, %v6353_v29 }
 0x346   :  { %7182 = vst [vmem:[#allocation33_spill] sm:$0xff] %v6356_v32  ;;  %v3490_v59 = vadd.f32 %v6356_v32, %v6351_v27  ;;  %v3500_v13 = vmul.f32 %v6356_v32, %v6356_v32 }
 0x348   :  { %v3491_v9 = vadd.f32 %v6348_v21, %v3490_v59  ;;  %v3503_v58 = vadd.f32 %v3500_v13, %v3499_v11  ;;  %v5452_v11 = vld [vmem:[#allocation7 + $0x48] sm:$0xff]   ;;  %v5453_v59 = vld [vmem:[#allocation7 + $0x50] sm:$0xff]   ;;  %v5454_v13 = vld [vmem:[#allocation7 + $0x58] sm:$0xff]  }
 0x349   :  { %4847 = vmatprep.subr.bf16.mxu0 %v5452_v11 }
 0x34a   :  { %v6370_v31 = vadd.f32 %v6353_v29, %v3491_v9  ;;  %v3504_v36 = vadd.f32 %v3503_v58, %v3501_v35  ;;  %4848 = vmatpush3.bf16.msra.mxu0 %v5452_v11  ;;  %v5455_v9 = vld [vmem:[#allocation7 + $0x60] sm:$0xff]  }
 0x34b   :  { %4849 = vmatprep.subr.bf16.mxu0 %v5453_v59 }
 0x34c   :  { %7183 = vst [vmem:[#allocation34_spill] sm:$0xff] %v6370_v31  ;;  %v6372_v37 = vadd.f32 %v3504_v36, %v3502_v33  ;;  %v5456_v33 = vld [vmem:[#allocation7 + $0x68] sm:$0xff]   ;;  %v5457_v36 = vld [vmem:[#allocation7 + $0x70] sm:$0xff]  }
 0x34e   :  { %7184 = vst [vmem:[#allocation35_spill] sm:$0xff] %v6372_v37  ;;  %4850 = vmatpush3.bf16.msra.mxu0 %v5453_v59 }
 0x34f   :  { %4851 = vmatprep.subr.bf16.mxu0 %v5454_v13 }
 0x352   :  { %4852 = vmatpush3.bf16.msra.mxu0 %v5454_v13 }
 0x353   :  { %4853 = vmatprep.subr.bf16.mxu0 %v5455_v9 }
 0x356   :  { %4854 = vmatpush3.bf16.msra.mxu0 %v5455_v9 }
 0x357   :  { %4855 = vmatprep.subr.bf16.mxu0 %v5456_v33 }
 0x35a   :  { %4856 = vmatpush3.bf16.msra.mxu0 %v5456_v33 }
 0x35b   :  { %4857 = vmatprep.subr.bf16.mxu0 %v5457_v36 }
 0x35e   :  { %4858 = vmatpush3.bf16.msra.mxu0 %v5457_v36 }
 0x35f   :  { %4859 = vmatprep.subr.bf16.mxu0 %v5458_v34 }
 0x362   :  { %4860 = vmatpush3.bf16.msra.mxu0 %v5458_v34 }
 0x36a   :  { %v2382_v47 = vpop.permute.xlu0 %2381 }
 0x36b   :  { %v2383_v49 = vadd.f32 %v2382_v47, %v2367_v17  ;;  %v5459_v47 = vld [vmem:[#allocation7] sm:$0xff]  }
 0x36c   :  { %v2395_v10 = vpop.permute.xlu1 %2394  ;;  %4865 = vmatprep.subr.bf16.mxu0 %v5459_v47 }
 0x36d   :  { %v2396_v24 = vadd.f32 %v2395_v10, %v2380_v7  ;;  %2384 = vrot.lane.b32.xlu0 %v2383_v49, %s5776_s18 }
 0x36f   :  { %2397 = vrot.lane.b32.xlu1 %v2396_v24, %s5776_s18 }
 0x3b4   :  { %v1285_v35 = vpop.permute.xlu0 %1284 }
 0x3b5   :  { %v1286_v58 = vadd.f32 %v1285_v35, %v1283_v14 }
 0x3b6   :  { %v1298_v17 = vpop.permute.xlu1 %1297 }
 0x3b7   :  { %1287 = vrot.lane.b32.xlu0 %v1286_v58, %s5767_s15  ;;  %v1299_v7 = vadd.f32 %v1298_v17, %v1296_v23 }
 0x3b9   :  { %1300 = vrot.lane.b32.xlu1 %v1299_v7, %s5767_s15 }
 0x3df   :  { %v2385_v14 = vpop.permute.xlu0 %2384 }
 0x3e0   :  { %v6378_v10 = vadd.f32 %v2385_v14, %v2383_v49  ;;  %v6387_v49 = vsub.s32 0, %v6000_v28 }
 0x3e1   :  { %v2398_v11 = vpop.permute.xlu1 %2397 }
 0x3e2   :  { %v6380_v59 = vadd.f32 %v2398_v11, %v2396_v24  ;;  %2387 = vrot.lane.b32.xlu0 %v6378_v10, %s5777_s20  ;;  %7185 = vst [vmem:[#allocation36_spill] sm:$0xff] %v6387_v49 }
 0x3e4   :  { %2400 = vrot.lane.b32.xlu1 %v6380_v59, %s5777_s20 }
 0x429   :  { %v1288_v23 = vpop.permute.xlu0 %1287 }
 0x42a   :  { %v1289_v13 = vadd.f32 %v1288_v23, %v1286_v58 }
 0x42b   :  { %v1301_v35 = vpop.permute.xlu1 %1300 }
 0x42c   :  { %v1290_v9 = vmul.f32 0.001953125, %v1289_v13  ;;  %v1302_v33 = vadd.f32 %v1301_v35, %v1299_v7 }
 0x42e   :  { %v1304_v17 = vmul.f32 %v1290_v9, %v1290_v9  ;;  %v1303_v36 = vmul.f32 0.001953125, %v1302_v33  ;;  %v1309_v24 = vrot.slane %v1290_v9, %v6387_v49 }
 0x430   :  { %v1305_v34 = vsub.f32 %v1303_v36, %v1304_v17  ;;  %v1310_v11 = vsub.f32 %v6301_v16, %v1309_v24  ;;  %v1311_v21 = vsub.f32 %v6305_v20, %v1309_v24  ;;  %v1312_v23 = vsub.f32 %v6299_v15, %v1309_v24 }
 0x431   :  { %v1313_v7 = vsub.f32 %v6303_v19, %v1309_v24 }
 0x432   :  { %v1314_v29 = vadd.f32 1e-05, %v1305_v34 }
 0x434   :  { %5555 = vrsqrt.f32 %v1314_v29 }
 0x43e   :  { %v5556_v14 = vpop.eup %5555 }
 0x43f   :  { %v1319_v58 = vrot.slane %v5556_v14, %v6387_v49 }
 0x441   :  { %v1320_v13 = vmul.f32 %v1319_v58, %v1310_v11  ;;  %v1321_v35 = vmul.f32 %v1319_v58, %v1311_v21  ;;  %v1322_v33 = vmul.f32 %v1319_v58, %v1312_v23  ;;  %v1323_v29 = vmul.f32 %v1319_v58, %v1313_v7 }
 0x443   :  { %v1324_v17 = vmax.f32 %v1320_v13, 0.0  ;;  %v1325_v36 = vmax.f32 %v1321_v35, 0.0  ;;  %v1326_v34 = vmax.f32 %v1322_v33, 0.0  ;;  %v1327_v32 = vmax.f32 %v1323_v29, 0.0  ;;  %v5461_v13 = vld [vmem:[#allocation7 + $0x10] sm:$0xff]  }
 0x445   :  { %v1328_v9 = vrot.slane %v1324_v17, 7  ;;  %v1329_v27 = vrot.slane %v1325_v36, 7  ;;  %v1342_v37 = vpack.c.bf16 %v1325_v36, %v1324_v17  ;;  %v1344_v16 = vrot.slane %v1324_v17, 1 }
 0x446   :  { %v1345_v31 = vrot.slane %v1325_v36, 1  ;;  %v1330_v20 = vrot.slane %v1326_v34, 7  ;;  %v1343_v56 = vpack.c.bf16 %v1327_v32, %v1326_v34  ;;  %v1347_v14 = vrot.slane %v1327_v32, 1 }
 0x447   :  { %4861 = vmatprep.mubr.bf16.mxu0 %v1342_v37  ;;  %v1331_v15 = vrot.slane %v1327_v32, 7  ;;  %v1334_v19 = vsel %vm148_vm0, %v1328_v9, %v1329_v27  ;;  %v1346_v21 = vrot.slane %v1326_v34, 1 }
 0x448   :  { %4862 = vmatmul.mubr.bf16.vlgmr.msra.gmra.mrb[0].mxu0 %v1343_v56  ;;  %v1337_v24 = vmul.f32 %v1334_v19, %v6036_v45  ;;  %v1333_v11 = vsel %vm148_vm0, %v1329_v27, %v1330_v20  ;;  %v1350_v58 = vsel %vm157_vm1, %v1344_v16, %v1345_v31  ;;  %v1351_v23 = vsel %vm157_vm1, %v1347_v14, %v1344_v16  ;;  %v5462_v16 = vld [vmem:[#allocation7 + $0x18] sm:$0xff]  }
 0x449   :  { %4866 = vmatpush3.bf16.msra.mxu0 %v5459_v47  ;;  %v1335_v32 = vsel %vm148_vm0, %v1331_v15, %v1328_v9  ;;  %v1332_v37 = vsel %vm148_vm0, %v1330_v20, %v1331_v15  ;;  %v6409_v56 = vmul.f32 %v1333_v11, %v6021_v38  ;;  %v1349_v7 = vsel %vm157_vm1, %v1345_v31, %v1346_v21 }
 0x44a   :  { %4867 = vmatprep.subr.bf16.mxu0 %v5460_v40  ;;  %v1336_v27 = vmul.f32 %v1335_v32, %v6023_v39  ;;  %v1339_v35 = vmul.f32 %v1332_v37, %v6034_v44  ;;  %v1352_v47 = vmul.f32 %v1350_v58, %v6063_v55  ;;  %v1353_v33 = vmul.f32 %v1349_v7, %v6061_v54  ;;  %v5465_v58 = vld [vmem:[#allocation7 + $0x30] sm:$0xff]   ;;  %v5466_v32 = vld [vmem:[#allocation7 + $0x38] sm:$0xff]   ;;  %v4280_v37 = vld [vmem:[%s7138_s2 + $0xa0] sm:$0xff] }
 0x44b   :  { %v1348_v29 = vsel %vm157_vm1, %v1346_v21, %v1347_v14  ;;  %v6420_v17 = vmul.f32 %v1351_v23, %v6079_v1  ;;  %v5463_v14 = vld [vmem:[#allocation7 + $0x20] sm:$0xff]   ;;  %v588_v23 = vld [vmem:[%s7138_s2 + $0x18] sm:$0xff] }
 0x44c   :  { %v1340_v36 = vpack.c.bf16 %v1337_v24, %v1336_v27  ;;  %v1341_v34 = vpack.c.bf16 %v1339_v35, %v6409_v56  ;;  %v1356_v31 = vpack.c.bf16 %v1353_v33, %v1352_v47  ;;  %v6424_v9 = vmul.f32 %v1348_v29, %v6081_v2  ;;  %v5464_v24 = vld [vmem:[#allocation7 + $0x28] sm:$0xff]   ;;  %v5467_v7 = vld [vmem:[#allocation7 + $0x80] sm:$0xff]   ;;  %v4282_v35 = vld [vmem:[%s7138_s2 + $0xb0] sm:$0xff] }
 0x44d   :  { %4868 = vmatpush3.bf16.msra.mxu0 %v5460_v40  ;;  %v585_v40 = vld [vmem:[%s7138_s2] sm:$0xff]  ;;  %v4281_v56 = vld [vmem:[%s7138_s2 + $0xa8] sm:$0xff] }
 0x44e   :  { %4881 = vmatprep.mubr.bf16.mxu0 %v1340_v36  ;;  %4869 = vmatprep.subr.bf16.mxu0 %v5461_v13  ;;  %v1357_v20 = vpack.c.bf16 %v6420_v17, %v6424_v9  ;;  %v5571_v27 = vld [vmem:[%s7138_s2 + $0x40] sm:$0xff]  ;;  %v5572_v47 = vld [vmem:[%s7138_s2 + $0x48] sm:$0xff]  ;;  %v5573_v36 = vld [vmem:[%s7138_s2 + $0x50] sm:$0xff] }
 0x44f   :  { %v4262_v33 = vadd.f32 -1.0, %v5572_v47  ;;  %v5468_v29 = vld [vmem:[#allocation7 + $0x88] sm:$0xff]   ;;  %v5478_v17 = vld [vmem:[#allocation10 + $0x58] sm:$0xff]   ;;  %v6522_v9 = vld [vmem:[%s7136_s0 + $0x10] sm:$0xff] }
 0x450   :  { %v5472_v47 = vld [vmem:[#allocation7 + $0xa8] sm:$0xff]  }
 0x451   :  { %4870 = vmatpush3.bf16.msra.mxu0 %v5461_v13  ;;  %v4261_v13 = vadd.f32 -1.0, %v5571_v27 }
 0x452   :  { %4871 = vmatprep.subr.bf16.mxu0 %v5462_v16 }
 0x454   :  { %v2388_v15 = vpop.permute.xlu0 %2387 }
 0x455   :  { %4872 = vmatpush3.bf16.msra.mxu0 %v5462_v16  ;;  %v6429_v19 = vadd.f32 %v2388_v15, %v6378_v10  ;;  %v586_v10 = vld [vmem:[%s7138_s2 + $0x8] sm:$0xff]  ;;  %v4263_v16 = vadd.f32 -1.0, %v5573_v36  ;;  %v4283_v15 = vld [vmem:[%s7138_s2 + $0xb8] sm:$0xff] }
 0x456   :  { %v2401_v21 = vpop.permute.xlu1 %2400  ;;  %4873 = vmatprep.subr.bf16.mxu0 %v5463_v14  ;;  %v5578_v36 = vld [vmem:[%s7138_s2 + $0x78] sm:$0xff] }
 0x457   :  { %v6432_v11 = vadd.f32 %v2401_v21, %v6380_v59  ;;  %2390 = vrot.lane.b32.xlu0 %v6429_v19, %s5767_s15  ;;  %v587_v59 = vld [vmem:[%s7138_s2 + $0x10] sm:$0xff]  ;;  %v5574_v21 = vld [vmem:[%s7138_s2 + $0x58] sm:$0xff] }
 0x459   :  { %4874 = vmatpush3.bf16.msra.mxu0 %v5463_v14  ;;  %2403 = vrot.lane.b32.xlu1 %v6432_v11, %s5767_s15  ;;  %v375_v14 = vmul.f32 1e+30, %v4261_v13  ;;  %v5577_v13 = vld [vmem:[%s7138_s2 + $0x70] sm:$0xff] }
 0x45a   :  { %4875 = vmatprep.subr.bf16.mxu0 %v5464_v24 }
 0x45b   :  { %591 = vperm.xlu0 %5353, %v585_v40   ;;  %v376_v40 = vmul.f32 1e+30, %v4262_v33 }
 0x45d   :  { %4876 = vmatpush3.bf16.msra.mxu0 %v5464_v24  ;;  %596 = vperm.xlu1 %5354, %v586_v10   ;;  %v4264_v24 = vadd.f32 -1.0, %v5574_v21  ;;  %v5469_v10 = vld [vmem:[#allocation7 + $0x90] sm:$0xff]   ;;  %v5475_v21 = vld [vmem:[#allocation10 + $0x40] sm:$0xff]  }
 0x45e   :  { %4877 = vmatprep.subr.bf16.mxu0 %v5465_v58 }
 0x45f   :  { %601 = vperm.xlu0 %5353, %v587_v59   ;;  %v378_v59 = vmul.f32 1e+30, %v4264_v24  ;;  %v5476_v24 = vld [vmem:[#allocation10 + $0x48] sm:$0xff]  }
 0x461   :  { %4878 = vmatpush3.bf16.msra.mxu0 %v5465_v58  ;;  %606 = vperm.xlu1 %5354, %v588_v23   ;;  %v377_v58 = vmul.f32 1e+30, %v4263_v16  ;;  %v5470_v23 = vld [vmem:[#allocation7 + $0x98] sm:$0xff]   ;;  %v4268_v16 = vadd.f32 -1.0, %v5578_v36 }
 0x462   :  { %4879 = vmatprep.subr.bf16.mxu0 %v5466_v32 }
 0x463   :  { %730 = vperm.xlu0 %5353, %v4280_v37  }
 0x465   :  { %4880 = vmatpush3.bf16.msra.mxu0 %v5466_v32  ;;  %735 = vperm.xlu1 %5354, %v4281_v56   ;;  %v5576_v32 = vld [vmem:[%s7138_s2 + $0x68] sm:$0xff]  ;;  %v5471_v56 = vld [vmem:[#allocation7 + $0xa0] sm:$0xff]  }
 0x466   :  { %4885 = vmatprep.subr.bf16.mxu0 %v5467_v7  ;;  %v4266_v37 = vadd.f32 -1.0, %v5576_v32  ;;  %v344_v32 = vld [vmem:[%s7140_s4 + $0x8] sm:$0xff] }
 0x467   :  { %740 = vperm.xlu0 %5353, %v4282_v35   ;;  %v4267_v35 = vadd.f32 -1.0, %v5577_v13 }
 0x468   :  { %4882 = vmatmul.mubr.bf16.vlgmr.msra.gmra.mrb[0].mxu0 %v1341_v34  ;;  %v5575_v34 = vld [vmem:[%s7138_s2 + $0x60] sm:$0xff]  ;;  %v384_v27 = vmul.f32 1e+30, %v4266_v37  ;;  %v5482_v37 = vld [vmem:[#allocation10 + $0x78] sm:$0xff]  }
 0x469   :  { %4886 = vmatpush3.bf16.msra.mxu0 %v5467_v7  ;;  %4901 = vmatprep.mubr.bf16.mxu0 %v1356_v31  ;;  %v4265_v31 = vadd.f32 -1.0, %v5575_v34  ;;  %v385_v33 = vmul.f32 1e+30, %v4267_v35  ;;  %v5481_v34 = vld [vmem:[#allocation10 + $0x70] sm:$0xff]  }
 0x46a   :  { %745 = vperm.xlu1 %5354, %v4283_v15   ;;  %4887 = vmatprep.subr.bf16.mxu0 %v5468_v29  ;;  %v386_v15 = vmul.f32 1e+30, %v4268_v16 }
 0x46b   :  { %400 = vperm.xlu0 %5353, %v375_v14   ;;  %v383_v7 = vmul.f32 1e+30, %v4265_v31  ;;  %v5474_v14 = vld [vmem:[#allocation7 + $0xb8] sm:$0xff]   ;;  %v343_v31 = vld [vmem:[%s7140_s4] sm:$0xff] }
 0x46d   :  { %4888 = vmatpush3.bf16.msra.mxu0 %v5468_v29  ;;  %v5473_v29 = vld [vmem:[#allocation7 + $0xb0] sm:$0xff]  }
 0x46e   :  { %405 = vperm.xlu1 %5354, %v376_v40   ;;  %4889 = vmatprep.subr.bf16.mxu0 %v5469_v10  ;;  %v6506_v40 = vld [vmem:[%s7136_s0] sm:$0xff] }
 0x46f   :  { %410 = vperm.xlu0 %5353, %v377_v58   ;;  %v6513_v58 = vld [vmem:[%s7136_s0 + $0x8] sm:$0xff] }
 0x471   :  { %4890 = vmatpush3.bf16.msra.mxu0 %v5469_v10  ;;  %v5477_v10 = vld [vmem:[#allocation10 + $0x50] sm:$0xff]  }
 0x472   :  { %415 = vperm.xlu1 %5354, %v378_v59   ;;  %4891 = vmatprep.subr.bf16.mxu0 %v5470_v23  ;;  %v6533_v59 = vld [vmem:[%s7136_s0 + $0x18] sm:$0xff] }
 0x473   :  { %390 = vrot.lane.b32.xlu0 %v6032_v43, %s5775_s6 }
 0x475   :  { %4892 = vmatpush3.bf16.msra.mxu0 %v5470_v23  ;;  %v5480_v23 = vld [vmem:[#allocation10 + $0x68] sm:$0xff]  }
 0x476   :  { %392 = vrot.lane.b32.xlu1 %v6028_v42, %s5775_s6  ;;  %4893 = vmatprep.subr.bf16.mxu0 %v5471_v56 }
 0x477   :  { %512 = vperm.xlu0 %5353, %v383_v7   ;;  %v345_v7 = vld [vmem:[%s7140_s4 + $0x10] sm:$0xff] }
 0x479   :  { %4894 = vmatpush3.bf16.msra.mxu0 %v5471_v56  ;;  %v6551_v56 = vld [vmem:[#allocation10] sm:$0xff]  }
 0x47a   :  { %517 = vperm.xlu1 %5354, %v384_v27   ;;  %4895 = vmatprep.subr.bf16.mxu0 %v5472_v47  ;;  %v346_v27 = vld [vmem:[%s7140_s4 + $0x18] sm:$0xff] }
 0x47b   :  { %394 = vrot.lane.b32.xlu0 %v6040_v46, %s5775_s6 }
 0x47d   :  { %4896 = vmatpush3.bf16.msra.mxu0 %v5472_v47 }
 0x47e   :  { %522 = vperm.xlu1 %5354, %v385_v33   ;;  %4897 = vmatprep.subr.bf16.mxu0 %v5473_v29 }
 0x47f   :  { %396 = vrot.lane.b32.xlu0 %v6057_v52, %s5775_s6 }
 0x481   :  { %4898 = vmatpush3.bf16.msra.mxu0 %v5473_v29 }
 0x482   :  { %444 = vrot.lane.b32.xlu1 %v6032_v43, %s5778_s11  ;;  %4899 = vmatprep.subr.bf16.mxu0 %v5474_v14 }
 0x483   :  { %446 = vrot.lane.b32.xlu0 %v6028_v42, %s5778_s11 }
 0x485   :  { %4900 = vmatpush3.bf16.msra.mxu0 %v5474_v14 }
 0x486   :  { %527 = vperm.xlu1 %5354, %v386_v15   ;;  %5005 = vmatprep.subr.bf16.mxu0 %v5475_v21 }
 0x487   :  { %448 = vrot.lane.b32.xlu0 %v6040_v46, %s5778_s11 }
 0x488   :  { %4902 = vmatmul.mubr.bf16.vlgmr.msra.gmra.mrb[0].mxu0 %v1357_v20  ;;  %v5479_v20 = vld [vmem:[#allocation10 + $0x60] sm:$0xff]  }
 0x489   :  { %5006 = vmatpush3.bf16.msra.mxu0 %v5475_v21  ;;  %v576_v21 = vrot.slane %v6083_v3, 4 }
 0x48a   :  { %470 = vrot.lane.b32.xlu1 %v6506_v40, %s5775_s6  ;;  %5007 = vmatprep.subr.bf16.mxu0 %v5476_v24 }
 0x48b   :  { %472 = vrot.lane.b32.xlu0 %v6513_v58, %s5775_s6 }
 0x48d   :  { %5008 = vmatpush3.bf16.msra.mxu0 %v5476_v24  ;;  %v579_v24 = vrot.slane %v6112_v18, 4 }
 0x48e   :  { %450 = vrot.lane.b32.xlu1 %v6057_v52, %s5778_s11  ;;  %5009 = vmatprep.subr.bf16.mxu0 %v5477_v10 }
 0x48f   :  { %474 = vrot.lane.b32.xlu0 %v6522_v9, %s5775_s6 }
 0x491   :  { %5010 = vmatpush3.bf16.msra.mxu0 %v5477_v10  ;;  %v577_v10 = vrot.slane %v6002_v30, 4 }
 0x492   :  { %486 = vrot.lane.b32.xlu1 %v6506_v40, %s5778_s11  ;;  %5011 = vmatprep.subr.bf16.mxu0 %v5478_v17 }
 0x493   :  { %488 = vrot.lane.b32.xlu0 %v6513_v58, %s5778_s11 }
 0x495   :  { %5012 = vmatpush3.bf16.msra.mxu0 %v5478_v17  ;;  %v584_v17 = vsel %vm580_vm4, %v579_v24, %v576_v21 }
 0x496   :  { %476 = vrot.lane.b32.xlu1 %v6533_v59, %s5775_s6  ;;  %5013 = vmatprep.subr.bf16.mxu0 %v5479_v20 }
 0x497   :  { %490 = vrot.lane.b32.xlu0 %v6522_v9, %s5778_s11 }
 0x499   :  { %5014 = vmatpush3.bf16.msra.mxu0 %v5479_v20 }
 0x49a   :  { %502 = vrot.lane.b32.xlu1 %v6053_v51, %s5775_s6  ;;  %5015 = vmatprep.subr.bf16.mxu0 %v5480_v23 }
 0x49b   :  { %504 = vrot.lane.b32.xlu0 %v6049_v50, %s5775_s6 }
 0x49d   :  { %5016 = vmatpush3.bf16.msra.mxu0 %v5480_v23  ;;  %v578_v23 = vrot.slane %v6126_v25, 4 }
 0x49e   :  { %349 = vperm.xlu1 %5354, %v343_v31   ;;  %5017 = vmatprep.subr.bf16.mxu0 %v5481_v34 }
 0x49f   :  { %354 = vperm.xlu0 %5353, %v344_v32  }
 0x4a1   :  { %5018 = vmatpush3.bf16.msra.mxu0 %v5481_v34 }
 0x4a2   :  { %492 = vrot.lane.b32.xlu1 %v6533_v59, %s5778_s11  ;;  %5019 = vmatprep.subr.bf16.mxu0 %v5482_v37 }
 0x4a3   :  { %506 = vrot.lane.b32.xlu0 %v6073_v61, %s5775_s6 }
 0x4a5   :  { %5020 = vmatpush3.bf16.msra.mxu0 %v5482_v37  ;;  %v582_v37 = vsel %vm580_vm4, %v577_v10, %v578_v23 }
 0x4a6   :  { %359 = vperm.xlu1 %5354, %v345_v7   ;;  %5025 = vmatprep.subr.bf16.mxu0 %v6551_v56  ;;  %v581_v7 = vsel %vm580_vm4, %v578_v23, %v579_v24 }
 0x4a7   :  { %508 = vrot.lane.b32.xlu0 %v6077_v0, %s5775_s6 }
 0x4aa   :  { %550 = vrot.lane.b32.xlu1 %v6053_v51, %s5778_s11 }
 0x4ab   :  { %552 = vrot.lane.b32.xlu0 %v6049_v50, %s5778_s11 }
 0x4ae   :  { %364 = vperm.xlu1 %5354, %v346_v27  }
 0x4af   :  { %554 = vrot.lane.b32.xlu0 %v6073_v61, %s5778_s11 }
 0x4b2   :  { %556 = vrot.lane.b32.xlu1 %v6077_v0, %s5778_s11 }
 0x4c9   :  { %v2391_v13 = vpop.permute.xlu0 %2390 }
 0x4ca   :  { %v2392_v35 = vadd.f32 %v2391_v13, %v6429_v19  ;;  %v583_v19 = vsel %vm580_vm4, %v576_v21, %v577_v10 }
 0x4cb   :  { %v2404_v47 = vpop.permute.xlu1 %2403 }
 0x4cc   :  { %v2393_v33 = vmul.f32 0.001953125, %v2392_v35  ;;  %v2405_v29 = vadd.f32 %v2404_v47, %v6432_v11 }
 0x4ce   :  { %v2407_v36 = vmul.f32 %v2393_v33, %v2393_v33  ;;  %v2406_v16 = vmul.f32 0.001953125, %v2405_v29  ;;  %v2412_v11 = vrot.slane %v2393_v33, %v6387_v49 }
 0x4d0   :  { %v2408_v14 = vsub.f32 %v2406_v16, %v2407_v36  ;;  %v2413_v30 = vsub.f32 %v6328_v4, %v2412_v11  ;;  %v2414_v13 = vsub.f32 %v6332_v6, %v2412_v11  ;;  %v2415_v25 = vsub.f32 %v6326_v62, %v2412_v11 }
 0x4d1   :  { %v2416_v35 = vsub.f32 %v6330_v5, %v2412_v11 }
 0x4d2   :  { %v2417_v15 = vadd.f32 1e-05, %v2408_v14 }
 0x4d4   :  { %5557 = vrsqrt.f32 %v2417_v15 }
 0x4da   :  { %v592_v20 = vpop.permute.xlu0 %591 }
 0x4db   :  { %v6580_v31 = vmul.f32 %v592_v20, %v584_v17 }
 0x4dc   :  { %v597_v34 = vpop.permute.xlu1 %596 }
 0x4dd   :  { %7186 = vst [vmem:[#allocation37_spill] sm:$0xff] %v6580_v31  ;;  %v6582_v32 = vmul.f32 %v597_v34, %v583_v19 }
 0x4de   :  { %v602_v3 = vpop.permute.xlu0 %601  ;;  %v5558_v18 = vpop.eup %5557 }
 0x4df   :  { %7187 = vst [vmem:[#allocation38_spill] sm:$0xff] %v6582_v32  ;;  %v2422_v47 = vrot.slane %v5558_v18, %v6387_v49  ;;  %v6591_v29 = vmul.f32 %v602_v3, %v582_v37 }
 0x4e0   :  { %v607_v33 = vpop.permute.xlu1 %606 }
 0x4e1   :  { %7188 = vst [vmem:[#allocation39_spill] sm:$0xff] %v6591_v29  ;;  %v6593_v36 = vmul.f32 %v607_v33, %v581_v7  ;;  %v2423_v16 = vmul.f32 %v2422_v47, %v2413_v30  ;;  %v2424_v14 = vmul.f32 %v2422_v47, %v2414_v13  ;;  %v2425_v15 = vmul.f32 %v2422_v47, %v2415_v25 }
 0x4e2   :  { %v2426_v4 = vmul.f32 %v2422_v47, %v2416_v35  ;;  %v731_v21 = vpop.permute.xlu0 %730 }
 0x4e3   :  { %7189 = vst [vmem:[#allocation40_spill] sm:$0xff] %v6593_v36  ;;  %v6597_v6 = vmul.f32 %v731_v21, %v583_v19  ;;  %v6599_v62 = vmax.f32 %v2423_v16, 0.0  ;;  %v6601_v5 = vmax.f32 %v2424_v14, 0.0  ;;  %v6603_v10 = vmax.f32 %v2425_v15, 0.0 }
 0x4e4   :  { %v6605_v20 = vmax.f32 %v2426_v4, 0.0  ;;  %v736_v23 = vpop.permute.xlu1 %735 }
 0x4e5   :  { %7190 = vst [vmem:[#allocation41_spill] sm:$0xff] %v6597_v6  ;;  %v6607_v11 = vmul.f32 %v736_v23, %v582_v37  ;;  %v2445_v3 = vrot.slane %v6599_v62, 7  ;;  %v2446_v18 = vrot.slane %v6601_v5, 7  ;;  %v2447_v19 = vrot.slane %v6603_v10, 7 }
 0x4e6   :  { %v741_v34 = vpop.permute.xlu0 %740  ;;  %v2448_v30 = vrot.slane %v6605_v20, 7  ;;  %v2431_v35 = vrot.slane %v6599_v62, 6  ;;  %v2432_v47 = vrot.slane %v6601_v5, 6 }
 0x4e7   :  { %7191 = vst [vmem:[#allocation42_spill] sm:$0xff] %v6607_v11  ;;  %v6615_v25 = vmul.f32 %v741_v34, %v581_v7  ;;  %v2451_v37 = vsel %vm148_vm0, %v2445_v3, %v2446_v18  ;;  %v2450_v14 = vsel %vm148_vm0, %v2446_v18, %v2447_v19  ;;  %v2433_v18 = vrot.slane %v6603_v10, 6 }
 0x4e8   :  { %v2452_v33 = vsel %vm148_vm0, %v2448_v30, %v2445_v3  ;;  %v2449_v16 = vsel %vm148_vm0, %v2447_v19, %v2448_v30  ;;  %v2454_v4 = vmul.f32 %v2451_v37, %v6036_v45  ;;  %v2455_v21 = vmul.f32 %v2450_v14, %v6021_v38  ;;  %v5484_v45 = vld [vmem:[#allocation10 + $0x8] sm:$0xff]  }
 0x4e9   :  { %7192 = vst [vmem:[#allocation43_spill] sm:$0xff] %v6615_v25  ;;  %v746_v15 = vpop.permute.xlu1 %745  ;;  %v2453_v7 = vmul.f32 %v2452_v33, %v6023_v39  ;;  %v2456_v23 = vmul.f32 %v2449_v16, %v6034_v44  ;;  %v2434_v3 = vrot.slane %v6605_v20, 6  ;;  %v2437_v30 = vsel %vm619_vm2, %v2431_v35, %v2432_v47  ;;  %v5495_v25 = vld [vmem:[#allocation10 + $0xa0] sm:$0xff]  }
 0x4ea   :  { %v6631_v34 = vmul.f32 %v746_v15, %v584_v17  ;;  %v6633_v13 = vpop.permute.xlu0 %400  ;;  %v2440_v39 = vmul.f32 %v2437_v30, %v6225_v41  ;;  %v2436_v16 = vsel %vm619_vm2, %v2432_v47, %v2433_v18  ;;  %v2459_v41 = vpack.c.bf16 %v6601_v5, %v6599_v62 }
 0x4eb   :  { %v2457_v19 = vpack.c.bf16 %v2454_v4, %v2453_v7  ;;  %v2458_v24 = vpack.c.bf16 %v2456_v23, %v2455_v21  ;;  %v2438_v44 = vsel %vm619_vm2, %v2434_v3, %v2431_v35  ;;  %v2435_v33 = vsel %vm619_vm2, %v2433_v18, %v2434_v3 }
 0x4ec   :  { %7193 = vst [vmem:[#allocation44_spill] sm:$0xff] %v6631_v34  ;;  %v2439_v37 = vmul.f32 %v2438_v44, %v6229_v48  ;;  %v6656_v35 = vmul.f32 %v2436_v16, %v6244_v12  ;;  %v5485_v48 = vld [vmem:[#allocation10 + $0x10] sm:$0xff]   ;;  %v6660_v7 = vmul.f32 %v2435_v33, %v6240_v8  ;;  %v2461_v4 = vrot.slane %v6599_v62, 1  ;;  %v5486_v44 = vld [vmem:[#allocation10 + $0x18] sm:$0xff]  }
 0x4ed   :  { %v6644_v17 = vpop.permute.xlu1 %405  ;;  %5021 = vmatprep.mubr.bf16.mxu0 %v2457_v19  ;;  %v2463_v12 = vrot.slane %v6603_v10, 1  ;;  %v2475_v23 = vrot.slane %v6599_v62, 2  ;;  %v2476_v3 = vrot.slane %v6601_v5, 2 }
 0x4ee   :  { %5022 = vmatmul.mubr.bf16.vlgmr.msra.gmra.mrb[4].mxu0 %v2458_v24  ;;  %v6653_v14 = vpop.permute.xlu0 %410  ;;  %v2443_v15 = vpack.c.bf16 %v2440_v39, %v2439_v37  ;;  %v2462_v24 = vrot.slane %v6601_v5, 1  ;;  %v2444_v30 = vpack.c.bf16 %v6660_v7, %v6656_v35  ;;  %v2477_v7 = vrot.slane %v6603_v10, 2 }
 0x4ef   :  { %5026 = vmatpush3.bf16.msra.mxu0 %v6551_v56  ;;  %v2464_v56 = vrot.slane %v6605_v20, 1 }
 0x4f0   :  { %5027 = vmatprep.subr.bf16.mxu0 %v5484_v45  ;;  %5041 = vmatprep.mubr.bf16.mxu0 %v2443_v15  ;;  %v2466_v18 = vsel %vm157_vm1, %v2462_v24, %v2463_v12  ;;  %v2467_v19 = vsel %vm157_vm1, %v2461_v4, %v2462_v24 }
 0x4f1   :  { %v6666_v21 = vpop.permute.xlu1 %415  ;;  %v2465_v39 = vsel %vm157_vm1, %v2463_v12, %v2464_v56  ;;  %v6683_v37 = vmul.f32 %v2467_v19, %v6063_v55  ;;  %v6686_v33 = vmul.f32 %v2466_v18, %v6061_v54  ;;  %v2481_v55 = vsel %vm687_vm3, %v2475_v23, %v2476_v3  ;;  %v5487_v12 = vld [vmem:[#allocation10 + $0x20] sm:$0xff]   ;;  %v5494_v54 = vld [vmem:[#allocation10 + $0x98] sm:$0xff]  }
 0x4f2   :  { %v6672_v8 = vpop.permute.xlu0 %390  ;;  %v6691_v16 = vmul.f32 %v2465_v39, %v6081_v2  ;;  %v6707_v2 = vmul.f32 %v2481_v55, %v6272_v63 }
 0x4f3   :  { %5028 = vmatpush3.bf16.msra.mxu0 %v5484_v45  ;;  %v2468_v45 = vsel %vm157_vm1, %v2464_v56, %v2461_v4  ;;  %v2478_v4 = vrot.slane %v6605_v20, 2  ;;  %v2480_v56 = vsel %vm687_vm3, %v2476_v3, %v2477_v7 }
 0x4f4   :  { %5029 = vmatprep.subr.bf16.mxu0 %v5485_v48  ;;  %v6696_v15 = vmul.f32 %v2468_v45, %v6079_v1  ;;  %v6718_v39 = vmul.f32 %v2480_v56, %v6268_v60  ;;  %v5492_v60 = vld [vmem:[#allocation10 + $0x88] sm:$0xff]  }
 0x4f5   :  { %v6693_v35 = vpop.permute.xlu1 %392  ;;  %v2479_v18 = vsel %vm687_vm3, %v2477_v7, %v2478_v4  ;;  %v2482_v63 = vsel %vm687_vm3, %v2478_v4, %v2475_v23  ;;  %v5488_v7 = vld [vmem:[#allocation10 + $0x28] sm:$0xff]  }
 0x4f6   :  { %v6701_v24 = vpop.permute.xlu0 %512  ;;  %v6728_v3 = vmul.f32 %v2482_v63, %v6283_v22 }
 0x4f7   :  { %5030 = vmatpush3.bf16.msra.mxu0 %v5485_v48  ;;  %v6723_v48 = vmul.f32 %v2479_v18, %v6287_v26  ;;  %v5489_v26 = vld [vmem:[#allocation10 + $0x30] sm:$0xff]   ;;  %v5491_v18 = vld [vmem:[#allocation10 + $0x80] sm:$0xff]  }
 0x4f8   :  { %5031 = vmatprep.subr.bf16.mxu0 %v5486_v44 }
 0x4f9   :  { %v6715_v19 = vpop.permute.xlu1 %517 }
 0x4fa   :  { %v395_v45 = vpop.permute.xlu0 %394 }
 0x4fb   :  { %5032 = vmatpush3.bf16.msra.mxu0 %v5486_v44  ;;  %v5490_v44 = vld [vmem:[#allocation10 + $0x38] sm:$0xff]  }
 0x4fc   :  { %5033 = vmatprep.subr.bf16.mxu0 %v5487_v12 }
 0x4fd   :  { %v6730_v38 = vpop.permute.xlu1 %522 }
 0x4fe   :  { %v397_v28 = vpop.permute.xlu0 %396 }
 0x4ff   :  { %5034 = vmatpush3.bf16.msra.mxu0 %v5487_v12 }
 0x500   :  { %5035 = vmatprep.subr.bf16.mxu0 %v5488_v7 }
 0x501   :  { %v445_v23 = vpop.permute.xlu1 %444 }
 0x502   :  { %v447_v4 = vpop.permute.xlu0 %446 }
 0x503   :  { %5036 = vmatpush3.bf16.msra.mxu0 %v5488_v7  ;;  %v5493_v7 = vld [vmem:[#allocation10 + $0x90] sm:$0xff]  }
 0x504   :  { %5037 = vmatprep.subr.bf16.mxu0 %v5489_v26 }
 0x505   :  { %v6734_v56 = vpop.permute.xlu1 %527 }
 0x506   :  { %v6736_v22 = vpop.permute.xlu0 %448 }
 0x507   :  { %5038 = vmatpush3.bf16.msra.mxu0 %v5489_v26  ;;  %v6748_v26 = vld [vmem:[%s7139_s3] ss:$0 sm:$0xff] }
 0x508   :  { %5039 = vmatprep.subr.bf16.mxu0 %v5490_v44  ;;  %v426_v49 = vadd.f32 %v6748_v26, %v6653_v14  ;;  %v427_v29 = vadd.f32 %v6748_v26, %v6666_v21 }
 0x509   :  { %v471_v63 = vpop.permute.xlu1 %470 }
 0x50a   :  { %v473_v27 = vpop.permute.xlu0 %472  ;;  %v430_v11 = vadd.f32 %v426_v49, %v395_v45  ;;  %v437_v49 = vadd.f32 %v6644_v17, %v6028_v42  ;;  %v439_v42 = vadd.f32 %v6666_v21, %v6057_v52 }
 0x50b   :  { %5040 = vmatpush3.bf16.msra.mxu0 %v5490_v44 }
 0x50c   :  { %5045 = vmatprep.subr.bf16.mxu0 %v5491_v18 }
 0x50d   :  { %v6738_v12 = vpop.permute.xlu1 %450 }
 0x50e   :  { %5042 = vmatmul.mubr.bf16.vlgmr.msra.gmra.mrb[4].mxu0 %v2444_v30  ;;  %v6740_v55 = vpop.permute.xlu0 %474  ;;  %v424_v30 = vadd.f32 %v6748_v26, %v6633_v13 }
 0x50f   :  { %5046 = vmatpush3.bf16.msra.mxu0 %v5491_v18  ;;  %5061 = vmatprep.mubr.bf16.mxu0 %v2459_v41  ;;  %v425_v18 = vadd.f32 %v6748_v26, %v6644_v17 }
 0x510   :  { %5047 = vmatprep.subr.bf16.mxu0 %v5492_v60  ;;  %v428_v5 = vadd.f32 %v424_v30, %v6672_v8 }
 0x511   :  { %v487_v44 = vpop.permute.xlu1 %486  ;;  %v429_v47 = vadd.f32 %v425_v18, %v6693_v35 }
 0x512   :  { %v489_v1 = vpop.permute.xlu0 %488  ;;  %v432_v6 = vmax.f32 %v6506_v40, %v428_v5  ;;  %v5496_v40 = vld [vmem:[#allocation10 + $0xa8] sm:$0xff]  }
 0x513   :  { %5048 = vmatpush3.bf16.msra.mxu0 %v5492_v60  ;;  %v6763_v60 = vld [vmem:[%s7139_s3 + $0x1] ss:$0 sm:$0xff]  ;;  %v433_v35 = vmax.f32 %v6513_v58, %v429_v47  ;;  %v434_v58 = vmax.f32 %v6522_v9, %v430_v11  ;;  %v431_v47 = vadd.f32 %v427_v29, %v397_v28  ;;  %v530_v9 = vadd.f32 %v6748_v26, %v6701_v24  ;;  %s7053_s3 = sld [smem:[#allocation2 + $0x1]] }
 0x514   :  { %5049 = vmatprep.subr.bf16.mxu0 %v5493_v7  ;;  %v458_v8 = vadd.f32 %v6763_v60, %v6633_v13  ;;  %v459_v18 = vadd.f32 %v6763_v60, %v6644_v17  ;;  %v531_v29 = vadd.f32 %v6748_v26, %v6715_v19 }
 0x515   :  { %v6754_v62 = vpop.permute.xlu1 %476  ;;  %v435_v28 = vmax.f32 %v6533_v59, %v431_v47  ;;  %v532_v59 = vadd.f32 %v6748_v26, %v6730_v38 }
 0x516   :  { %v6757_v41 = vpop.permute.xlu0 %490  ;;  %v462_v36 = vadd.f32 %v458_v8, %v445_v23  ;;  %v463_v45 = vadd.f32 %v459_v18, %v447_v4  ;;  %v460_v23 = vadd.f32 %v6763_v60, %v6653_v14  ;;  %v479_v8 = vadd.f32 %v6748_v26, %v473_v27 }
 0x517   :  { %5050 = vmatpush3.bf16.msra.mxu0 %v5493_v7  ;;  %v436_v7 = vadd.f32 %v6633_v13, %v6032_v43  ;;  %v438_v43 = vadd.f32 %v6653_v14, %v6040_v46  ;;  %v441_v13 = vmax.f32 %v433_v35, %v437_v49  ;;  %v494_v14 = vadd.f32 %v6763_v60, %v487_v44  ;;  %v5498_v44 = vld [vmem:[#allocation10 + $0xb8] sm:$0xff]  }
 0x518   :  { %5051 = vmatprep.subr.bf16.mxu0 %v5494_v54  ;;  %v464_v11 = vadd.f32 %v460_v23, %v6736_v22  ;;  %v495_v27 = vadd.f32 %v6763_v60, %v489_v1  ;;  %v480_v35 = vadd.f32 %v6748_v26, %v6740_v55  ;;  %v542_v22 = vadd.f32 %v6701_v24, %v6053_v51 }
 0x519   :  { %v503_v34 = vpop.permute.xlu1 %502  ;;  %v440_v31 = vmax.f32 %v432_v6, %v436_v7  ;;  %v5497_v6 = vld [vmem:[#allocation10 + $0xb0] sm:$0xff]   ;;  %v467_v46 = vmax.f32 %v441_v13, %v463_v45  ;;  %v442_v52 = vmax.f32 %v434_v58, %v438_v43  ;;  %v481_v51 = vadd.f32 %v6748_v26, %v6754_v62 }
 0x51a   :  { %v505_v30 = vpop.permute.xlu0 %504  ;;  %v534_v18 = vadd.f32 %v530_v9, %v503_v34  ;;  %v496_v34 = vadd.f32 %v6763_v60, %v6757_v41 }
 0x51b   :  { %5052 = vmatpush3.bf16.msra.mxu0 %v5494_v54  ;;  %v478_v54 = vadd.f32 %v6748_v26, %v471_v63  ;;  %v466_v17 = vmax.f32 %v440_v31, %v462_v36  ;;  %v461_v36 = vadd.f32 %v6763_v60, %v6666_v21  ;;  %v483_v63 = vmax.f32 %v467_v46, %v479_v8 }
 0x51c   :  { %5053 = vmatprep.subr.bf16.mxu0 %v5495_v25  ;;  %v535_v7 = vadd.f32 %v531_v29, %v505_v30  ;;  %v558_v21 = vadd.f32 %v6763_v60, %v6701_v24  ;;  %v468_v49 = vmax.f32 %v442_v52, %v464_v11  ;;  %v443_v30 = vmax.f32 %v435_v28, %v439_v42  ;;  %v7194_v42 = vld [vmem:[#allocation26_spill] sm:$0xff] }
 0x51d   :  { %v350_v5 = vpop.permute.xlu1 %349  ;;  %v482_v31 = vmax.f32 %v466_v17, %v478_v54  ;;  %v465_v1 = vadd.f32 %v461_v36, %v6738_v12  ;;  %v499_v58 = vmax.f32 %v483_v63, %v495_v27  ;;  %v559_v29 = vadd.f32 %v6763_v60, %v6715_v19 }
 0x51e   :  { %v355_v32 = vpop.permute.xlu0 %354  ;;  %v484_v24 = vmax.f32 %v468_v49, %v480_v35  ;;  %v6817_v41 = vmul.f32 %v350_v5, %v6261_v53  ;;  %v545_v36 = vadd.f32 %v6734_v56, %v6077_v0 }
 0x51f   :  { %5054 = vmatpush3.bf16.msra.mxu0 %v5495_v25  ;;  %v498_v45 = vmax.f32 %v482_v31, %v494_v14  ;;  %v6812_v12 = vmul.f32 %v355_v32, %v6266_v57  ;;  %v539_v43 = vmax.f32 %v499_v58, %v535_v7  ;;  %v469_v23 = vmax.f32 %v443_v30, %v465_v1  ;;  %v5499_v57 = vld [vmem:[#allocation10 + $0xc0] sm:$0xff]   ;;  %v5500_v31 = vld [vmem:[#allocation10 + $0xc8] sm:$0xff]  }
 0x520   :  { %5055 = vmatprep.subr.bf16.mxu0 %v5496_v40  ;;  %v543_v32 = vadd.f32 %v6715_v19, %v6049_v50  ;;  %v500_v17 = vmax.f32 %v484_v24, %v496_v34 }
 0x521   :  { %v493_v25 = vpop.permute.xlu1 %492  ;;  %v538_v54 = vmax.f32 %v498_v45, %v534_v18  ;;  %v485_v53 = vmax.f32 %v469_v23, %v481_v51  ;;  %v846_v5 = vmul.f32 %v6812_v12, %v6812_v12  ;;  %v836_v28 = vadd.f32 %v6812_v12, %v6817_v41 }
 0x522   :  { %v507_v4 = vpop.permute.xlu0 %506  ;;  %v497_v8 = vadd.f32 %v6763_v60, %v493_v25  ;;  %v547_v25 = vmax.f32 %v539_v43, %v543_v32  ;;  %v560_v18 = vadd.f32 %v6763_v60, %v6730_v38  ;;  %v7197_v45 = vpack.c.bf16 %v6686_v33, %v6683_v37  ;;  %v7198_v32 = vld [vmem:[#allocation34_spill] sm:$0xff] }
 0x523   :  { %5056 = vmatpush3.bf16.msra.mxu0 %v5496_v40  ;;  %v533_v40 = vadd.f32 %v6748_v26, %v6734_v56  ;;  %v536_v13 = vadd.f32 %v532_v59, %v507_v4  ;;  %v544_v26 = vadd.f32 %v6730_v38, %v6073_v61  ;;  %v546_v27 = vmax.f32 %v538_v54, %v542_v22  ;;  %v7195_v59 = vld [vmem:[#allocation27_spill] sm:$0xff] }
 0x524   :  { %5057 = vmatprep.subr.bf16.mxu0 %v5497_v6  ;;  %v845_v61 = vmul.f32 %v6817_v41, %v6817_v41  ;;  %v501_v52 = vmax.f32 %v485_v53, %v497_v8  ;;  %v7199_v53 = vld [vmem:[#allocation35_spill] sm:$0xff] }
 0x525   :  { %v360_v55 = vpop.permute.xlu1 %359  ;;  %v540_v14 = vmax.f32 %v500_v17, %v536_v13 }
 0x526   :  { %v509_v47 = vpop.permute.xlu0 %508  ;;  %v6821_v62 = vmul.f32 %v7194_v42, %v360_v55  ;;  %v849_v7 = vadd.f32 %v846_v5, %v845_v61  ;;  %v5502_v42 = vld [vmem:[#allocation10 + $0xd8] sm:$0xff]   ;;  %v3506_v5 = vrot.slane %v7199_v53, 4 }
 0x527   :  { %5058 = vmatpush3.bf16.msra.mxu0 %v5497_v6  ;;  %v537_v6 = vadd.f32 %v533_v40, %v509_v47  ;;  %v548_v38 = vmax.f32 %v540_v14, %v544_v26  ;;  %v3493_v26 = vrot.slane %v7198_v32, 4 }
 0x528   :  { %5059 = vmatprep.subr.bf16.mxu0 %v5498_v44  ;;  %v847_v19 = vmul.f32 %v6821_v62, %v6821_v62  ;;  %v837_v22 = vadd.f32 %v836_v28, %v6821_v62  ;;  %v5504_v28 = vld [vmem:[#allocation10 + $0xe8] sm:$0xff]  }
 0x529   :  { %v551_v9 = vpop.permute.xlu1 %550  ;;  %v541_v1 = vmax.f32 %v501_v52, %v537_v6 }
 0x52a   :  { %v562_v46 = vadd.f32 %v558_v21, %v551_v9  ;;  %v553_v11 = vpop.permute.xlu0 %552  ;;  %v850_v34 = vadd.f32 %v849_v7, %v847_v19 }
 0x52b   :  { %5060 = vmatpush3.bf16.msra.mxu0 %v5498_v44  ;;  %v563_v50 = vadd.f32 %v559_v29, %v553_v11  ;;  %v7196_v44 = vpack.c.bf16 %v6605_v20, %v6603_v10  ;;  %v561_v10 = vadd.f32 %v6763_v60, %v6734_v56  ;;  %v5501_v20 = vld [vmem:[#allocation10 + $0xd0] sm:$0xff]   ;;  %v549_v54 = vmax.f32 %v541_v1, %v545_v36  ;;  %v5503_v11 = vld [vmem:[#allocation10 + $0xe0] sm:$0xff]  }
 0x52c   :  { %5065 = vmatprep.subr.bf16.mxu0 %v5499_v57  ;;  %v6839_v4 = vmax.f32 %v546_v27, %v562_v46  ;;  %v3494_v27 = vadd.f32 %v3493_v26, %v7198_v32  ;;  %v3507_v36 = vadd.f32 %v3506_v5, %v7199_v53 }
 0x52d   :  { %v6841_v63 = vmax.f32 %v547_v25, %v563_v50  ;;  %v365_v35 = vpop.permute.xlu1 %364 }
 0x52e   :  { %v6847_v21 = vmul.f32 %v7195_v59, %v365_v35  ;;  %5062 = vmatmul.mubr.bf16.vlgmr.msra.gmra.mrb[4].mxu0 %v7196_v44  ;;  %v555_v0 = vpop.permute.xlu0 %554  ;;  %v770_v51 = vmul.f32 %v6839_v4, %v6839_v4  ;;  %v5505_v59 = vld [vmem:[#allocation10 + $0xf0] sm:$0xff]  }
 0x52f   :  { %v771_v49 = vmul.f32 %v6841_v63, %v6841_v63  ;;  %5066 = vmatpush3.bf16.msra.mxu0 %v5499_v57  ;;  %5081 = vmatprep.mubr.bf16.mxu0 %v7197_v45  ;;  %v564_v58 = vadd.f32 %v560_v18, %v555_v0  ;;  %v761_v37 = vadd.f32 %v6841_v63, %v6839_v4 }
 0x530   :  { %v838_v55 = vadd.f32 %v837_v22, %v6847_v21  ;;  %v848_v30 = vmul.f32 %v6847_v21, %v6847_v21  ;;  %5067 = vmatprep.subr.bf16.mxu0 %v5500_v31  ;;  %v3495_v22 = vrot.slane %v3494_v27, 2 }
 0x531   :  { %v6866_v33 = vmax.f32 %v548_v38, %v564_v58  ;;  %v557_v40 = vpop.permute.xlu1 %556  ;;  %v774_v13 = vadd.f32 %v771_v49, %v770_v51  ;;  %v3508_v49 = vrot.slane %v3507_v36, 2 }
 0x532   :  { %v839_v47 = vrot.slane %v838_v55, 4  ;;  %v851_v24 = vadd.f32 %v850_v34, %v848_v30  ;;  %v565_v43 = vadd.f32 %v561_v10, %v557_v40  ;;  %v3496_v34 = vadd.f32 %v3495_v22, %v3494_v27  ;;  %v5506_v30 = vld [vmem:[#allocation10 + $0xf8] sm:$0xff]  }
 0x533   :  { %v762_v23 = vadd.f32 %v761_v37, %v6866_v33  ;;  %v772_v56 = vmul.f32 %v6866_v33, %v6866_v33  ;;  %5068 = vmatpush3.bf16.msra.mxu0 %v5500_v31  ;;  %v5514_v27 = vld [vmem:[#allocation10 + $0x138] sm:$0xff]  }
 0x534   :  { %v852_v60 = vrot.slane %v851_v24, 4  ;;  %v6871_v8 = vmax.f32 %v549_v54, %v565_v43  ;;  %5069 = vmatprep.subr.bf16.mxu0 %v5501_v20  ;;  %v840_v17 = vadd.f32 %v839_v47, %v838_v55  ;;  %v3497_v37 = vrot.slane %v3496_v34, 1  ;;  %v5507_v47 = vld [vmem:[#allocation10 + $0x100] sm:$0xff]  }
 0x535   :  { %v775_v57 = vadd.f32 %v774_v13, %v772_v56  ;;  %v5508_v13 = vld [vmem:[#allocation10 + $0x108] sm:$0xff]   ;;  %v7201_v56 = vpack.c.bf16 %v6718_v39, %v6707_v2 }
 0x536   :  { %v763_v9 = vadd.f32 %v762_v23, %v6871_v8  ;;  %v773_v29 = vmul.f32 %v6871_v8, %v6871_v8  ;;  %v853_v14 = vadd.f32 %v852_v60, %v851_v24  ;;  %v841_v61 = vrot.slane %v840_v17, 2  ;;  %v5509_v60 = vld [vmem:[#allocation10 + $0x110] sm:$0xff]  }
 0x537   :  { %5070 = vmatpush3.bf16.msra.mxu0 %v5501_v20  ;;  %v3509_v20 = vadd.f32 %v3508_v49, %v3507_v36  ;;  %v6896_v54 = vadd.f32 %v3497_v37, %v3496_v34  ;;  %v7200_v23 = vpack.c.bf16 %v6696_v15, %v6691_v16  ;;  %v5512_v15 = vld [vmem:[#allocation10 + $0x128] sm:$0xff]   ;;  %v5517_v49 = vld [vmem:[#allocation13 + $0x50] sm:$0xff]   ;;  %v7204_v37 = vld [vmem:[#allocation25_spill] sm:$0xff] }
 0x538   :  { %v764_v6 = vrot.slane %v763_v9, 4  ;;  %v776_v46 = vadd.f32 %v775_v57, %v773_v29  ;;  %5071 = vmatprep.subr.bf16.mxu0 %v5502_v42  ;;  %v854_v31 = vrot.slane %v853_v14, 2  ;;  %v842_v7 = vadd.f32 %v841_v61, %v840_v17  ;;  %v5511_v57 = vld [vmem:[#allocation10 + $0x120] sm:$0xff]   ;;  %v5513_v29 = vld [vmem:[#allocation10 + $0x130] sm:$0xff]  }
 0x539   :  { %v3510_v24 = vrot.slane %v3509_v20, 1  ;;  %v5521_v34 = vld [vmem:[#allocation13 + $0x70] sm:$0xff]  }
 0x53a   :  { %v765_v25 = vadd.f32 %v764_v6, %v763_v9  ;;  %v777_v50 = vrot.slane %v776_v46, 4  ;;  %v855_v0 = vadd.f32 %v854_v31, %v853_v14  ;;  %v843_v58 = vrot.slane %v842_v7, 1 }
 0x53b   :  { %5072 = vmatpush3.bf16.msra.mxu0 %v5502_v42  ;;  %v6900_v43 = vadd.f32 %v3510_v24, %v3509_v20  ;;  %v5510_v42 = vld [vmem:[#allocation10 + $0x118] sm:$0xff]   ;;  %v5524_v20 = vld [vmem:[#allocation13 + $0x8] sm:$0xff]  }
 0x53c   :  { %5073 = vmatprep.subr.bf16.mxu0 %v5503_v11  ;;  %v766_v52 = vrot.slane %v765_v25, 2  ;;  %v778_v19 = vadd.f32 %v777_v50, %v776_v46  ;;  %v856_v10 = vrot.slane %v855_v0, 1  ;;  %v6888_v51 = vadd.f32 %v843_v58, %v842_v7  ;;  %v5520_v58 = vld [vmem:[#allocation13 + $0x68] sm:$0xff]   ;;  %v7206_v24 = vld [vmem:[#allocation37_spill] sm:$0xff] }
 0x53e   :  { %v767_v35 = vadd.f32 %v766_v52, %v765_v25  ;;  %v779_v18 = vrot.slane %v778_v19, 2  ;;  %v6892_v40 = vadd.f32 %v856_v10, %v855_v0  ;;  %v5515_v52 = vld [vmem:[#allocation13 + $0x40] sm:$0xff]  }
 0x53f   :  { %5074 = vmatpush3.bf16.msra.mxu0 %v5503_v11  ;;  %v5523_v10 = vld [vmem:[#allocation13] sm:$0xff]  }
 0x540   :  { %5075 = vmatprep.subr.bf16.mxu0 %v5504_v28  ;;  %v768_v1 = vrot.slane %v767_v35, 1  ;;  %v780_v44 = vadd.f32 %v779_v18, %v778_v19  ;;  %v5516_v18 = vld [vmem:[#allocation13 + $0x48] sm:$0xff]  }
 0x542   :  { %v6880_v45 = vadd.f32 %v768_v1, %v767_v35  ;;  %v781_v38 = vrot.slane %v780_v44, 1  ;;  %v7202_v1 = vpack.c.bf16 %v6728_v3, %v6723_v48  ;;  %v5518_v48 = vld [vmem:[#allocation13 + $0x58] sm:$0xff]   ;;  %v5519_v3 = vld [vmem:[#allocation13 + $0x60] sm:$0xff]  }
 0x543   :  { %5076 = vmatpush3.bf16.msra.mxu0 %v5504_v28 }
 0x544   :  { %783 = vrot.lane.b32.xlu0 %v6880_v45, %s5775_s6  ;;  %5077 = vmatprep.subr.bf16.mxu0 %v5505_v59  ;;  %v6884_v55 = vadd.f32 %v781_v38, %v780_v44 }
 0x546   :  { %796 = vrot.lane.b32.xlu1 %v6884_v55, %s5775_s6 }
 0x547   :  { %5078 = vmatpush3.bf16.msra.mxu0 %v5505_v59  ;;  %v7203_v59 = vld [vmem:[#allocation24_spill] sm:$0xff] }
 0x548   :  { %858 = vrot.lane.b32.xlu0 %v6888_v51, %s5775_s6  ;;  %5079 = vmatprep.subr.bf16.mxu0 %v5506_v30 }
 0x54a   :  { %871 = vrot.lane.b32.xlu1 %v6892_v40, %s5775_s6 }
 0x54b   :  { %5080 = vmatpush3.bf16.msra.mxu0 %v5506_v30  ;;  %v5522_v30 = vld [vmem:[#allocation13 + $0x78] sm:$0xff]  }
 0x54c   :  { %3512 = vrot.lane.b32.xlu0 %v6896_v54, %s5775_s6  ;;  %5085 = vmatprep.subr.bf16.mxu0 %v5507_v47 }
 0x54e   :  { %5082 = vmatmul.mubr.bf16.vlgmr.msra.gmra.mrb[4].mxu0 %v7200_v23  ;;  %3525 = vrot.lane.b32.xlu1 %v6900_v43, %s5775_s6  ;;  %v5525_v23 = vld [vmem:[#allocation13 + $0x10] sm:$0xff]  }
 0x54f   :  { %5086 = vmatpush3.bf16.msra.mxu0 %v5507_v47  ;;  %5101 = vmatprep.mubr.bf16.mxu0 %v7201_v56  ;;  %v7205_v47 = vld [vmem:[#allocation38_spill] sm:$0xff]  ;;  %v5526_v56 = vld [vmem:[#allocation13 + $0x18] sm:$0xff]  }
 0x550   :  { %5087 = vmatprep.subr.bf16.mxu0 %v5508_v13 }
 0x553   :  { %5088 = vmatpush3.bf16.msra.mxu0 %v5508_v13  ;;  %v7207_v13 = vpack.c.bf16 %v7205_v47, %v7206_v24  ;;  %v7219_v47 = vld [vmem:[#allocation43_spill] sm:$0xff] }
 0x554   :  { %5089 = vmatprep.subr.bf16.mxu0 %v5509_v60 }
 0x557   :  { %5090 = vmatpush3.bf16.msra.mxu0 %v5509_v60  ;;  %v5527_v60 = vld [vmem:[#allocation13 + $0x20] sm:$0xff]  }
 0x558   :  { %5091 = vmatprep.subr.bf16.mxu0 %v5510_v42 }
 0x55b   :  { %5092 = vmatpush3.bf16.msra.mxu0 %v5510_v42  ;;  %v6910_v32 = vpop.f32.mrb[0].mxu0  ;;  %v5528_v42 = vld [vmem:[#allocation13 + $0x28] sm:$0xff]  }
 0x55c   :  { %v6912_v16 = vpop.f32.mrb[1].mxu0  ;;  %5093 = vmatprep.subr.bf16.mxu0 %v5511_v57  ;;  %v1714_v53 = vmul.f32 %v6910_v32, %v6910_v32 }
 0x55d   :  { %v6914_v26 = vpop.f32.mrb[2].mxu0  ;;  %v1712_v2 = vmul.f32 %v6912_v16, %v6912_v16 }
 0x55e   :  { %v6916_v17 = vpop.f32.mrb[3].mxu0  ;;  %v1715_v46 = vmul.f32 %v6914_v26, %v6914_v26 }
 0x55f   :  { %v1703_v39 = vadd.f32 %v6916_v17, %v6912_v16  ;;  %v1713_v9 = vmul.f32 %v6916_v17, %v6916_v17  ;;  %5094 = vmatpush3.bf16.msra.mxu0 %v5511_v57  ;;  %v5529_v57 = vld [vmem:[#allocation13 + $0x30] sm:$0xff]  }
 0x560   :  { %5095 = vmatprep.subr.bf16.mxu0 %v5512_v15 }
 0x561   :  { %v1704_v5 = vadd.f32 %v6910_v32, %v1703_v39  ;;  %v1716_v6 = vadd.f32 %v1713_v9, %v1712_v2  ;;  %v5531_v2 = vld [vmem:[#allocation13 + $0x80] sm:$0xff]   ;;  %v5532_v39 = vld [vmem:[#allocation13 + $0x88] sm:$0xff]   ;;  %v7208_v9 = vld [vmem:[#allocation40_spill] sm:$0xff] }
 0x563   :  { %v1705_v11 = vadd.f32 %v6914_v26, %v1704_v5  ;;  %v1717_v14 = vadd.f32 %v1716_v6, %v1714_v53  ;;  %5096 = vmatpush3.bf16.msra.mxu0 %v5512_v15  ;;  %v5530_v15 = vld [vmem:[#allocation13 + $0x38] sm:$0xff]   ;;  %v7211_v5 = vld [vmem:[#allocation22_spill] sm:$0xff]  ;;  %v5533_v6 = vld [vmem:[#allocation13 + $0x90] sm:$0xff]  }
 0x564   :  { %5097 = vmatprep.subr.bf16.mxu0 %v5513_v29 }
 0x565   :  { %v1706_v25 = vrot.slane %v1705_v11, 4  ;;  %v1718_v50 = vadd.f32 %v1717_v14, %v1715_v46  ;;  %v5534_v46 = vld [vmem:[#allocation13 + $0x98] sm:$0xff]   ;;  %v5536_v14 = vld [vmem:[#allocation13 + $0xa8] sm:$0xff]  }
 0x567   :  { %5098 = vmatpush3.bf16.msra.mxu0 %v5513_v29  ;;  %v1707_v61 = vadd.f32 %v1706_v25, %v1705_v11  ;;  %v1719_v28 = vrot.slane %v1718_v50, 4  ;;  %v7209_v29 = vld [vmem:[#allocation39_spill] sm:$0xff]  ;;  %v5535_v11 = vld [vmem:[#allocation13 + $0xa0] sm:$0xff]   ;;  %v5538_v25 = vld [vmem:[#allocation13 + $0xb8] sm:$0xff]  }
 0x568   :  { %5099 = vmatprep.subr.bf16.mxu0 %v5514_v27  ;;  %v7210_v53 = vpack.c.bf16 %v7208_v9, %v7209_v29 }
 0x569   :  { %v1708_v19 = vrot.slane %v1707_v61, 2  ;;  %v1720_v31 = vadd.f32 %v1719_v28, %v1718_v50  ;;  %v5539_v50 = vld [vmem:[#allocation13 + $0xc0] sm:$0xff]   ;;  %v7212_v28 = vld [vmem:[#allocation23_spill] sm:$0xff] }
 0x56b   :  { %5100 = vmatpush3.bf16.msra.mxu0 %v5514_v27  ;;  %v1709_v36 = vadd.f32 %v1708_v19, %v1707_v61  ;;  %v1721_v35 = vrot.slane %v1720_v31, 2  ;;  %v5537_v27 = vld [vmem:[#allocation13 + $0xb0] sm:$0xff]   ;;  %v5540_v61 = vld [vmem:[#allocation13 + $0xc8] sm:$0xff]  }
 0x56c   :  { %5165 = vmatprep.subr.bf16.mxu0 %v5515_v52  ;;  %v5541_v19 = vld [vmem:[#allocation13 + $0xd0] sm:$0xff]  }
 0x56d   :  { %v1710_v7 = vrot.slane %v1709_v36, 1  ;;  %v1722_v22 = vadd.f32 %v1721_v35, %v1720_v31  ;;  %v5542_v31 = vld [vmem:[#allocation13 + $0xd8] sm:$0xff]   ;;  %v5544_v35 = vld [vmem:[#allocation13 + $0xe8] sm:$0xff]  }
 0x56e   :  { %5102 = vmatmul.mubr.bf16.vlgmr.msra.gmra.mrb[4].mxu0 %v7202_v1  ;;  %v5548_v1 = vld [vmem:[#allocation13 + $0x108] sm:$0xff]  }
 0x56f   :  { %5166 = vmatpush3.bf16.msra.mxu0 %v5515_v52  ;;  %5181 = vmatprep.mubr.bf16.mxu0 %v7203_v59  ;;  %v6934_v44 = vadd.f32 %v1710_v7, %v1709_v36  ;;  %v1723_v0 = vrot.slane %v1722_v22, 1  ;;  %v7213_v52 = vld [vmem:[#allocation28_spill] sm:$0xff]  ;;  %v5543_v36 = vld [vmem:[#allocation13 + $0xe0] sm:$0xff]   ;;  %v5546_v7 = vld [vmem:[#allocation13 + $0xf8] sm:$0xff]  }
 0x570   :  { %5167 = vmatprep.subr.bf16.mxu0 %v5516_v18  ;;  %v7214_v59 = vld [vmem:[#allocation29_spill] sm:$0xff] }
 0x571   :  { %1725 = vrot.lane.b32.xlu0 %v6934_v44, %s5775_s6  ;;  %v6938_v38 = vadd.f32 %v1723_v0, %v1722_v22  ;;  %v5547_v22 = vld [vmem:[#allocation13 + $0x100] sm:$0xff]  }
 0x572   :  { %v7215_v0 = vld [vmem:[#allocation42_spill] sm:$0xff] }
 0x573   :  { %5168 = vmatpush3.bf16.msra.mxu0 %v5516_v18  ;;  %1738 = vrot.lane.b32.xlu1 %v6938_v38, %s5775_s6  ;;  %v5545_v18 = vld [vmem:[#allocation13 + $0xf0] sm:$0xff]  }
 0x574   :  { %5169 = vmatprep.subr.bf16.mxu0 %v5517_v49 }
 0x577   :  { %5170 = vmatpush3.bf16.msra.mxu0 %v5517_v49  ;;  %v7216_v49 = vld [vmem:[#allocation41_spill] sm:$0xff] }
 0x578   :  { %5171 = vmatprep.subr.bf16.mxu0 %v5518_v48 }
 0x57b   :  { %5172 = vmatpush3.bf16.msra.mxu0 %v5518_v48  ;;  %v7217_v48 = vpack.c.bf16 %v7215_v0, %v7216_v49 }
 0x57c   :  { %5173 = vmatprep.subr.bf16.mxu0 %v5519_v3 }
 0x57f   :  { %5174 = vmatpush3.bf16.msra.mxu0 %v5519_v3  ;;  %v5549_v3 = vld [vmem:[#allocation13 + $0x110] sm:$0xff]  }
 0x580   :  { %5175 = vmatprep.subr.bf16.mxu0 %v5520_v58 }
 0x583   :  { %5176 = vmatpush3.bf16.msra.mxu0 %v5520_v58  ;;  %v5550_v58 = vld [vmem:[#allocation13 + $0x118] sm:$0xff]  }
 0x584   :  { %5177 = vmatprep.subr.bf16.mxu0 %v5521_v34 }
 0x587   :  { %5178 = vmatpush3.bf16.msra.mxu0 %v5521_v34  ;;  %v5551_v34 = vld [vmem:[#allocation13 + $0x120] sm:$0xff]  }
 0x588   :  { %5179 = vmatprep.subr.bf16.mxu0 %v5522_v30 }
 0x58b   :  { %5180 = vmatpush3.bf16.msra.mxu0 %v5522_v30  ;;  %v5552_v30 = vld [vmem:[#allocation13 + $0x128] sm:$0xff]  }
 0x58c   :  { %5185 = vmatprep.subr.bf16.mxu0 %v5523_v10 }
 0x58e   :  { %5182 = vmatmul.mubr.bf16.vlgmr.msra.gmra.mrb[8].mxu0 %v7204_v37  ;;  %v7218_v37 = vld [vmem:[#allocation44_spill] sm:$0xff] }
 0x58f   :  { %5186 = vmatpush3.bf16.msra.mxu0 %v5523_v10  ;;  %5201 = vmatprep.mubr.bf16.mxu0 %v7207_v13  ;;  %v5553_v10 = vld [vmem:[#allocation13 + $0x130] sm:$0xff]   ;;  %v7220_v24 = vpack.c.bf16 %v7218_v37, %v7219_v47 }
 0x590   :  { %5187 = vmatprep.subr.bf16.mxu0 %v5524_v20 }
 0x593   :  { %5188 = vmatpush3.bf16.msra.mxu0 %v5524_v20  ;;  %v5554_v20 = vld [vmem:[#allocation13 + $0x138] sm:$0xff]  }
 0x594   :  { %5189 = vmatprep.subr.bf16.mxu0 %v5525_v23 }
 0x597   :  { %5190 = vmatpush3.bf16.msra.mxu0 %v5525_v23 }
 0x598   :  { %5191 = vmatprep.subr.bf16.mxu0 %v5526_v56 }
 0x59b   :  { %5192 = vmatpush3.bf16.msra.mxu0 %v5526_v56 }
 0x59c   :  { %5193 = vmatprep.subr.bf16.mxu0 %v5527_v60 }
 0x59f   :  { %5194 = vmatpush3.bf16.msra.mxu0 %v5527_v60 }
 0x5a0   :  { %5195 = vmatprep.subr.bf16.mxu0 %v5528_v42 }
 0x5a3   :  { %5196 = vmatpush3.bf16.msra.mxu0 %v5528_v42 }
 0x5a4   :  { %5197 = vmatprep.subr.bf16.mxu0 %v5529_v57 }
 0x5a7   :  { %5198 = vmatpush3.bf16.msra.mxu0 %v5529_v57 }
 0x5a8   :  { %5199 = vmatprep.subr.bf16.mxu0 %v5530_v15 }
 0x5ab   :  { %5200 = vmatpush3.bf16.msra.mxu0 %v5530_v15 }
 0x5ac   :  { %5205 = vmatprep.subr.bf16.mxu0 %v5531_v2 }
 0x5ae   :  { %5202 = vmatmul.mubr.bf16.vlgmr.msra.gmra.mrb[8].mxu0 %v7210_v53 }
 0x5af   :  { %5206 = vmatpush3.bf16.msra.mxu0 %v5531_v2  ;;  %5221 = vmatprep.mubr.bf16.mxu0 %v7211_v5 }
 0x5b0   :  { %5207 = vmatprep.subr.bf16.mxu0 %v5532_v39 }
 0x5b3   :  { %5208 = vmatpush3.bf16.msra.mxu0 %v5532_v39 }
 0x5b4   :  { %5209 = vmatprep.subr.bf16.mxu0 %v5533_v6 }
 0x5b7   :  { %5210 = vmatpush3.bf16.msra.mxu0 %v5533_v6 }
 0x5b8   :  { %5211 = vmatprep.subr.bf16.mxu0 %v5534_v46 }
 0x5bb   :  { %5212 = vmatpush3.bf16.msra.mxu0 %v5534_v46 }
 0x5bc   :  { %5213 = vmatprep.subr.bf16.mxu0 %v5535_v11 }
 0x5bf   :  { %5214 = vmatpush3.bf16.msra.mxu0 %v5535_v11 }
 0x5c0   :  { %5215 = vmatprep.subr.bf16.mxu0 %v5536_v14 }
 0x5c3   :  { %5216 = vmatpush3.bf16.msra.mxu0 %v5536_v14 }
 0x5c4   :  { %5217 = vmatprep.subr.bf16.mxu0 %v5537_v27 }
 0x5c7   :  { %5218 = vmatpush3.bf16.msra.mxu0 %v5537_v27 }
 0x5c8   :  { %5219 = vmatprep.subr.bf16.mxu0 %v5538_v25 }
 0x5cb   :  { %5220 = vmatpush3.bf16.msra.mxu0 %v5538_v25 }
 0x5cc   :  { %5225 = vmatprep.subr.bf16.mxu0 %v5539_v50 }
 0x5ce   :  { %5222 = vmatmul.mubr.bf16.vlgmr.msra.gmra.mrb[8].mxu0 %v7212_v28 }
 0x5cf   :  { %5226 = vmatpush3.bf16.msra.mxu0 %v5539_v50  ;;  %5241 = vmatprep.mubr.bf16.mxu0 %v7213_v52 }
 0x5d0   :  { %5227 = vmatprep.subr.bf16.mxu0 %v5540_v61 }
 0x5d3   :  { %5228 = vmatpush3.bf16.msra.mxu0 %v5540_v61 }
 0x5d4   :  { %5229 = vmatprep.subr.bf16.mxu0 %v5541_v19 }
 0x5d7   :  { %5230 = vmatpush3.bf16.msra.mxu0 %v5541_v19 }
 0x5d8   :  { %5231 = vmatprep.subr.bf16.mxu0 %v5542_v31 }
 0x5db   :  { %5232 = vmatpush3.bf16.msra.mxu0 %v5542_v31 }
 0x5dc   :  { %5233 = vmatprep.subr.bf16.mxu0 %v5543_v36 }
 0x5df   :  { %5234 = vmatpush3.bf16.msra.mxu0 %v5543_v36 }
 0x5e0   :  { %5235 = vmatprep.subr.bf16.mxu0 %v5544_v35 }
 0x5e3   :  { %5236 = vmatpush3.bf16.msra.mxu0 %v5544_v35 }
 0x5e4   :  { %5237 = vmatprep.subr.bf16.mxu0 %v5545_v18 }
 0x5e7   :  { %5238 = vmatpush3.bf16.msra.mxu0 %v5545_v18 }
 0x5e8   :  { %5239 = vmatprep.subr.bf16.mxu0 %v5546_v7 }
 0x5eb   :  { %5240 = vmatpush3.bf16.msra.mxu0 %v5546_v7 }
 0x5ec   :  { %5245 = vmatprep.subr.bf16.mxu0 %v5547_v22 }
 0x5ee   :  { %5242 = vmatmul.mubr.bf16.vlgmr.msra.gmra.mrb[8].mxu0 %v7214_v59 }
 0x5ef   :  { %5246 = vmatpush3.bf16.msra.mxu0 %v5547_v22  ;;  %5261 = vmatprep.mubr.bf16.mxu0 %v7217_v48 }
 0x5f0   :  { %5247 = vmatprep.subr.bf16.mxu0 %v5548_v1 }
 0x5f3   :  { %5248 = vmatpush3.bf16.msra.mxu0 %v5548_v1 }
 0x5f4   :  { %5249 = vmatprep.subr.bf16.mxu0 %v5549_v3 }
 0x5f7   :  { %5250 = vmatpush3.bf16.msra.mxu0 %v5549_v3 }
 0x5f8   :  { %5251 = vmatprep.subr.bf16.mxu0 %v5550_v58 }
 0x5fb   :  { %5252 = vmatpush3.bf16.msra.mxu0 %v5550_v58 }
 0x5fc   :  { %5253 = vmatprep.subr.bf16.mxu0 %v5551_v34 }
 0x5ff   :  { %5254 = vmatpush3.bf16.msra.mxu0 %v5551_v34 }
 0x600   :  { %5255 = vmatprep.subr.bf16.mxu0 %v5552_v30 }
 0x603   :  { %5256 = vmatpush3.bf16.msra.mxu0 %v5552_v30 }
 0x604   :  { %5257 = vmatprep.subr.bf16.mxu0 %v5553_v10 }
 0x607   :  { %5258 = vmatpush3.bf16.msra.mxu0 %v5553_v10 }
 0x608   :  { %5259 = vmatprep.subr.bf16.mxu0 %v5554_v20 }
 0x60b   :  { %5260 = vmatpush3.bf16.msra.mxu0 %v5554_v20 }
 0x60e   :  { %5262 = vmatmul.mubr.bf16.vlgmr.msra.gmra.mrb[8].mxu0 %v7220_v24  ;;  %v784_v24 = vpop.permute.xlu0 %783 }
 0x641   :  { %v6959_v13 = vpop.f32.mrb[4].mxu0 }
 0x642   :  { %v6961_v23 = vpop.f32.mrb[5].mxu0  ;;  %v3081_v2 = vmul.f32 %v6959_v13, %v6959_v13 }
 0x643   :  { %v6963_v56 = vpop.f32.mrb[6].mxu0  ;;  %v3079_v42 = vmul.f32 %v6961_v23, %v6961_v23 }
 0x644   :  { %v6965_v60 = vpop.f32.mrb[7].mxu0  ;;  %v3082_v29 = vmul.f32 %v6963_v56, %v6963_v56 }
 0x645   :  { %v3070_v57 = vadd.f32 %v6965_v60, %v6961_v23  ;;  %v3080_v15 = vmul.f32 %v6965_v60, %v6965_v60 }
 0x647   :  { %v3071_v39 = vadd.f32 %v6959_v13, %v3070_v57  ;;  %v3083_v9 = vadd.f32 %v3080_v15, %v3079_v42  ;;  %v797_v15 = vpop.permute.xlu1 %796 }
 0x649   :  { %v3072_v53 = vadd.f32 %v6963_v56, %v3071_v39  ;;  %v3084_v5 = vadd.f32 %v3083_v9, %v3081_v2 }
 0x64b   :  { %v3073_v6 = vrot.slane %v3072_v53, 4  ;;  %v3085_v46 = vadd.f32 %v3084_v5, %v3082_v29 }
 0x64d   :  { %v3074_v11 = vadd.f32 %v3073_v6, %v3072_v53  ;;  %v3086_v14 = vrot.slane %v3085_v46, 4  ;;  %v859_v53 = vpop.permute.xlu0 %858 }
 0x64f   :  { %v3075_v27 = vrot.slane %v3074_v11, 2  ;;  %v3087_v25 = vadd.f32 %v3086_v14, %v3085_v46  ;;  %v872_v46 = vpop.permute.xlu1 %871  ;;  %v785_v14 = vadd.f32 %v784_v24, %v6880_v45 }
 0x651   :  { %v3076_v50 = vadd.f32 %v3075_v27, %v3074_v11  ;;  %v3088_v61 = vrot.slane %v3087_v25, 2  ;;  %v3513_v27 = vpop.permute.xlu0 %3512 }
 0x653   :  { %v3077_v28 = vrot.slane %v3076_v50, 1  ;;  %v3089_v52 = vadd.f32 %v3088_v61, %v3087_v25  ;;  %v798_v25 = vadd.f32 %v797_v15, %v6884_v55  ;;  %v860_v61 = vadd.f32 %v859_v53, %v6888_v51 }
 0x655   :  { %v3078_v19 = vadd.f32 %v3077_v28, %v3076_v50  ;;  %v3090_v31 = vrot.slane %v3089_v52, 1  ;;  %v3526_v50 = vpop.permute.xlu1 %3525  ;;  %v1726_v28 = vpop.permute.xlu0 %1725 }
 0x656   :  { %v1727_v45 = vadd.f32 %v1726_v28, %v6934_v44  ;;  %v3527_v44 = vadd.f32 %v3526_v50, %v6900_v43 }
 0x657   :  { %3092 = vrot.lane.b32.xlu0 %v3078_v19, %s5775_s6  ;;  %v3091_v36 = vadd.f32 %v3090_v31, %v3089_v52  ;;  %v873_v52 = vadd.f32 %v872_v46, %v6892_v40  ;;  %v3514_v40 = vadd.f32 %v3513_v27, %v6896_v54 }
 0x659   :  { %3105 = vrot.lane.b32.xlu1 %v3091_v36, %s5775_s6  ;;  %v1739_v31 = vpop.permute.xlu1 %1738 }
 0x65a   :  { %v1740_v55 = vadd.f32 %v1739_v31, %v6938_v38 }
 0x6e1   :  { %v6981_v35 = vpop.f32.mrb[8].mxu0 }
 0x6e2   :  { %v6983_v18 = vpop.f32.mrb[9].mxu0  ;;  %v4157_v49 = vmul.f32 %v6981_v35, %v6981_v35 }
 0x6e3   :  { %v6985_v7 = vpop.f32.mrb[10].mxu0  ;;  %v4155_v1 = vmul.f32 %v6983_v18, %v6983_v18 }
 0x6e4   :  { %v6987_v22 = vpop.f32.mrb[11].mxu0  ;;  %v4158_v58 = vmul.f32 %v6985_v7, %v6985_v7 }
 0x6e5   :  { %v4146_v59 = vadd.f32 %v6987_v22, %v6983_v18  ;;  %v4156_v0 = vmul.f32 %v6987_v22, %v6987_v22 }
 0x6e7   :  { %v4147_v48 = vadd.f32 %v6981_v35, %v4146_v59  ;;  %v4159_v3 = vadd.f32 %v4156_v0, %v4155_v1  ;;  %v3093_v1 = vpop.permute.xlu0 %3092  ;;  %v3106_v59 = vpop.permute.xlu1 %3105 }
 0x6e8   :  { %v3094_v0 = vadd.f32 %v3093_v1, %v3078_v19  ;;  %v3107_v51 = vadd.f32 %v3106_v59, %v3091_v36 }
 0x6e9   :  { %v4148_v34 = vadd.f32 %v6985_v7, %v4147_v48  ;;  %v4160_v30 = vadd.f32 %v4159_v3, %v4157_v49 }
 0x6eb   :  { %v4149_v10 = vrot.slane %v4148_v34, 4  ;;  %v4161_v20 = vadd.f32 %v4160_v30, %v4158_v58 }
 0x6ed   :  { %v4150_v37 = vadd.f32 %v4149_v10, %v4148_v34  ;;  %v4162_v47 = vrot.slane %v4161_v20, 4 }
 0x6ef   :  { %v4151_v42 = vrot.slane %v4150_v37, 2  ;;  %v4163_v57 = vadd.f32 %v4162_v47, %v4161_v20 }
 0x6f1   :  { %v4152_v2 = vadd.f32 %v4151_v42, %v4150_v37  ;;  %v4164_v39 = vrot.slane %v4163_v57, 2 }
 0x6f3   :  { %v4153_v9 = vrot.slane %v4152_v2, 1  ;;  %v4165_v29 = vadd.f32 %v4164_v39, %v4163_v57 }
 0x6f5   :  { %v4154_v5 = vadd.f32 %v4153_v9, %v4152_v2  ;;  %v4166_v6 = vrot.slane %v4165_v29, 1 }
 0x6f7   :  { %4168 = vrot.lane.b32.xlu0 %v4154_v5, %s5775_s6  ;;  %v4167_v11 = vadd.f32 %v4166_v6, %v4165_v29 }
 0x6f9   :  { %4181 = vrot.lane.b32.xlu1 %v4167_v11, %s5775_s6 }
 0x6fb   :  { %786 = vrot.lane.b32.xlu0 %v785_v14, %s5776_s18 }
 0x6fd   :  { %799 = vrot.lane.b32.xlu1 %v798_v25, %s5776_s18 }
 0x6ff   :  { %861 = vrot.lane.b32.xlu0 %v860_v61, %s5776_s18 }
 0x701   :  { %874 = vrot.lane.b32.xlu1 %v873_v52, %s5776_s18 }
 0x703   :  { %1728 = vrot.lane.b32.xlu0 %v1727_v45, %s5776_s18 }
 0x705   :  { %1741 = vrot.lane.b32.xlu1 %v1740_v55, %s5776_s18 }
 0x707   :  { %3095 = vrot.lane.b32.xlu0 %v3094_v0, %s5776_s18 }
 0x709   :  { %3108 = vrot.lane.b32.xlu1 %v3107_v51, %s5776_s18 }
 0x70b   :  { %3515 = vrot.lane.b32.xlu0 %v3514_v40, %s5776_s18 }
 0x70d   :  { %3528 = vrot.lane.b32.xlu1 %v3527_v44, %s5776_s18 }
 0x769   :  { %v4169_v38 = vpop.permute.xlu0 %4168 }
 0x76a   :  { %v4170_v49 = vadd.f32 %v4169_v38, %v4154_v5 }
 0x76b   :  { %v4182_v48 = vpop.permute.xlu1 %4181 }
 0x76c   :  { %v4183_v3 = vadd.f32 %v4182_v48, %v4167_v11  ;;  %4171 = vrot.lane.b32.xlu0 %v4170_v49, %s5776_s18 }
 0x76d   :  { %v787_v19 = vpop.permute.xlu0 %786 }
 0x76e   :  { %v788_v36 = vadd.f32 %v787_v19, %v785_v14  ;;  %4184 = vrot.lane.b32.xlu1 %v4183_v3, %s5776_s18  ;;  %s7055_s18 = sld [smem:[#allocation2 + $0x2]] }
 0x76f   :  { %v800_v58 = vpop.permute.xlu1 %799 }
 0x770   :  { %v801_v54 = vadd.f32 %v800_v58, %v798_v25  ;;  %789 = vrot.lane.b32.xlu0 %v788_v36, %s5777_s20 }
 0x771   :  { %v862_v34 = vpop.permute.xlu0 %861 }
 0x772   :  { %v863_v43 = vadd.f32 %v862_v34, %v860_v61  ;;  %802 = vrot.lane.b32.xlu1 %v801_v54, %s5777_s20 }
 0x773   :  { %v875_v30 = vpop.permute.xlu1 %874 }
 0x774   :  { %v876_v10 = vadd.f32 %v875_v30, %v873_v52  ;;  %864 = vrot.lane.b32.xlu0 %v863_v43, %s5777_s20 }
 0x775   :  { %v1729_v20 = vpop.permute.xlu0 %1728 }
 0x776   :  { %v1730_v37 = vadd.f32 %v1729_v20, %v1727_v45  ;;  %877 = vrot.lane.b32.xlu1 %v876_v10, %s5777_s20 }
 0x777   :  { %v1742_v47 = vpop.permute.xlu1 %1741 }
 0x778   :  { %v1743_v24 = vadd.f32 %v1742_v47, %v1740_v55  ;;  %1731 = vrot.lane.b32.xlu0 %v1730_v37, %s5777_s20 }
 0x779   :  { %v3096_v42 = vpop.permute.xlu0 %3095 }
 0x77a   :  { %v3097_v57 = vadd.f32 %v3096_v42, %v3094_v0  ;;  %1744 = vrot.lane.b32.xlu1 %v1743_v24, %s5777_s20 }
 0x77b   :  { %v3109_v15 = vpop.permute.xlu1 %3108 }
 0x77c   :  { %v3110_v2 = vadd.f32 %v3109_v15, %v3107_v51  ;;  %3098 = vrot.lane.b32.xlu0 %v3097_v57, %s5777_s20 }
 0x77d   :  { %v3516_v39 = vpop.permute.xlu0 %3515 }
 0x77e   :  { %v3517_v9 = vadd.f32 %v3516_v39, %v3514_v40  ;;  %3111 = vrot.lane.b32.xlu1 %v3110_v2, %s5777_s20 }
 0x77f   :  { %v3529_v29 = vpop.permute.xlu1 %3528 }
 0x780   :  { %v3530_v53 = vadd.f32 %v3529_v29, %v3527_v44  ;;  %3518 = vrot.lane.b32.xlu0 %v3517_v9, %s5777_s20 }
 0x782   :  { %3531 = vrot.lane.b32.xlu1 %v3530_v53, %s5777_s20 }
 0x7de   :  { %v4172_v5 = vpop.permute.xlu0 %4171 }
 0x7df   :  { %v4173_v6 = vadd.f32 %v4172_v5, %v4170_v49 }
 0x7e0   :  { %v4185_v46 = vpop.permute.xlu1 %4184 }
 0x7e1   :  { %v4186_v11 = vadd.f32 %v4185_v46, %v4183_v3  ;;  %4174 = vrot.lane.b32.xlu0 %v4173_v6, %s5777_s20 }
 0x7e2   :  { %v790_v14 = vpop.permute.xlu0 %789 }
 0x7e3   :  { %v791_v27 = vadd.f32 %v790_v14, %v788_v36  ;;  %4187 = vrot.lane.b32.xlu1 %v4186_v11, %s5777_s20  ;;  %s7057_s20 = sld [smem:[#allocation2 + $0x4]] }
 0x7e4   :  { %v803_v25 = vpop.permute.xlu1 %802 }
 0x7e5   :  { %v804_v50 = vadd.f32 %v803_v25, %v801_v54  ;;  %792 = vrot.lane.b32.xlu0 %v791_v27, %s5767_s15 }
 0x7e6   :  { %v865_v61 = vpop.permute.xlu0 %864 }
 0x7e7   :  { %v866_v28 = vadd.f32 %v865_v61, %v863_v43  ;;  %805 = vrot.lane.b32.xlu1 %v804_v50, %s5767_s15 }
 0x7e8   :  { %v878_v52 = vpop.permute.xlu1 %877 }
 0x7e9   :  { %v879_v31 = vadd.f32 %v878_v52, %v876_v10  ;;  %867 = vrot.lane.b32.xlu0 %v866_v28, %s5767_s15 }
 0x7ea   :  { %v1732_v45 = vpop.permute.xlu0 %1731 }
 0x7eb   :  { %v1733_v1 = vadd.f32 %v1732_v45, %v1730_v37  ;;  %880 = vrot.lane.b32.xlu1 %v879_v31, %s5767_s15 }
 0x7ec   :  { %v1745_v55 = vpop.permute.xlu1 %1744 }
 0x7ed   :  { %v1746_v59 = vadd.f32 %v1745_v55, %v1743_v24  ;;  %1734 = vrot.lane.b32.xlu0 %v1733_v1, %s5767_s15 }
 0x7ee   :  { %v3099_v0 = vpop.permute.xlu0 %3098 }
 0x7ef   :  { %v3100_v51 = vadd.f32 %v3099_v0, %v3097_v57  ;;  %1747 = vrot.lane.b32.xlu1 %v1746_v59, %s5767_s15 }
 0x7f0   :  { %v3112_v40 = vpop.permute.xlu1 %3111 }
 0x7f1   :  { %v3113_v44 = vadd.f32 %v3112_v40, %v3110_v2  ;;  %3101 = vrot.lane.b32.xlu0 %v3100_v51, %s5767_s15 }
 0x7f2   :  { %v3519_v38 = vpop.permute.xlu0 %3518 }
 0x7f3   :  { %v3520_v49 = vadd.f32 %v3519_v38, %v3517_v9  ;;  %3114 = vrot.lane.b32.xlu1 %v3113_v44, %s5767_s15 }
 0x7f4   :  { %v3532_v48 = vpop.permute.xlu1 %3531 }
 0x7f5   :  { %v3533_v3 = vadd.f32 %v3532_v48, %v3530_v53  ;;  %3521 = vrot.lane.b32.xlu0 %v3520_v49, %s5767_s15 }
 0x7f7   :  { %3534 = vrot.lane.b32.xlu1 %v3533_v3, %s5767_s15 }
 0x853   :  { %v4175_v19 = vpop.permute.xlu0 %4174 }
 0x854   :  { %v7045_v36 = vadd.f32 %v4175_v19, %v4173_v6 }
 0x855   :  { %v4188_v58 = vpop.permute.xlu1 %4187 }
 0x856   :  { %v7047_v54 = vadd.f32 %v4188_v58, %v4186_v11  ;;  %4177 = vrot.lane.b32.xlu0 %v7045_v36, %s5767_s15 }
 0x857   :  { %v793_v34 = vpop.permute.xlu0 %792 }
 0x858   :  { %v794_v43 = vadd.f32 %v793_v34, %v791_v27  ;;  %4190 = vrot.lane.b32.xlu1 %v7047_v54, %s5767_s15  ;;  %s4284_s15 = sld [smem:[#allocation2 + $0x3]]  ;;  %v821_v34 = vstv %s7053_s3 }
 0x859   :  { %v806_v30 = vpop.permute.xlu1 %805 }
 0x85a   :  { %v795_v10 = vmul.f32 0.001953125, %v794_v43  ;;  %v807_v20 = vadd.f32 %v806_v30, %v804_v50 }
 0x85b   :  { %v868_v37 = vpop.permute.xlu0 %867 }
 0x85c   :  { %v809_v47 = vmul.f32 %v795_v10, %v795_v10  ;;  %v808_v24 = vmul.f32 0.001953125, %v807_v20  ;;  %v869_v42 = vadd.f32 %v868_v37, %v866_v28  ;;  %v7221_v37 = vld [vmem:[#allocation36_spill] sm:$0xff] }
 0x85d   :  { %v881_v57 = vpop.permute.xlu1 %880 }
 0x85e   :  { %v810_v15 = vsub.f32 %v808_v24, %v809_v47  ;;  %v870_v2 = vmul.f32 0.001953125, %v869_v42  ;;  %v882_v39 = vadd.f32 %v881_v57, %v879_v31  ;;  %v814_v47 = vrot.slane %v795_v10, %v7221_v37  ;;  %v5584_v10 = vld [vmem:[%s7136_s0 + $0x8] sm:$0xff] }
 0x85f   :  { %v1735_v9 = vpop.permute.xlu0 %1734  ;;  %v896_v42 = vstv %s7055_s18 }
 0x860   :  { %v1736_v29 = vadd.f32 %v1735_v9, %v1733_v1  ;;  %v819_v53 = vadd.f32 1e-05, %v810_v15  ;;  %v884_v5 = vmul.f32 %v870_v2, %v870_v2  ;;  %v883_v6 = vmul.f32 0.001953125, %v882_v39 }
 0x861   :  { %v1748_v46 = vpop.permute.xlu1 %1747  ;;  %v889_v15 = vrot.slane %v870_v2, %v7221_v37  ;;  %v1763_v39 = vstv %s7057_s20  ;;  %v3130_v9 = vstv %s7061_s26  ;;  %v5585_v2 = vld [vmem:[%s7136_s0 + $0x10] sm:$0xff] }
 0x862   :  { %v1737_v11 = vmul.f32 0.001953125, %v1736_v29  ;;  %v1749_v14 = vadd.f32 %v1748_v46, %v1746_v59  ;;  %5559 = vrsqrt.f32 %v819_v53  ;;  %v885_v25 = vsub.f32 %v883_v6, %v884_v5  ;;  %v5583_v53 = vld [vmem:[%s7136_s0] sm:$0xff] }
 0x863   :  { %v3102_v27 = vpop.permute.xlu0 %3101  ;;  %v3550_v46 = vstv %s7065_s27 }
 0x864   :  { %v1751_v50 = vmul.f32 %v1737_v11, %v1737_v11  ;;  %v1750_v61 = vmul.f32 0.001953125, %v1749_v14  ;;  %v3103_v28 = vadd.f32 %v3102_v27, %v3100_v51  ;;  %v894_v31 = vadd.f32 1e-05, %v885_v25  ;;  %v5586_v25 = vld [vmem:[%s7136_s0 + $0x18] sm:$0xff]  ;;  %s4474_s0 = sld [smem:[#allocation2 + $0x7]] }
 0x865   :  { %v3115_v52 = vpop.permute.xlu1 %3114 }
 0x866   :  { %v1752_v45 = vsub.f32 %v1750_v61, %v1751_v50  ;;  %v7059_v1 = vmul.f32 0.001953125, %v3103_v28  ;;  %v3116_v55 = vadd.f32 %v3115_v52, %v3113_v44  ;;  %5561 = vrsqrt.f32 %v894_v31 }
 0x867   :  { %v3522_v59 = vpop.permute.xlu0 %3521  ;;  %v815_v28 = vsub.f32 %v6839_v4, %v814_v47  ;;  %v816_v52 = vsub.f32 %v6841_v63, %v814_v47  ;;  %v817_v31 = vsub.f32 %v6866_v33, %v814_v47 }
 0x868   :  { %v3523_v0 = vadd.f32 %v3522_v59, %v3520_v49  ;;  %v1761_v40 = vadd.f32 1e-05, %v1752_v45  ;;  %v3118_v51 = vmul.f32 %v7059_v1, %v7059_v1  ;;  %v3117_v38 = vmul.f32 0.001953125, %v3116_v55 }
 0x869   :  { %v3535_v48 = vpop.permute.xlu1 %3534  ;;  %v755_v49 = vstv %s4284_s15  ;;  %v1756_v45 = vrot.slane %v1737_v11, %v7221_v37  ;;  %v818_v55 = vsub.f32 %v6871_v8, %v814_v47  ;;  %v890_v59 = vsub.f32 %v6817_v41, %v889_v15 }
 0x86a   :  { %v3524_v19 = vmul.f32 0.001953125, %v3523_v0  ;;  %v3536_v58 = vadd.f32 %v3535_v48, %v3533_v3  ;;  %5563 = vrsqrt.f32 %v1761_v40  ;;  %v3119_v43 = vsub.f32 %v3117_v38, %v3118_v51 }
 0x86b   :  { %v756_v5 = vmul.f32 %v5583_v53, %v755_v49  ;;  %v757_v6 = vmul.f32 %v5584_v10, %v755_v49  ;;  %v758_v27 = vmul.f32 %v5585_v2, %v755_v49  ;;  %v759_v50 = vmul.f32 %v5586_v25, %v755_v49  ;;  %v7222_v25 = vld [vmem:[#allocation31_spill] sm:$0xff] }
 0x86c   :  { %v3538_v44 = vmul.f32 %v3524_v19, %v3524_v19  ;;  %v5560_v30 = vpop.eup %5559  ;;  %v3537_v20 = vmul.f32 0.001953125, %v3536_v58  ;;  %v3128_v57 = vadd.f32 1e-05, %v3119_v43  ;;  %v891_v40 = vsub.f32 %v6812_v12, %v889_v15 }
 0x86d   :  { %v822_v24 = vmul.f32 %v5560_v30, %v821_v34  ;;  %v892_v51 = vsub.f32 %v6821_v62, %v889_v15  ;;  %v893_v38 = vsub.f32 %v6847_v21, %v889_v15  ;;  %v1757_v11 = vsub.f32 %v6912_v16, %v1756_v45 }
 0x86e   :  { %v3539_v29 = vsub.f32 %v3537_v20, %v3538_v44  ;;  %5565 = vrsqrt.f32 %v3128_v57  ;;  %v1758_v8 = vsub.f32 %v6916_v17, %v1756_v45  ;;  %v1759_v41 = vsub.f32 %v6910_v32, %v1756_v45 }
 0x86f   :  { %v826_v3 = vrot.slane %v822_v24, %v7221_v37  ;;  %v1760_v12 = vsub.f32 %v6914_v26, %v1756_v45  ;;  %v3123_v62 = vrot.slane %v7059_v1, %v7221_v37  ;;  %v3543_v21 = vrot.slane %v3524_v19, %v7221_v37 }
 0x870   :  { %v3548_v14 = vadd.f32 1e-05, %v3539_v29  ;;  %v5562_v61 = vpop.eup %5561 }
 0x871   :  { %v897_v0 = vmul.f32 %v5562_v61, %v896_v42  ;;  %v827_v48 = vmul.f32 %v826_v3, %v815_v28  ;;  %v828_v58 = vmul.f32 %v826_v3, %v816_v52  ;;  %v829_v33 = vmul.f32 %v826_v3, %v817_v31 }
 0x872   :  { %5567 = vrsqrt.f32 %v3548_v14  ;;  %v830_v34 = vmul.f32 %v826_v3, %v818_v55  ;;  %v3124_v29 = vsub.f32 %v6961_v23, %v3123_v62  ;;  %v3125_v1 = vsub.f32 %v6965_v60, %v3123_v62 }
 0x873   :  { %v901_v63 = vrot.slane %v897_v0, %v7221_v37  ;;  %v831_v24 = vadd.f32 %v827_v48, %v756_v5  ;;  %v832_v16 = vadd.f32 %v828_v58, %v757_v6  ;;  %v833_v42 = vadd.f32 %v829_v33, %v758_v27  ;;  %v7224_v0 = vld [vmem:[#allocation30_spill] sm:$0xff] }
 0x874   :  { %v5564_v4 = vpop.eup %5563  ;;  %v834_v17 = vadd.f32 %v830_v34, %v759_v50  ;;  %v3126_v53 = vsub.f32 %v6959_v13, %v3123_v62  ;;  %v3127_v6 = vsub.f32 %v6963_v56, %v3123_v62  ;;  %v3544_v50 = vsub.f32 %v7222_v25, %v3543_v21  ;;  %v7223_v13 = vld [vmem:[#allocation33_spill] sm:$0xff] }
 0x875   :  { %v1764_v43 = vmul.f32 %v5564_v4, %v1763_v39  ;;  %v902_v44 = vmul.f32 %v901_v63, %v890_v59  ;;  %v903_v20 = vmul.f32 %v901_v63, %v891_v40  ;;  %v904_v49 = vmul.f32 %v901_v63, %v892_v51  ;;  %v7225_v51 = vld [vmem:[#allocation32_spill] sm:$0xff] }
 0x876   :  { %v905_v47 = vmul.f32 %v901_v63, %v893_v38  ;;  %v3545_v59 = vsub.f32 %v7223_v13, %v3543_v21  ;;  %v3546_v40 = vsub.f32 %v7224_v0, %v3543_v21  ;;  %v3547_v38 = vsub.f32 %v7225_v51, %v3543_v21 }
 0x877   :  { %v1768_v30 = vrot.slane %v1764_v43, %v7221_v37  ;;  %v906_v3 = vadd.f32 %v902_v44, %v831_v24  ;;  %v907_v10 = vadd.f32 %v903_v20, %v832_v16  ;;  %v908_v14 = vadd.f32 %v904_v49, %v833_v42 }
 0x878   :  { %v5566_v57 = vpop.eup %5565  ;;  %v909_v2 = vadd.f32 %v905_v47, %v834_v17  ;;  %v4206_v17 = vstv %s4474_s0 }
 0x879   :  { %v1769_v32 = vmul.f32 %v1768_v30, %v1757_v11  ;;  %v1770_v15 = vmul.f32 %v1768_v30, %v1758_v8  ;;  %v1771_v39 = vmul.f32 %v1768_v30, %v1759_v41  ;;  %v1772_v26 = vmul.f32 %v1768_v30, %v1760_v12 }
 0x87a   :  { %v3131_v19 = vmul.f32 %v5566_v57, %v3130_v9 }
 0x87b   :  { %v1773_v61 = vadd.f32 %v1769_v32, %v906_v3  ;;  %v1774_v52 = vadd.f32 %v1770_v15, %v907_v10  ;;  %v1775_v23 = vadd.f32 %v1771_v39, %v908_v14  ;;  %v1776_v31 = vadd.f32 %v1772_v26, %v909_v2 }
 0x87c   :  { %v5568_v5 = vpop.eup %5567  ;;  %v3135_v27 = vrot.slane %v3131_v19, %v7221_v37 }
 0x87d   :  { %v3551_v28 = vmul.f32 %v5568_v5, %v3550_v46 }
 0x87e   :  { %v3136_v60 = vmul.f32 %v3135_v27, %v3124_v29  ;;  %v3137_v9 = vmul.f32 %v3135_v27, %v3125_v1  ;;  %v3138_v45 = vmul.f32 %v3135_v27, %v3126_v53  ;;  %v3139_v55 = vmul.f32 %v3135_v27, %v3127_v6 }
 0x87f   :  { %v3555_v56 = vrot.slane %v3551_v28, %v7221_v37 }
 0x880   :  { %v3140_v48 = vadd.f32 %v3136_v60, %v1773_v61  ;;  %v3141_v4 = vadd.f32 %v3137_v9, %v1774_v52  ;;  %v3142_v63 = vadd.f32 %v3138_v45, %v1775_v23  ;;  %v3143_v58 = vadd.f32 %v3139_v55, %v1776_v31 }
 0x881   :  { %v3556_v46 = vmul.f32 %v3555_v56, %v3544_v50  ;;  %v3557_v33 = vmul.f32 %v3555_v56, %v3545_v59  ;;  %v3558_v34 = vmul.f32 %v3555_v56, %v3546_v40  ;;  %v3559_v11 = vmul.f32 %v3555_v56, %v3547_v38 }
 0x883   :  { %v3560_v8 = vadd.f32 %v3556_v46, %v3140_v48  ;;  %v3561_v41 = vadd.f32 %v3557_v33, %v3141_v4  ;;  %v3562_v43 = vadd.f32 %v3558_v34, %v3142_v63  ;;  %v3563_v12 = vadd.f32 %v3559_v11, %v3143_v58 }
 0x8c8   :  { %v4178_v62 = vpop.permute.xlu0 %4177 }
 0x8c9   :  { %v4179_v44 = vadd.f32 %v4178_v62, %v7045_v36 }
 0x8ca   :  { %v4191_v30 = vpop.permute.xlu1 %4190 }
 0x8cb   :  { %v4180_v20 = vmul.f32 0.001953125, %v4179_v44  ;;  %v4192_v21 = vadd.f32 %v4191_v30, %v7047_v54 }
 0x8cd   :  { %v4194_v49 = vmul.f32 %v4180_v20, %v4180_v20  ;;  %v4193_v47 = vmul.f32 0.001953125, %v4192_v21  ;;  %v4199_v42 = vrot.slane %v4180_v20, %v7221_v37 }
 0x8cf   :  { %v4195_v24 = vsub.f32 %v4193_v47, %v4194_v49  ;;  %v4200_v15 = vsub.f32 %v6983_v18, %v4199_v42  ;;  %v4201_v39 = vsub.f32 %v6987_v22, %v4199_v42  ;;  %v4202_v36 = vsub.f32 %v6981_v35, %v4199_v42 }
 0x8d0   :  { %v4203_v26 = vsub.f32 %v6985_v7, %v4199_v42 }
 0x8d1   :  { %v4204_v16 = vadd.f32 1e-05, %v4195_v24 }
 0x8d3   :  { %5569 = vrsqrt.f32 %v4204_v16 }
 0x8dd   :  { %v5570_v57 = vpop.eup %5569 }
 0x8de   :  { %v4207_v32 = vmul.f32 %v5570_v57, %v4206_v17 }
 0x8e0   :  { %v4211_v54 = vrot.slane %v4207_v32, %v7221_v37 }
 0x8e2   :  { %v4212_v29 = vmul.f32 %v4211_v54, %v4200_v15  ;;  %v4213_v1 = vmul.f32 %v4211_v54, %v4201_v39  ;;  %v4214_v19 = vmul.f32 %v4211_v54, %v4202_v36  ;;  %v4215_v3 = vmul.f32 %v4211_v54, %v4203_v26 }
 0x8e4   :  { %v4216_v53 = vadd.f32 %v4212_v29, %v3560_v8  ;;  %v4217_v10 = vadd.f32 %v4213_v1, %v3561_v41  ;;  %v4218_v14 = vadd.f32 %v4214_v19, %v3562_v43  ;;  %v4219_v2 = vadd.f32 %v4215_v3, %v3563_v12 }
 0x8e6   :  { %4220 = vst [vmem:[#allocation15] sm:$0xff] %v4216_v53  ;;  %4221 = vst [vmem:[#allocation15 + $0x8] sm:$0xff] %v4217_v10 }
 0x8e7   :  { %4222 = vst [vmem:[#allocation15 + $0x10] sm:$0xff] %v4218_v14  ;;  %4223 = vst [vmem:[#allocation15 + $0x18] sm:$0xff] %v4219_v2 }
 0x8e8   :  { %5742 = shalt.err (!%p5739_p1)
}
 0x8e9   :  { %s5743_s17 = scalar_lea.hbm %s7148_s12, 512 }
 0x8ea   :  { %p5744_p2 = scmp.ne.s32.totalorder %s7148_s12, %s5743_s17  ;;  %p5747_p3 = scmp.lt.u32.totalorder %s5743_s17, %s7148_s12 }
 0x8ec   :  { %p5749_p4 = pnand %p5747_p3, %p5744_p2 }
 0x8ee   :  { %5752 = shalt.err (!%p5749_p4)
}
 0x8ef   :  { %s5780_s4 = smov 128  }
 0x8f0   :  { %4235 = dma.vmem_to_hbm [thread:$0]  %s4230_s8, 512, %s7148_s12, [#allocation4], %s5780_s4, %s5780_s4, %s5775_s6  }
 0x8f1   :  { %5763 = dma.done.wait [#allocation4], 512  }
 0x8f2   :  { %5764 = vsyncadd [#allocation4], 4294966784 }
 0x8f3   :  { %4239 = vsyncpa [#allocation3], 1 }
 0x8f4   :  { %4240 = vsyncpa [#allocation8], 1 }
 0x8f5   :  { %4241 = vsyncpa [#allocation11], 1 }
 0x8f6   :  { %4242 = vsyncpa [#allocation14], 1 }
 0x8f7   :  { %4243 = vsyncpa [#allocation4], 1 }
 0x8f8   :  { %4244 = vsyncpa [#allocation5], 1 }

</bundles_post_ra>
